<compile_context>
chip_gen: v7x
topology: tpu7x:2x2x1
jax: 0.10.0
libtpu: 0.0.40
codegen_flags: <defaults>
</compile_context>

<pallas_src>
from functools import partial

import jax
import jax.numpy as jnp
from jax import lax
from jax.experimental import pallas as pl
from jax.experimental.pallas import tpu as pltpu


def get_padding(kernel_size, dilation=1):
    return int((kernel_size * dilation - dilation) / 2)


def _round_up(x, m):
    return ((x + m - 1) // m) * m


_TILE_DEFAULTS_CACHE = {}


def _tile_defaults():
    """(max Lout tile, VMEM budget for tile sizing, vmem_limit cap) per TPU gen.

    A failed hardware query falls back to the conservative v7x (64 MiB) sizing
    -- merely smaller tiles on v5e/v6e, never a VMEM OOM on v7x -- and the
    failure is NOT cached, so a later successful query corrects it."""
    if "v" in _TILE_DEFAULTS_CACHE:
        return _TILE_DEFAULTS_CACHE["v"]
    try:
        vmem = int(pltpu.get_tpu_info().vmem_capacity_bytes)
        ok = True
    except Exception:
        vmem, ok = 64 * 1024 * 1024, False
    if vmem <= 64 * 1024 * 1024:                        # v7x-class (64 MiB VMEM)
        val = (512, 20 * 1024 * 1024, 44 * 1024 * 1024)
    else:                                               # v5e / v6e (128 MiB VMEM)
        val = (1024, 40 * 1024 * 1024, 96 * 1024 * 1024)
    if ok:
        _TILE_DEFAULTS_CACHE["v"] = val
    return val


def _conv1d_kernel(x_ref, xh_ref, w_ref, b_ref, o_ref, *,
                   stride, ksize, groups, apply_leaky, neg_slope):
    """One output-length tile of a grouped 1D conv (+ optional leaky relu).

    x_ref  : (B, Lt*stride, Cin)    main input block (padded, channels-last)
    xh_ref : (B, H, Cin)            halo rows (the K - stride overhang)
    w_ref  : (K, Cin//groups, Cout) compact grouped weight, w[k, c, co]
    b_ref  : (1, 1, Cout)
    o_ref  : (B, Lt, Cout)
    """
    B, Lt, Cout = o_ref.shape
    Lin_step = x_ref.shape[1]
    Cin = x_ref.shape[2]
    cig = Cin // groups
    cog = Cout // groups

    def _ds(start, size):
        if stride == 1:
            return pl.ds(start, size)
        return pl.ds(start, size, stride=stride)

    def read_tap(k):
        # Rows k, k+stride, ..., k+(Lt-1)*stride read straight from the two
        # input refs (no VMEM->VMEM window copy, no im2col buffer).
        if k < Lin_step:
            n_main = min(Lt, (Lin_step - 1 - k) // stride + 1)
        else:
            n_main = 0
        parts = []
        if n_main > 0:
            parts.append(x_ref[:, _ds(k, n_main), :])
        n_halo = Lt - n_main
        if n_halo > 0:
            off = k + n_main * stride - Lin_step
            parts.append(xh_ref[:, _ds(off, n_halo), :])
        tap = parts[0] if len(parts) == 1 else jnp.concatenate(parts, axis=1)
        return tap.reshape(B * Lt, Cin)                 # flatten: one long MXU stream

    # K (x groups) accumulated dots in f32.
    accs = [jnp.zeros((B * Lt, cog), jnp.float32) for _ in range(groups)]
    for k in range(ksize):
        tap = read_tap(k)
        wk = w_ref[k]                                   # (cig, Cout)
        if groups == 1 and Cin == 1:
            # First CoMBD layer: pure-VPU FIR (an MXU pass would use <1% width).
            accs[0] = accs[0] + tap.astype(jnp.float32) * wk.astype(jnp.float32)
        else:
            for g in range(groups):
                lhs = tap if groups == 1 else tap[:, g * cig:(g + 1) * cig]
                rhs = wk if groups == 1 else wk[:, g * cog:(g + 1) * cog]
                accs[g] = accs[g] + lax.dot_general(
                    lhs, rhs, (((1,), (0,)), ((), ())),
                    preferred_element_type=jnp.float32)

    y = accs[0] if groups == 1 else jnp.concatenate(accs, axis=-1)   # (B*Lt, Cout)
    y = y + b_ref[...].reshape(1, Cout).astype(jnp.float32)          # f32 epilogue
    if apply_leaky:
        y = jnp.where(y >= 0, y, neg_slope * y)
    o_ref[...] = y.reshape(B, Lt, Cout).astype(o_ref.dtype)


def conv1d_pallas(x_blc, weight, bias, *, stride, groups, padding, apply_leaky,
                  neg_slope=0.1, max_lout_tile=None):
    """Grouped Conv1d (+ optional leaky_relu) on channels-last input.

    x_blc : (B, L, C_in)   weight: (C_out, C_in//groups, K) (PyTorch layout)."""
    B, L, Cin = x_blc.shape
    Cout, cig, K = weight.shape
    assert Cin == cig * groups and Cout % groups == 0
    cog = Cout // groups

    Lpad_true = L + 2 * padding
    Lout = (Lpad_true - K) // stride + 1
    assert Lout > 0

    default_tile, tile_budget, vmem_cap = _tile_defaults()
    if max_lout_tile is None:
        max_lout_tile = default_tile

    bpe = jnp.dtype(x_blc.dtype).itemsize
    wbpe = jnp.dtype(weight.dtype).itemsize
    H = _round_up(max(K - stride, 1), 8)               # halo rows (sublane multiple)

    def vmem_est(lt):
        lin = lt * stride
        cout_l = _round_up(Cout, 128)                  # lane-padded accumulator width
        cin_l = _round_up(Cin, 128)
        return (2 * B * lin * Cin * bpe                # main block, double buffered
                + 2 * B * H * Cin * bpe                # halo block
                + 2 * B * lt * Cout * bpe              # output block
                + 2 * K * max(cig, 8) * cout_l * wbpe  # compact weight (resident)
                + 2 * 8 * cout_l * wbpe                # bias
                + B * lt * cout_l * 4                  # f32 accumulator values
                + B * lt * cin_l * bpe)                # tap temporaries

    # Output-length tile: as large as the per-generation VMEM budget allows,
    # a multiple of H so the halo BlockSpec lands on exact block boundaries.
    Lt = _round_up(min(max_lout_tile, Lout), H)
    while vmem_est(Lt) > tile_budget and Lt > H:
        Lt = max(H, _round_up(Lt // 2, H))

    nt = (Lout + Lt - 1) // Lt
    Lout_pad = nt * Lt
    Lin_step = Lt * stride
    assert Lin_step % H == 0
    hs = Lin_step // H                                 # halo block-index step
    Ltot = max(nt * Lin_step + H, Lpad_true)

    xp = jnp.pad(x_blc, ((0, 0), (padding, Ltot - L - padding), (0, 0)))
    wt = jnp.transpose(weight, (2, 1, 0))              # (K, cig, Cout) compact grouped weight
    b3 = bias.reshape(1, 1, Cout)

    kernel = partial(_conv1d_kernel, stride=stride, ksize=K, groups=groups,
                     apply_leaky=apply_leaky, neg_slope=neg_slope)

    flops = 2 * B * Lout_pad * K * cig * Cout          # true grouped FLOPs
    bytes_accessed = int(bpe * (B * Ltot * Cin + nt * B * H * Cin + B * Lout_pad * Cout)
                         + wt.size * wbpe + Cout * jnp.dtype(bias.dtype).itemsize)

    out = pl.pallas_call(
        kernel,
        out_shape=jax.ShapeDtypeStruct((B, Lout_pad, Cout), x_blc.dtype),
        grid=(nt,),
        in_specs=[
            pl.BlockSpec((B, Lin_step, Cin), lambda i: (0, i, 0)),        # main block
            pl.BlockSpec((B, H, Cin), lambda i: (0, (i + 1) * hs, 0)),    # halo rows
            pl.BlockSpec((K, cig, Cout), lambda i: (0, 0, 0)),            # weight (resident)
            pl.BlockSpec((1, 1, Cout), lambda i: (0, 0, 0)),              # bias
        ],
        out_specs=pl.BlockSpec((B, Lt, Cout), lambda i: (0, i, 0)),
        compiler_params=pltpu.CompilerParams(
            dimension_semantics=("parallel",),
            vmem_limit_bytes=int(min(vmem_cap, max(32 * 1024 * 1024, 6 * vmem_est(Lt)))),
        ),
        cost_estimate=pl.CostEstimate(flops=flops, transcendentals=0,
                                      bytes_accessed=bytes_accessed),
    )(xp, xp, wt, b3)

    return out[:, :Lout, :]


def init_combd_params(key, filters, kernels, groups):
    """Deterministic parameter init matching PyTorch Conv1d shapes."""
    params = {"convs": [], "post": None}
    init_channel = 1
    for f, k, g in zip(filters, kernels, groups):
        key, kw, kb = jax.random.split(key, 3)
        w = 0.1 * jax.random.normal(kw, (f, init_channel // g, k), jnp.float32)
        b = 0.1 * jax.random.normal(kb, (f,), jnp.float32)
        params["convs"].append((w, b))
        init_channel = f
    key, kw, kb = jax.random.split(key, 3)
    wp = 0.1 * jax.random.normal(kw, (1, filters[-1], 3), jnp.float32)
    bp = 0.1 * jax.random.normal(kb, (1,), jnp.float32)
    params["post"] = (wp, bp)
    return params


def combd_forward(x_ncl, params, kernels, groups, strides, compute_dtype=None):
    """x_ncl: (B, 1, L) NCL.  Returns (flattened_out, fmap) like torch.

    compute_dtype: set jnp.bfloat16 on v6e/v7x to halve HBM/VMEM bytes
    (f32 accumulation is kept inside the kernel)."""
    if compute_dtype is None:
        compute_dtype = x_ncl.dtype
    fmap = []
    h = jnp.transpose(x_ncl, (0, 2, 1)).astype(compute_dtype)   # (B, L, C) channels-last
    for (w, b), k, g, s in zip(params["convs"], kernels, groups, strides):
        h = conv1d_pallas(h, w.astype(compute_dtype), b, stride=s, groups=g,
                          padding=get_padding(k, 1), apply_leaky=True)
        # TODO(synk): emit this NCL fmap directly from the kernel (second output).
        fmap.append(jnp.transpose(h, (0, 2, 1)))
    wp, bp = params["post"]
    h = conv1d_pallas(h, wp.astype(compute_dtype), bp, stride=1, groups=1,
                      padding=get_padding(3, 1), apply_leaky=False)
    out = h[:, :, 0]                                   # (B, L_out) == torch.flatten(x, 1, -1)
    return out, fmap


# ----------------------- plain-JAX reference (for checking) -----------------------

def _conv1d_ref(x_ncl, w, b, stride, groups, padding):
    y = lax.conv_general_dilated(
        x_ncl, w, window_strides=(stride,), padding=[(padding, padding)],
        dimension_numbers=("NCH", "OIH", "NCH"), feature_group_count=groups,
        precision=lax.Precision.HIGHEST)
    return y + b.reshape(1, -1, 1)


def combd_forward_ref(x_ncl, params, kernels, groups, strides):
    fmap = []
    h = x_ncl
    for (w, b), k, g, s in zip(params["convs"], kernels, groups, strides):
        h = _conv1d_ref(h, w, b, s, g, get_padding(k, 1))
        h = jnp.where(h >= 0, h, 0.1 * h)
        fmap.append(h)
    wp, bp = params["post"]
    h = _conv1d_ref(h, wp, bp, 1, 1, get_padding(3, 1))
    return h.reshape(h.shape[0], -1), fmap


if __name__ == "__main__":
    # Small CoMBD config (filters / kernels / groups / strides per layer).
    filters = [4, 8, 16]
    kernels = [5, 5, 5]
    groups = [1, 2, 4]
    strides = [1, 2, 2]

    key = jax.random.PRNGKey(0)
    key, kx = jax.random.split(key)
    x = jax.random.normal(kx, (2, 1, 64), jnp.float32)   # (B=2, C=1, L=64), NCL

    params = init_combd_params(key, filters, kernels, groups)

    fwd = jax.jit(lambda xx, pp: combd_forward(xx, pp, kernels, groups, strides))
    out, fmap = fwd(x, params)
    out = jax.block_until_ready(out)
    fmap = [jax.block_until_ready(f) for f in fmap]

    # Shape sanity checks (mirror PyTorch conv arithmetic).
    assert out.shape == (2, 16), out.shape
    assert [f.shape for f in fmap] == [(2, 4, 64), (2, 8, 32), (2, 16, 16)]
    assert bool(jnp.all(jnp.isfinite(out)))
    assert all(bool(jnp.all(jnp.isfinite(f))) for f in fmap)

    # Numerical check vs plain-JAX grouped conv reference.
    # f32 activations + f32 accumulation: much tighter tolerance than before
    # (review: 5e-2 could mask halo/tap off-by-one bugs).
    out_ref, fmap_ref = combd_forward_ref(x, params, kernels, groups, strides)
    assert jnp.allclose(out, out_ref, atol=2e-3, rtol=2e-3), \
        float(jnp.max(jnp.abs(out - out_ref)))
    for f, fr in zip(fmap, fmap_ref):
        assert jnp.allclose(f, fr, atol=2e-3, rtol=2e-3), \
            float(jnp.max(jnp.abs(f - fr)))

    print("KERNEL_OK")
</pallas_src>

<mosaic_0001>
module attributes {stable_mosaic.version = 11 : i64} {
  func.func @_conv1d_kernel(%arg0: i32, %arg1: memref<2x64x1xf32, #tpu.memory_space<vmem>>, %arg2: memref<2x8x1xf32, #tpu.memory_space<vmem>>, %arg3: memref<5x1x4xf32, #tpu.memory_space<vmem>>, %arg4: memref<1x1x4xf32, #tpu.memory_space<vmem>>, %arg5: memref<2x64x4xf32, #tpu.memory_space<vmem>>) attributes {dimension_semantics = [#tpu.dimension_semantics<parallel>], iteration_bounds = array<i64: 1>, scalar_prefetch = 0 : i64, scratch_operands = 0 : i64, tpu.core_type = #tpu.core_type<tc>, window_params = [{transform_indices = @transform_0, window_bounds = array<i64: 2, 64, 1>}, {transform_indices = @transform_1, window_bounds = array<i64: 2, 8, 1>}, {pipeline_mode = #tpu.pipeline_mode<synchronous>, transform_indices = @transform_2, window_bounds = array<i64: 5, 1, 4>}, {pipeline_mode = #tpu.pipeline_mode<synchronous>, transform_indices = @transform_3, window_bounds = array<i64: 1, 1, 4>}, {transform_indices = @transform_4, window_bounds = array<i64: 2, 64, 4>}]} {
    %cst = arith.constant 0.000000e+00 : f32
    %0 = vector.broadcast %cst : f32 to vector<128x4xf32>
    %c0 = arith.constant 0 : index
    %c0_0 = arith.constant 0 : index
    %c0_1 = arith.constant 0 : index
    %1 = vector.load %arg1[%c0, %c0_0, %c0_1] : memref<2x64x1xf32, #tpu.memory_space<vmem>>, vector<2x64x1xf32>
    %2 = vector.shape_cast %1 : vector<2x64x1xf32> to vector<128x1xf32>
    %c0_2 = arith.constant 0 : index
    %c0_3 = arith.constant 0 : index
    %c0_4 = arith.constant 0 : index
    %3 = vector.load %arg3[%c0_2, %c0_3, %c0_4] : memref<5x1x4xf32, #tpu.memory_space<vmem>>, vector<1x1x4xf32>
    %4 = vector.shape_cast %3 : vector<1x1x4xf32> to vector<1x4xf32>
    %5 = vector.broadcast %2 : vector<128x1xf32> to vector<128x4xf32>
    %6 = vector.broadcast %4 : vector<1x4xf32> to vector<128x4xf32>
    %7 = arith.mulf %5, %6 : vector<128x4xf32>
    %8 = arith.addf %0, %7 : vector<128x4xf32>
    %c0_5 = arith.constant 0 : index
    %c1 = arith.constant 1 : index
    %c0_6 = arith.constant 0 : index
    %9 = vector.load %arg1[%c0_5, %c1, %c0_6] : memref<2x64x1xf32, #tpu.memory_space<vmem>>, vector<2x63x1xf32>
    %c0_7 = arith.constant 0 : index
    %c0_8 = arith.constant 0 : index
    %c0_9 = arith.constant 0 : index
    %10 = vector.load %arg2[%c0_7, %c0_8, %c0_9] : memref<2x8x1xf32, #tpu.memory_space<vmem>>, vector<2x1x1xf32>
    %11 = tpu.concatenate %9, %10 in 1 : vector<2x63x1xf32>, vector<2x1x1xf32> -> vector<2x64x1xf32>
    %12 = vector.shape_cast %11 : vector<2x64x1xf32> to vector<128x1xf32>
    %c1_10 = arith.constant 1 : index
    %c0_11 = arith.constant 0 : index
    %c0_12 = arith.constant 0 : index
    %13 = vector.load %arg3[%c1_10, %c0_11, %c0_12] : memref<5x1x4xf32, #tpu.memory_space<vmem>>, vector<1x1x4xf32>
    %14 = vector.shape_cast %13 : vector<1x1x4xf32> to vector<1x4xf32>
    %15 = vector.broadcast %12 : vector<128x1xf32> to vector<128x4xf32>
    %16 = vector.broadcast %14 : vector<1x4xf32> to vector<128x4xf32>
    %17 = arith.mulf %15, %16 : vector<128x4xf32>
    %18 = arith.addf %8, %17 : vector<128x4xf32>
    %c0_13 = arith.constant 0 : index
    %c2 = arith.constant 2 : index
    %c0_14 = arith.constant 0 : index
    %19 = vector.load %arg1[%c0_13, %c2, %c0_14] : memref<2x64x1xf32, #tpu.memory_space<vmem>>, vector<2x62x1xf32>
    %c0_15 = arith.constant 0 : index
    %c0_16 = arith.constant 0 : index
    %c0_17 = arith.constant 0 : index
    %20 = vector.load %arg2[%c0_15, %c0_16, %c0_17] : memref<2x8x1xf32, #tpu.memory_space<vmem>>, vector<2x2x1xf32>
    %21 = tpu.concatenate %19, %20 in 1 : vector<2x62x1xf32>, vector<2x2x1xf32> -> vector<2x64x1xf32>
    %22 = vector.shape_cast %21 : vector<2x64x1xf32> to vector<128x1xf32>
    %c2_18 = arith.constant 2 : index
    %c0_19 = arith.constant 0 : index
    %c0_20 = arith.constant 0 : index
    %23 = vector.load %arg3[%c2_18, %c0_19, %c0_20] : memref<5x1x4xf32, #tpu.memory_space<vmem>>, vector<1x1x4xf32>
    %24 = vector.shape_cast %23 : vector<1x1x4xf32> to vector<1x4xf32>
    %25 = vector.broadcast %22 : vector<128x1xf32> to vector<128x4xf32>
    %26 = vector.broadcast %24 : vector<1x4xf32> to vector<128x4xf32>
    %27 = arith.mulf %25, %26 : vector<128x4xf32>
    %28 = arith.addf %18, %27 : vector<128x4xf32>
    %c0_21 = arith.constant 0 : index
    %c3 = arith.constant 3 : index
    %c0_22 = arith.constant 0 : index
    %29 = vector.load %arg1[%c0_21, %c3, %c0_22] : memref<2x64x1xf32, #tpu.memory_space<vmem>>, vector<2x61x1xf32>
    %c0_23 = arith.constant 0 : index
    %c0_24 = arith.constant 0 : index
    %c0_25 = arith.constant 0 : index
    %30 = vector.load %arg2[%c0_23, %c0_24, %c0_25] : memref<2x8x1xf32, #tpu.memory_space<vmem>>, vector<2x3x1xf32>
    %31 = tpu.concatenate %29, %30 in 1 : vector<2x61x1xf32>, vector<2x3x1xf32> -> vector<2x64x1xf32>
    %32 = vector.shape_cast %31 : vector<2x64x1xf32> to vector<128x1xf32>
    %c3_26 = arith.constant 3 : index
    %c0_27 = arith.constant 0 : index
    %c0_28 = arith.constant 0 : index
    %33 = vector.load %arg3[%c3_26, %c0_27, %c0_28] : memref<5x1x4xf32, #tpu.memory_space<vmem>>, vector<1x1x4xf32>
    %34 = vector.shape_cast %33 : vector<1x1x4xf32> to vector<1x4xf32>
    %35 = vector.broadcast %32 : vector<128x1xf32> to vector<128x4xf32>
    %36 = vector.broadcast %34 : vector<1x4xf32> to vector<128x4xf32>
    %37 = arith.mulf %35, %36 : vector<128x4xf32>
    %38 = arith.addf %28, %37 : vector<128x4xf32>
    %c0_29 = arith.constant 0 : index
    %c4 = arith.constant 4 : index
    %c0_30 = arith.constant 0 : index
    %39 = vector.load %arg1[%c0_29, %c4, %c0_30] : memref<2x64x1xf32, #tpu.memory_space<vmem>>, vector<2x60x1xf32>
    %c0_31 = arith.constant 0 : index
    %c0_32 = arith.constant 0 : index
    %c0_33 = arith.constant 0 : index
    %40 = vector.load %arg2[%c0_31, %c0_32, %c0_33] : memref<2x8x1xf32, #tpu.memory_space<vmem>>, vector<2x4x1xf32>
    %41 = tpu.concatenate %39, %40 in 1 : vector<2x60x1xf32>, vector<2x4x1xf32> -> vector<2x64x1xf32>
    %42 = vector.shape_cast %41 : vector<2x64x1xf32> to vector<128x1xf32>
    %c4_34 = arith.constant 4 : index
    %c0_35 = arith.constant 0 : index
    %c0_36 = arith.constant 0 : index
    %43 = vector.load %arg3[%c4_34, %c0_35, %c0_36] : memref<5x1x4xf32, #tpu.memory_space<vmem>>, vector<1x1x4xf32>
    %44 = vector.shape_cast %43 : vector<1x1x4xf32> to vector<1x4xf32>
    %45 = vector.broadcast %42 : vector<128x1xf32> to vector<128x4xf32>
    %46 = vector.broadcast %44 : vector<1x4xf32> to vector<128x4xf32>
    %47 = arith.mulf %45, %46 : vector<128x4xf32>
    %48 = arith.addf %38, %47 : vector<128x4xf32>
    %c0_37 = arith.constant 0 : index
    %c0_38 = arith.constant 0 : index
    %c0_39 = arith.constant 0 : index
    %49 = vector.load %arg4[%c0_37, %c0_38, %c0_39] : memref<1x1x4xf32, #tpu.memory_space<vmem>>, vector<1x1x4xf32>
    %50 = vector.shape_cast %49 : vector<1x1x4xf32> to vector<1x4xf32>
    %51 = vector.broadcast %50 : vector<1x4xf32> to vector<128x4xf32>
    %52 = arith.addf %48, %51 : vector<128x4xf32>
    %cst_40 = arith.constant 0.000000e+00 : f32
    %53 = vector.broadcast %cst_40 : f32 to vector<128x4xf32>
    %54 = arith.cmpf oge, %52, %53 : vector<128x4xf32>
    %cst_41 = arith.constant 1.000000e-01 : f32
    %55 = vector.broadcast %cst_41 : f32 to vector<128x4xf32>
    %56 = arith.mulf %55, %52 : vector<128x4xf32>
    %57 = arith.select %54, %52, %56 : vector<128x4xi1>, vector<128x4xf32>
    %58 = vector.shape_cast %57 : vector<128x4xf32> to vector<2x64x4xf32>
    %c0_42 = arith.constant 0 : index
    %c0_43 = arith.constant 0 : index
    %c0_44 = arith.constant 0 : index
    %59 = vector.load %arg5[%c0_42, %c0_43, %c0_44] : memref<2x64x4xf32, #tpu.memory_space<vmem>>, vector<2x64x4xf32>
    tpu.vector_store %arg5[%c0_42, %c0_43, %c0_44], %58 {strides = array<i32>} : memref<2x64x4xf32, #tpu.memory_space<vmem>>, vector<2x64x4xf32>,
    return
  }
  func.func @transform_0(%arg0: i32) -> (i32, i32, i32) {
    %c0_i32 = arith.constant 0 : i32
    %c0_i32_0 = arith.constant 0 : i32
    %c0_i32_1 = arith.constant 0 : i32
    return %c0_i32, %arg0, %c0_i32_0 : i32, i32, i32
  }
  func.func @transform_1(%arg0: i32) -> (i32, i32, i32) {
    %c1_i32 = arith.constant 1 : i32
    %0 = arith.addi %arg0, %c1_i32 : i32
    %c8_i32 = arith.constant 8 : i32
    %1 = arith.muli %0, %c8_i32 : i32
    %c0_i32 = arith.constant 0 : i32
    %c0_i32_0 = arith.constant 0 : i32
    %c0_i32_1 = arith.constant 0 : i32
    return %c0_i32, %1, %c0_i32_0 : i32, i32, i32
  }
  func.func @transform_2(%arg0: i32) -> (i32, i32, i32) {
    %c0_i32 = arith.constant 0 : i32
    %c0_i32_0 = arith.constant 0 : i32
    %c0_i32_1 = arith.constant 0 : i32
    %c0_i32_2 = arith.constant 0 : i32
    return %c0_i32, %c0_i32_0, %c0_i32_1 : i32, i32, i32
  }
  func.func @transform_3(%arg0: i32) -> (i32, i32, i32) {
    %c0_i32 = arith.constant 0 : i32
    %c0_i32_0 = arith.constant 0 : i32
    %c0_i32_1 = arith.constant 0 : i32
    %c0_i32_2 = arith.constant 0 : i32
    return %c0_i32, %c0_i32_0, %c0_i32_1 : i32, i32, i32
  }
  func.func @transform_4(%arg0: i32) -> (i32, i32, i32) {
    %c0_i32 = arith.constant 0 : i32
    %c0_i32_0 = arith.constant 0 : i32
    %c0_i32_1 = arith.constant 0 : i32
    return %c0_i32, %arg0, %c0_i32_0 : i32, i32, i32
  }
}

module attributes {stable_mosaic.version = 11 : i64} {
  func.func @_conv1d_kernel(%arg0: i32, %arg1: memref<2x64x4xf32, #tpu.memory_space<vmem>>, %arg2: memref<2x8x4xf32, #tpu.memory_space<vmem>>, %arg3: memref<5x2x8xf32, #tpu.memory_space<vmem>>, %arg4: memref<1x1x8xf32, #tpu.memory_space<vmem>>, %arg5: memref<2x32x8xf32, #tpu.memory_space<vmem>>) attributes {dimension_semantics = [#tpu.dimension_semantics<parallel>], iteration_bounds = array<i64: 1>, scalar_prefetch = 0 : i64, scratch_operands = 0 : i64, tpu.core_type = #tpu.core_type<tc>, window_params = [{transform_indices = @transform_0, window_bounds = array<i64: 2, 64, 4>}, {transform_indices = @transform_1, window_bounds = array<i64: 2, 8, 4>}, {pipeline_mode = #tpu.pipeline_mode<synchronous>, transform_indices = @transform_2, window_bounds = array<i64: 5, 2, 8>}, {pipeline_mode = #tpu.pipeline_mode<synchronous>, transform_indices = @transform_3, window_bounds = array<i64: 1, 1, 8>}, {transform_indices = @transform_4, window_bounds = array<i64: 2, 32, 8>}]} {
    %cst = arith.constant 0.000000e+00 : f32
    %0 = vector.broadcast %cst : f32 to vector<64x4xf32>
    %cst_0 = arith.constant 0.000000e+00 : f32
    %1 = vector.broadcast %cst_0 : f32 to vector<64x4xf32>
    %c0 = arith.constant 0 : index
    %c0_1 = arith.constant 0 : index
    %c0_2 = arith.constant 0 : index
    %2 = tpu.strided_load %arg1[%c0, %c0_1, %c0_2] {strides = array<i32: 1, 2, 1>} : memref<2x64x4xf32, #tpu.memory_space<vmem>>, vector<2x32x4xf32>
    %3 = vector.shape_cast %2 : vector<2x32x4xf32> to vector<64x4xf32>
    %c0_3 = arith.constant 0 : index
    %c0_4 = arith.constant 0 : index
    %c0_5 = arith.constant 0 : index
    %4 = vector.load %arg3[%c0_3, %c0_4, %c0_5] : memref<5x2x8xf32, #tpu.memory_space<vmem>>, vector<1x2x8xf32>
    %5 = vector.shape_cast %4 : vector<1x2x8xf32> to vector<2x8xf32>
    %6 = vector.extract_strided_slice %3 {offsets = [0, 0], sizes = [64, 2], strides = [1, 1]} : vector<64x4xf32> to vector<64x2xf32>
    %7 = vector.extract_strided_slice %5 {offsets = [0, 0], sizes = [2, 4], strides = [1, 1]} : vector<2x8xf32> to vector<2x4xf32>
    %cst_6 = arith.constant dense<0.000000e+00> : vector<64x4xf32>
    %8 = tpu.matmul %6, %7, %cst_6 {dimension_numbers = #tpu.dot_dimension_numbers<[1], [0], [0], [1], [0, 0, 1, 1], [], []>} : vector<64x2xf32>, vector<2x4xf32>, vector<64x4xf32> -> vector<64x4xf32>
    %9 = arith.addf %0, %8 : vector<64x4xf32>
    %10 = vector.extract_strided_slice %3 {offsets = [0, 2], sizes = [64, 2], strides = [1, 1]} : vector<64x4xf32> to vector<64x2xf32>
    %11 = vector.extract_strided_slice %5 {offsets = [0, 4], sizes = [2, 4], strides = [1, 1]} : vector<2x8xf32> to vector<2x4xf32>
    %cst_7 = arith.constant dense<0.000000e+00> : vector<64x4xf32>
    %12 = tpu.matmul %10, %11, %cst_7 {dimension_numbers = #tpu.dot_dimension_numbers<[1], [0], [0], [1], [0, 0, 1, 1], [], []>} : vector<64x2xf32>, vector<2x4xf32>, vector<64x4xf32> -> vector<64x4xf32>
    %13 = arith.addf %1, %12 : vector<64x4xf32>
    %c0_8 = arith.constant 0 : index
    %c1 = arith.constant 1 : index
    %c0_9 = arith.constant 0 : index
    %14 = tpu.strided_load %arg1[%c0_8, %c1, %c0_9] {strides = array<i32: 1, 2, 1>} : memref<2x64x4xf32, #tpu.memory_space<vmem>>, vector<2x32x4xf32>
    %15 = vector.shape_cast %14 : vector<2x32x4xf32> to vector<64x4xf32>
    %c1_10 = arith.constant 1 : index
    %c0_11 = arith.constant 0 : index
    %c0_12 = arith.constant 0 : index
    %16 = vector.load %arg3[%c1_10, %c0_11, %c0_12] : memref<5x2x8xf32, #tpu.memory_space<vmem>>, vector<1x2x8xf32>
    %17 = vector.shape_cast %16 : vector<1x2x8xf32> to vector<2x8xf32>
    %18 = vector.extract_strided_slice %15 {offsets = [0, 0], sizes = [64, 2], strides = [1, 1]} : vector<64x4xf32> to vector<64x2xf32>
    %19 = vector.extract_strided_slice %17 {offsets = [0, 0], sizes = [2, 4], strides = [1, 1]} : vector<2x8xf32> to vector<2x4xf32>
    %cst_13 = arith.constant dense<0.000000e+00> : vector<64x4xf32>
    %20 = tpu.matmul %18, %19, %cst_13 {dimension_numbers = #tpu.dot_dimension_numbers<[1], [0], [0], [1], [0, 0, 1, 1], [], []>} : vector<64x2xf32>, vector<2x4xf32>, vector<64x4xf32> -> vector<64x4xf32>
    %21 = arith.addf %9, %20 : vector<64x4xf32>
    %22 = vector.extract_strided_slice %15 {offsets = [0, 2], sizes = [64, 2], strides = [1, 1]} : vector<64x4xf32> to vector<64x2xf32>
    %23 = vector.extract_strided_slice %17 {offsets = [0, 4], sizes = [2, 4], strides = [1, 1]} : vector<2x8xf32> to vector<2x4xf32>
    %cst_14 = arith.constant dense<0.000000e+00> : vector<64x4xf32>
    %24 = tpu.matmul %22, %23, %cst_14 {dimension_numbers = #tpu.dot_dimension_numbers<[1], [0], [0], [1], [0, 0, 1, 1], [], []>} : vector<64x2xf32>, vector<2x4xf32>, vector<64x4xf32> -> vector<64x4xf32>
    %25 = arith.addf %13, %24 : vector<64x4xf32>
    %c0_15 = arith.constant 0 : index
    %c2 = arith.constant 2 : index
    %c0_16 = arith.constant 0 : index
    %26 = tpu.strided_load %arg1[%c0_15, %c2, %c0_16] {strides = array<i32: 1, 2, 1>} : memref<2x64x4xf32, #tpu.memory_space<vmem>>, vector<2x31x4xf32>
    %c0_17 = arith.constant 0 : index
    %c0_18 = arith.constant 0 : index
    %c0_19 = arith.constant 0 : index
    %27 = tpu.strided_load %arg2[%c0_17, %c0_18, %c0_19] {strides = array<i32: 1, 2, 1>} : memref<2x8x4xf32, #tpu.memory_space<vmem>>, vector<2x1x4xf32>
    %28 = tpu.concatenate %26, %27 in 1 : vector<2x31x4xf32>, vector<2x1x4xf32> -> vector<2x32x4xf32>
    %29 = vector.shape_cast %28 : vector<2x32x4xf32> to vector<64x4xf32>
    %c2_20 = arith.constant 2 : index
    %c0_21 = arith.constant 0 : index
    %c0_22 = arith.constant 0 : index
    %30 = vector.load %arg3[%c2_20, %c0_21, %c0_22] : memref<5x2x8xf32, #tpu.memory_space<vmem>>, vector<1x2x8xf32>
    %31 = vector.shape_cast %30 : vector<1x2x8xf32> to vector<2x8xf32>
    %32 = vector.extract_strided_slice %29 {offsets = [0, 0], sizes = [64, 2], strides = [1, 1]} : vector<64x4xf32> to vector<64x2xf32>
    %33 = vector.extract_strided_slice %31 {offsets = [0, 0], sizes = [2, 4], strides = [1, 1]} : vector<2x8xf32> to vector<2x4xf32>
    %cst_23 = arith.constant dense<0.000000e+00> : vector<64x4xf32>
    %34 = tpu.matmul %32, %33, %cst_23 {dimension_numbers = #tpu.dot_dimension_numbers<[1], [0], [0], [1], [0, 0, 1, 1], [], []>} : vector<64x2xf32>, vector<2x4xf32>, vector<64x4xf32> -> vector<64x4xf32>
    %35 = arith.addf %21, %34 : vector<64x4xf32>
    %36 = vector.extract_strided_slice %29 {offsets = [0, 2], sizes = [64, 2], strides = [1, 1]} : vector<64x4xf32> to vector<64x2xf32>
    %37 = vector.extract_strided_slice %31 {offsets = [0, 4], sizes = [2, 4], strides = [1, 1]} : vector<2x8xf32> to vector<2x4xf32>
    %cst_24 = arith.constant dense<0.000000e+00> : vector<64x4xf32>
    %38 = tpu.matmul %36, %37, %cst_24 {dimension_numbers = #tpu.dot_dimension_numbers<[1], [0], [0], [1], [0, 0, 1, 1], [], []>} : vector<64x2xf32>, vector<2x4xf32>, vector<64x4xf32> -> vector<64x4xf32>
    %39 = arith.addf %25, %38 : vector<64x4xf32>
    %c0_25 = arith.constant 0 : index
    %c3 = arith.constant 3 : index
    %c0_26 = arith.constant 0 : index
    %40 = tpu.strided_load %arg1[%c0_25, %c3, %c0_26] {strides = array<i32: 1, 2, 1>} : memref<2x64x4xf32, #tpu.memory_space<vmem>>, vector<2x31x4xf32>
    %c0_27 = arith.constant 0 : index
    %c1_28 = arith.constant 1 : index
    %c0_29 = arith.constant 0 : index
    %41 = tpu.strided_load %arg2[%c0_27, %c1_28, %c0_29] {strides = array<i32: 1, 2, 1>} : memref<2x8x4xf32, #tpu.memory_space<vmem>>, vector<2x1x4xf32>
    %42 = tpu.concatenate %40, %41 in 1 : vector<2x31x4xf32>, vector<2x1x4xf32> -> vector<2x32x4xf32>
    %43 = vector.shape_cast %42 : vector<2x32x4xf32> to vector<64x4xf32>
    %c3_30 = arith.constant 3 : index
    %c0_31 = arith.constant 0 : index
    %c0_32 = arith.constant 0 : index
    %44 = vector.load %arg3[%c3_30, %c0_31, %c0_32] : memref<5x2x8xf32, #tpu.memory_space<vmem>>, vector<1x2x8xf32>
    %45 = vector.shape_cast %44 : vector<1x2x8xf32> to vector<2x8xf32>
    %46 = vector.extract_strided_slice %43 {offsets = [0, 0], sizes = [64, 2], strides = [1, 1]} : vector<64x4xf32> to vector<64x2xf32>
    %47 = vector.extract_strided_slice %45 {offsets = [0, 0], sizes = [2, 4], strides = [1, 1]} : vector<2x8xf32> to vector<2x4xf32>
    %cst_33 = arith.constant dense<0.000000e+00> : vector<64x4xf32>
    %48 = tpu.matmul %46, %47, %cst_33 {dimension_numbers = #tpu.dot_dimension_numbers<[1], [0], [0], [1], [0, 0, 1, 1], [], []>} : vector<64x2xf32>, vector<2x4xf32>, vector<64x4xf32> -> vector<64x4xf32>
    %49 = arith.addf %35, %48 : vector<64x4xf32>
    %50 = vector.extract_strided_slice %43 {offsets = [0, 2], sizes = [64, 2], strides = [1, 1]} : vector<64x4xf32> to vector<64x2xf32>
    %51 = vector.extract_strided_slice %45 {offsets = [0, 4], sizes = [2, 4], strides = [1, 1]} : vector<2x8xf32> to vector<2x4xf32>
    %cst_34 = arith.constant dense<0.000000e+00> : vector<64x4xf32>
    %52 = tpu.matmul %50, %51, %cst_34 {dimension_numbers = #tpu.dot_dimension_numbers<[1], [0], [0], [1], [0, 0, 1, 1], [], []>} : vector<64x2xf32>, vector<2x4xf32>, vector<64x4xf32> -> vector<64x4xf32>
    %53 = arith.addf %39, %52 : vector<64x4xf32>
    %c0_35 = arith.constant 0 : index
    %c4 = arith.constant 4 : index
    %c0_36 = arith.constant 0 : index
    %54 = tpu.strided_load %arg1[%c0_35, %c4, %c0_36] {strides = array<i32: 1, 2, 1>} : memref<2x64x4xf32, #tpu.memory_space<vmem>>, vector<2x30x4xf32>
    %c0_37 = arith.constant 0 : index
    %c0_38 = arith.constant 0 : index
    %c0_39 = arith.constant 0 : index
    %55 = tpu.strided_load %arg2[%c0_37, %c0_38, %c0_39] {strides = array<i32: 1, 2, 1>} : memref<2x8x4xf32, #tpu.memory_space<vmem>>, vector<2x2x4xf32>
    %56 = tpu.concatenate %54, %55 in 1 : vector<2x30x4xf32>, vector<2x2x4xf32> -> vector<2x32x4xf32>
    %57 = vector.shape_cast %56 : vector<2x32x4xf32> to vector<64x4xf32>
    %c4_40 = arith.constant 4 : index
    %c0_41 = arith.constant 0 : index
    %c0_42 = arith.constant 0 : index
    %58 = vector.load %arg3[%c4_40, %c0_41, %c0_42] : memref<5x2x8xf32, #tpu.memory_space<vmem>>, vector<1x2x8xf32>
    %59 = vector.shape_cast %58 : vector<1x2x8xf32> to vector<2x8xf32>
    %60 = vector.extract_strided_slice %57 {offsets = [0, 0], sizes = [64, 2], strides = [1, 1]} : vector<64x4xf32> to vector<64x2xf32>
    %61 = vector.extract_strided_slice %59 {offsets = [0, 0], sizes = [2, 4], strides = [1, 1]} : vector<2x8xf32> to vector<2x4xf32>
    %cst_43 = arith.constant dense<0.000000e+00> : vector<64x4xf32>
    %62 = tpu.matmul %60, %61, %cst_43 {dimension_numbers = #tpu.dot_dimension_numbers<[1], [0], [0], [1], [0, 0, 1, 1], [], []>} : vector<64x2xf32>, vector<2x4xf32>, vector<64x4xf32> -> vector<64x4xf32>
    %63 = arith.addf %49, %62 : vector<64x4xf32>
    %64 = vector.extract_strided_slice %57 {offsets = [0, 2], sizes = [64, 2], strides = [1, 1]} : vector<64x4xf32> to vector<64x2xf32>
    %65 = vector.extract_strided_slice %59 {offsets = [0, 4], sizes = [2, 4], strides = [1, 1]} : vector<2x8xf32> to vector<2x4xf32>
    %cst_44 = arith.constant dense<0.000000e+00> : vector<64x4xf32>
    %66 = tpu.matmul %64, %65, %cst_44 {dimension_numbers = #tpu.dot_dimension_numbers<[1], [0], [0], [1], [0, 0, 1, 1], [], []>} : vector<64x2xf32>, vector<2x4xf32>, vector<64x4xf32> -> vector<64x4xf32>
    %67 = arith.addf %53, %66 : vector<64x4xf32>
    %68 = tpu.concatenate %63, %67 in 1 : vector<64x4xf32>, vector<64x4xf32> -> vector<64x8xf32>
    %c0_45 = arith.constant 0 : index
    %c0_46 = arith.constant 0 : index
    %c0_47 = arith.constant 0 : index
    %69 = vector.load %arg4[%c0_45, %c0_46, %c0_47] : memref<1x1x8xf32, #tpu.memory_space<vmem>>, vector<1x1x8xf32>
    %70 = vector.shape_cast %69 : vector<1x1x8xf32> to vector<1x8xf32>
    %71 = vector.broadcast %70 : vector<1x8xf32> to vector<64x8xf32>
    %72 = arith.addf %68, %71 : vector<64x8xf32>
    %cst_48 = arith.constant 0.000000e+00 : f32
    %73 = vector.broadcast %cst_48 : f32 to vector<64x8xf32>
    %74 = arith.cmpf oge, %72, %73 : vector<64x8xf32>
    %cst_49 = arith.constant 1.000000e-01 : f32
    %75 = vector.broadcast %cst_49 : f32 to vector<64x8xf32>
    %76 = arith.mulf %75, %72 : vector<64x8xf32>
    %77 = arith.select %74, %72, %76 : vector<64x8xi1>, vector<64x8xf32>
    %78 = vector.shape_cast %77 : vector<64x8xf32> to vector<2x32x8xf32>
    %c0_50 = arith.constant 0 : index
    %c0_51 = arith.constant 0 : index
    %c0_52 = arith.constant 0 : index
    %79 = vector.load %arg5[%c0_50, %c0_51, %c0_52] : memref<2x32x8xf32, #tpu.memory_space<vmem>>, vector<2x32x8xf32>
    tpu.vector_store %arg5[%c0_50, %c0_51, %c0_52], %78 {strides = array<i32>} : memref<2x32x8xf32, #tpu.memory_space<vmem>>, vector<2x32x8xf32>,
    return
  }
  func.func @transform_0(%arg0: i32) -> (i32, i32, i32) {
    %c0_i32 = arith.constant 0 : i32
    %c0_i32_0 = arith.constant 0 : i32
    %c0_i32_1 = arith.constant 0 : i32
    return %c0_i32, %arg0, %c0_i32_0 : i32, i32, i32
  }
  func.func @transform_1(%arg0: i32) -> (i32, i32, i32) {
    %c1_i32 = arith.constant 1 : i32
    %0 = arith.addi %arg0, %c1_i32 : i32
    %c8_i32 = arith.constant 8 : i32
    %1 = arith.muli %0, %c8_i32 : i32
    %c0_i32 = arith.constant 0 : i32
    %c0_i32_0 = arith.constant 0 : i32
    %c0_i32_1 = arith.constant 0 : i32
    return %c0_i32, %1, %c0_i32_0 : i32, i32, i32
  }
  func.func @transform_2(%arg0: i32) -> (i32, i32, i32) {
    %c0_i32 = arith.constant 0 : i32
    %c0_i32_0 = arith.constant 0 : i32
    %c0_i32_1 = arith.constant 0 : i32
    %c0_i32_2 = arith.constant 0 : i32
    return %c0_i32, %c0_i32_0, %c0_i32_1 : i32, i32, i32
  }
  func.func @transform_3(%arg0: i32) -> (i32, i32, i32) {
    %c0_i32 = arith.constant 0 : i32
    %c0_i32_0 = arith.constant 0 : i32
    %c0_i32_1 = arith.constant 0 : i32
    %c0_i32_2 = arith.constant 0 : i32
    return %c0_i32, %c0_i32_0, %c0_i32_1 : i32, i32, i32
  }
  func.func @transform_4(%arg0: i32) -> (i32, i32, i32) {
    %c0_i32 = arith.constant 0 : i32
    %c0_i32_0 = arith.constant 0 : i32
    %c0_i32_1 = arith.constant 0 : i32
    return %c0_i32, %arg0, %c0_i32_0 : i32, i32, i32
  }
}

module attributes {stable_mosaic.version = 11 : i64} {
  func.func @_conv1d_kernel(%arg0: i32, %arg1: memref<2x32x8xf32, #tpu.memory_space<vmem>>, %arg2: memref<2x8x8xf32, #tpu.memory_space<vmem>>, %arg3: memref<5x2x16xf32, #tpu.memory_space<vmem>>, %arg4: memref<1x1x16xf32, #tpu.memory_space<vmem>>, %arg5: memref<2x16x16xf32, #tpu.memory_space<vmem>>) attributes {dimension_semantics = [#tpu.dimension_semantics<parallel>], iteration_bounds = array<i64: 1>, scalar_prefetch = 0 : i64, scratch_operands = 0 : i64, tpu.core_type = #tpu.core_type<tc>, window_params = [{transform_indices = @transform_0, window_bounds = array<i64: 2, 32, 8>}, {transform_indices = @transform_1, window_bounds = array<i64: 2, 8, 8>}, {pipeline_mode = #tpu.pipeline_mode<synchronous>, transform_indices = @transform_2, window_bounds = array<i64: 5, 2, 16>}, {pipeline_mode = #tpu.pipeline_mode<synchronous>, transform_indices = @transform_3, window_bounds = array<i64: 1, 1, 16>}, {transform_indices = @transform_4, window_bounds = array<i64: 2, 16, 16>}]} {
    %cst = arith.constant 0.000000e+00 : f32
    %0 = vector.broadcast %cst : f32 to vector<32x4xf32>
    %cst_0 = arith.constant 0.000000e+00 : f32
    %1 = vector.broadcast %cst_0 : f32 to vector<32x4xf32>
    %cst_1 = arith.constant 0.000000e+00 : f32
    %2 = vector.broadcast %cst_1 : f32 to vector<32x4xf32>
    %cst_2 = arith.constant 0.000000e+00 : f32
    %3 = vector.broadcast %cst_2 : f32 to vector<32x4xf32>
    %c0 = arith.constant 0 : index
    %c0_3 = arith.constant 0 : index
    %c0_4 = arith.constant 0 : index
    %4 = tpu.strided_load %arg1[%c0, %c0_3, %c0_4] {strides = array<i32: 1, 2, 1>} : memref<2x32x8xf32, #tpu.memory_space<vmem>>, vector<2x16x8xf32>
    %5 = vector.shape_cast %4 : vector<2x16x8xf32> to vector<32x8xf32>
    %c0_5 = arith.constant 0 : index
    %c0_6 = arith.constant 0 : index
    %c0_7 = arith.constant 0 : index
    %6 = vector.load %arg3[%c0_5, %c0_6, %c0_7] : memref<5x2x16xf32, #tpu.memory_space<vmem>>, vector<1x2x16xf32>
    %7 = vector.shape_cast %6 : vector<1x2x16xf32> to vector<2x16xf32>
    %8 = vector.extract_strided_slice %5 {offsets = [0, 0], sizes = [32, 2], strides = [1, 1]} : vector<32x8xf32> to vector<32x2xf32>
    %9 = vector.extract_strided_slice %7 {offsets = [0, 0], sizes = [2, 4], strides = [1, 1]} : vector<2x16xf32> to vector<2x4xf32>
    %cst_8 = arith.constant dense<0.000000e+00> : vector<32x4xf32>
    %10 = tpu.matmul %8, %9, %cst_8 {dimension_numbers = #tpu.dot_dimension_numbers<[1], [0], [0], [1], [0, 0, 1, 1], [], []>} : vector<32x2xf32>, vector<2x4xf32>, vector<32x4xf32> -> vector<32x4xf32>
    %11 = arith.addf %0, %10 : vector<32x4xf32>
    %12 = vector.extract_strided_slice %5 {offsets = [0, 2], sizes = [32, 2], strides = [1, 1]} : vector<32x8xf32> to vector<32x2xf32>
    %13 = vector.extract_strided_slice %7 {offsets = [0, 4], sizes = [2, 4], strides = [1, 1]} : vector<2x16xf32> to vector<2x4xf32>
    %cst_9 = arith.constant dense<0.000000e+00> : vector<32x4xf32>
    %14 = tpu.matmul %12, %13, %cst_9 {dimension_numbers = #tpu.dot_dimension_numbers<[1], [0], [0], [1], [0, 0, 1, 1], [], []>} : vector<32x2xf32>, vector<2x4xf32>, vector<32x4xf32> -> vector<32x4xf32>
    %15 = arith.addf %1, %14 : vector<32x4xf32>
    %16 = vector.extract_strided_slice %5 {offsets = [0, 4], sizes = [32, 2], strides = [1, 1]} : vector<32x8xf32> to vector<32x2xf32>
    %17 = vector.extract_strided_slice %7 {offsets = [0, 8], sizes = [2, 4], strides = [1, 1]} : vector<2x16xf32> to vector<2x4xf32>
    %cst_10 = arith.constant dense<0.000000e+00> : vector<32x4xf32>
    %18 = tpu.matmul %16, %17, %cst_10 {dimension_numbers = #tpu.dot_dimension_numbers<[1], [0], [0], [1], [0, 0, 1, 1], [], []>} : vector<32x2xf32>, vector<2x4xf32>, vector<32x4xf32> -> vector<32x4xf32>
    %19 = arith.addf %2, %18 : vector<32x4xf32>
    %20 = vector.extract_strided_slice %5 {offsets = [0, 6], sizes = [32, 2], strides = [1, 1]} : vector<32x8xf32> to vector<32x2xf32>
    %21 = vector.extract_strided_slice %7 {offsets = [0, 12], sizes = [2, 4], strides = [1, 1]} : vector<2x16xf32> to vector<2x4xf32>
    %cst_11 = arith.constant dense<0.000000e+00> : vector<32x4xf32>
    %22 = tpu.matmul %20, %21, %cst_11 {dimension_numbers = #tpu.dot_dimension_numbers<[1], [0], [0], [1], [0, 0, 1, 1], [], []>} : vector<32x2xf32>, vector<2x4xf32>, vector<32x4xf32> -> vector<32x4xf32>
    %23 = arith.addf %3, %22 : vector<32x4xf32>
    %c0_12 = arith.constant 0 : index
    %c1 = arith.constant 1 : index
    %c0_13 = arith.constant 0 : index
    %24 = tpu.strided_load %arg1[%c0_12, %c1, %c0_13] {strides = array<i32: 1, 2, 1>} : memref<2x32x8xf32, #tpu.memory_space<vmem>>, vector<2x16x8xf32>
    %25 = vector.shape_cast %24 : vector<2x16x8xf32> to vector<32x8xf32>
    %c1_14 = arith.constant 1 : index
    %c0_15 = arith.constant 0 : index
    %c0_16 = arith.constant 0 : index
    %26 = vector.load %arg3[%c1_14, %c0_15, %c0_16] : memref<5x2x16xf32, #tpu.memory_space<vmem>>, vector<1x2x16xf32>
    %27 = vector.shape_cast %26 : vector<1x2x16xf32> to vector<2x16xf32>
    %28 = vector.extract_strided_slice %25 {offsets = [0, 0], sizes = [32, 2], strides = [1, 1]} : vector<32x8xf32> to vector<32x2xf32>
    %29 = vector.extract_strided_slice %27 {offsets = [0, 0], sizes = [2, 4], strides = [1, 1]} : vector<2x16xf32> to vector<2x4xf32>
    %cst_17 = arith.constant dense<0.000000e+00> : vector<32x4xf32>
    %30 = tpu.matmul %28, %29, %cst_17 {dimension_numbers = #tpu.dot_dimension_numbers<[1], [0], [0], [1], [0, 0, 1, 1], [], []>} : vector<32x2xf32>, vector<2x4xf32>, vector<32x4xf32> -> vector<32x4xf32>
    %31 = arith.addf %11, %30 : vector<32x4xf32>
    %32 = vector.extract_strided_slice %25 {offsets = [0, 2], sizes = [32, 2], strides = [1, 1]} : vector<32x8xf32> to vector<32x2xf32>
    %33 = vector.extract_strided_slice %27 {offsets = [0, 4], sizes = [2, 4], strides = [1, 1]} : vector<2x16xf32> to vector<2x4xf32>
    %cst_18 = arith.constant dense<0.000000e+00> : vector<32x4xf32>
    %34 = tpu.matmul %32, %33, %cst_18 {dimension_numbers = #tpu.dot_dimension_numbers<[1], [0], [0], [1], [0, 0, 1, 1], [], []>} : vector<32x2xf32>, vector<2x4xf32>, vector<32x4xf32> -> vector<32x4xf32>
    %35 = arith.addf %15, %34 : vector<32x4xf32>
    %36 = vector.extract_strided_slice %25 {offsets = [0, 4], sizes = [32, 2], strides = [1, 1]} : vector<32x8xf32> to vector<32x2xf32>
    %37 = vector.extract_strided_slice %27 {offsets = [0, 8], sizes = [2, 4], strides = [1, 1]} : vector<2x16xf32> to vector<2x4xf32>
    %cst_19 = arith.constant dense<0.000000e+00> : vector<32x4xf32>
    %38 = tpu.matmul %36, %37, %cst_19 {dimension_numbers = #tpu.dot_dimension_numbers<[1], [0], [0], [1], [0, 0, 1, 1], [], []>} : vector<32x2xf32>, vector<2x4xf32>, vector<32x4xf32> -> vector<32x4xf32>
    %39 = arith.addf %19, %38 : vector<32x4xf32>
    %40 = vector.extract_strided_slice %25 {offsets = [0, 6], sizes = [32, 2], strides = [1, 1]} : vector<32x8xf32> to vector<32x2xf32>
    %41 = vector.extract_strided_slice %27 {offsets = [0, 12], sizes = [2, 4], strides = [1, 1]} : vector<2x16xf32> to vector<2x4xf32>
    %cst_20 = arith.constant dense<0.000000e+00> : vector<32x4xf32>
    %42 = tpu.matmul %40, %41, %cst_20 {dimension_numbers = #tpu.dot_dimension_numbers<[1], [0], [0], [1], [0, 0, 1, 1], [], []>} : vector<32x2xf32>, vector<2x4xf32>, vector<32x4xf32> -> vector<32x4xf32>
    %43 = arith.addf %23, %42 : vector<32x4xf32>
    %c0_21 = arith.constant 0 : index
    %c2 = arith.constant 2 : index
    %c0_22 = arith.constant 0 : index
    %44 = tpu.strided_load %arg1[%c0_21, %c2, %c0_22] {strides = array<i32: 1, 2, 1>} : memref<2x32x8xf32, #tpu.memory_space<vmem>>, vector<2x15x8xf32>
    %c0_23 = arith.constant 0 : index
    %c0_24 = arith.constant 0 : index
    %c0_25 = arith.constant 0 : index
    %45 = tpu.strided_load %arg2[%c0_23, %c0_24, %c0_25] {strides = array<i32: 1, 2, 1>} : memref<2x8x8xf32, #tpu.memory_space<vmem>>, vector<2x1x8xf32>
    %46 = tpu.concatenate %44, %45 in 1 : vector<2x15x8xf32>, vector<2x1x8xf32> -> vector<2x16x8xf32>
    %47 = vector.shape_cast %46 : vector<2x16x8xf32> to vector<32x8xf32>
    %c2_26 = arith.constant 2 : index
    %c0_27 = arith.constant 0 : index
    %c0_28 = arith.constant 0 : index
    %48 = vector.load %arg3[%c2_26, %c0_27, %c0_28] : memref<5x2x16xf32, #tpu.memory_space<vmem>>, vector<1x2x16xf32>
    %49 = vector.shape_cast %48 : vector<1x2x16xf32> to vector<2x16xf32>
    %50 = vector.extract_strided_slice %47 {offsets = [0, 0], sizes = [32, 2], strides = [1, 1]} : vector<32x8xf32> to vector<32x2xf32>
    %51 = vector.extract_strided_slice %49 {offsets = [0, 0], sizes = [2, 4], strides = [1, 1]} : vector<2x16xf32> to vector<2x4xf32>
    %cst_29 = arith.constant dense<0.000000e+00> : vector<32x4xf32>
    %52 = tpu.matmul %50, %51, %cst_29 {dimension_numbers = #tpu.dot_dimension_numbers<[1], [0], [0], [1], [0, 0, 1, 1], [], []>} : vector<32x2xf32>, vector<2x4xf32>, vector<32x4xf32> -> vector<32x4xf32>
    %53 = arith.addf %31, %52 : vector<32x4xf32>
    %54 = vector.extract_strided_slice %47 {offsets = [0, 2], sizes = [32, 2], strides = [1, 1]} : vector<32x8xf32> to vector<32x2xf32>
    %55 = vector.extract_strided_slice %49 {offsets = [0, 4], sizes = [2, 4], strides = [1, 1]} : vector<2x16xf32> to vector<2x4xf32>
    %cst_30 = arith.constant dense<0.000000e+00> : vector<32x4xf32>
    %56 = tpu.matmul %54, %55, %cst_30 {dimension_numbers = #tpu.dot_dimension_numbers<[1], [0], [0], [1], [0, 0, 1, 1], [], []>} : vector<32x2xf32>, vector<2x4xf32>, vector<32x4xf32> -> vector<32x4xf32>
    %57 = arith.addf %35, %56 : vector<32x4xf32>
    %58 = vector.extract_strided_slice %47 {offsets = [0, 4], sizes = [32, 2], strides = [1, 1]} : vector<32x8xf32> to vector<32x2xf32>
    %59 = vector.extract_strided_slice %49 {offsets = [0, 8], sizes = [2, 4], strides = [1, 1]} : vector<2x16xf32> to vector<2x4xf32>
    %cst_31 = arith.constant dense<0.000000e+00> : vector<32x4xf32>
    %60 = tpu.matmul %58, %59, %cst_31 {dimension_numbers = #tpu.dot_dimension_numbers<[1], [0], [0], [1], [0, 0, 1, 1], [], []>} : vector<32x2xf32>, vector<2x4xf32>, vector<32x4xf32> -> vector<32x4xf32>
    %61 = arith.addf %39, %60 : vector<32x4xf32>
    %62 = vector.extract_strided_slice %47 {offsets = [0, 6], sizes = [32, 2], strides = [1, 1]} : vector<32x8xf32> to vector<32x2xf32>
    %63 = vector.extract_strided_slice %49 {offsets = [0, 12], sizes = [2, 4], strides = [1, 1]} : vector<2x16xf32> to vector<2x4xf32>
    %cst_32 = arith.constant dense<0.000000e+00> : vector<32x4xf32>
    %64 = tpu.matmul %62, %63, %cst_32 {dimension_numbers = #tpu.dot_dimension_numbers<[1], [0], [0], [1], [0, 0, 1, 1], [], []>} : vector<32x2xf32>, vector<2x4xf32>, vector<32x4xf32> -> vector<32x4xf32>
    %65 = arith.addf %43, %64 : vector<32x4xf32>
    %c0_33 = arith.constant 0 : index
    %c3 = arith.constant 3 : index
    %c0_34 = arith.constant 0 : index
    %66 = tpu.strided_load %arg1[%c0_33, %c3, %c0_34] {strides = array<i32: 1, 2, 1>} : memref<2x32x8xf32, #tpu.memory_space<vmem>>, vector<2x15x8xf32>
    %c0_35 = arith.constant 0 : index
    %c1_36 = arith.constant 1 : index
    %c0_37 = arith.constant 0 : index
    %67 = tpu.strided_load %arg2[%c0_35, %c1_36, %c0_37] {strides = array<i32: 1, 2, 1>} : memref<2x8x8xf32, #tpu.memory_space<vmem>>, vector<2x1x8xf32>
    %68 = tpu.concatenate %66, %67 in 1 : vector<2x15x8xf32>, vector<2x1x8xf32> -> vector<2x16x8xf32>
    %69 = vector.shape_cast %68 : vector<2x16x8xf32> to vector<32x8xf32>
    %c3_38 = arith.constant 3 : index
    %c0_39 = arith.constant 0 : index
    %c0_40 = arith.constant 0 : index
    %70 = vector.load %arg3[%c3_38, %c0_39, %c0_40] : memref<5x2x16xf32, #tpu.memory_space<vmem>>, vector<1x2x16xf32>
    %71 = vector.shape_cast %70 : vector<1x2x16xf32> to vector<2x16xf32>
    %72 = vector.extract_strided_slice %69 {offsets = [0, 0], sizes = [32, 2], strides = [1, 1]} : vector<32x8xf32> to vector<32x2xf32>
    %73 = vector.extract_strided_slice %71 {offsets = [0, 0], sizes = [2, 4], strides = [1, 1]} : vector<2x16xf32> to vector<2x4xf32>
    %cst_41 = arith.constant dense<0.000000e+00> : vector<32x4xf32>
    %74 = tpu.matmul %72, %73, %cst_41 {dimension_numbers = #tpu.dot_dimension_numbers<[1], [0], [0], [1], [0, 0, 1, 1], [], []>} : vector<32x2xf32>, vector<2x4xf32>, vector<32x4xf32> -> vector<32x4xf32>
    %75 = arith.addf %53, %74 : vector<32x4xf32>
    %76 = vector.extract_strided_slice %69 {offsets = [0, 2], sizes = [32, 2], strides = [1, 1]} : vector<32x8xf32> to vector<32x2xf32>
    %77 = vector.extract_strided_slice %71 {offsets = [0, 4], sizes = [2, 4], strides = [1, 1]} : vector<2x16xf32> to vector<2x4xf32>
    %cst_42 = arith.constant dense<0.000000e+00> : vector<32x4xf32>
    %78 = tpu.matmul %76, %77, %cst_42 {dimension_numbers = #tpu.dot_dimension_numbers<[1], [0], [0], [1], [0, 0, 1, 1], [], []>} : vector<32x2xf32>, vector<2x4xf32>, vector<32x4xf32> -> vector<32x4xf32>
    %79 = arith.addf %57, %78 : vector<32x4xf32>
    %80 = vector.extract_strided_slice %69 {offsets = [0, 4], sizes = [32, 2], strides = [1, 1]} : vector<32x8xf32> to vector<32x2xf32>
    %81 = vector.extract_strided_slice %71 {offsets = [0, 8], sizes = [2, 4], strides = [1, 1]} : vector<2x16xf32> to vector<2x4xf32>
    %cst_43 = arith.constant dense<0.000000e+00> : vector<32x4xf32>
    %82 = tpu.matmul %80, %81, %cst_43 {dimension_numbers = #tpu.dot_dimension_numbers<[1], [0], [0], [1], [0, 0, 1, 1], [], []>} : vector<32x2xf32>, vector<2x4xf32>, vector<32x4xf32> -> vector<32x4xf32>
    %83 = arith.addf %61, %82 : vector<32x4xf32>
    %84 = vector.extract_strided_slice %69 {offsets = [0, 6], sizes = [32, 2], strides = [1, 1]} : vector<32x8xf32> to vector<32x2xf32>
    %85 = vector.extract_strided_slice %71 {offsets = [0, 12], sizes = [2, 4], strides = [1, 1]} : vector<2x16xf32> to vector<2x4xf32>
    %cst_44 = arith.constant dense<0.000000e+00> : vector<32x4xf32>
    %86 = tpu.matmul %84, %85, %cst_44 {dimension_numbers = #tpu.dot_dimension_numbers<[1], [0], [0], [1], [0, 0, 1, 1], [], []>} : vector<32x2xf32>, vector<2x4xf32>, vector<32x4xf32> -> vector<32x4xf32>
    %87 = arith.addf %65, %86 : vector<32x4xf32>
    %c0_45 = arith.constant 0 : index
    %c4 = arith.constant 4 : index
    %c0_46 = arith.constant 0 : index
    %88 = tpu.strided_load %arg1[%c0_45, %c4, %c0_46] {strides = array<i32: 1, 2, 1>} : memref<2x32x8xf32, #tpu.memory_space<vmem>>, vector<2x14x8xf32>
    %c0_47 = arith.constant 0 : index
    %c0_48 = arith.constant 0 : index
    %c0_49 = arith.constant 0 : index
    %89 = tpu.strided_load %arg2[%c0_47, %c0_48, %c0_49] {strides = array<i32: 1, 2, 1>} : memref<2x8x8xf32, #tpu.memory_space<vmem>>, vector<2x2x8xf32>
    %90 = tpu.concatenate %88, %89 in 1 : vector<2x14x8xf32>, vector<2x2x8xf32> -> vector<2x16x8xf32>
    %91 = vector.shape_cast %90 : vector<2x16x8xf32> to vector<32x8xf32>
    %c4_50 = arith.constant 4 : index
    %c0_51 = arith.constant 0 : index
    %c0_52 = arith.constant 0 : index
    %92 = vector.load %arg3[%c4_50, %c0_51, %c0_52] : memref<5x2x16xf32, #tpu.memory_space<vmem>>, vector<1x2x16xf32>
    %93 = vector.shape_cast %92 : vector<1x2x16xf32> to vector<2x16xf32>
    %94 = vector.extract_strided_slice %91 {offsets = [0, 0], sizes = [32, 2], strides = [1, 1]} : vector<32x8xf32> to vector<32x2xf32>
    %95 = vector.extract_strided_slice %93 {offsets = [0, 0], sizes = [2, 4], strides = [1, 1]} : vector<2x16xf32> to vector<2x4xf32>
    %cst_53 = arith.constant dense<0.000000e+00> : vector<32x4xf32>
    %96 = tpu.matmul %94, %95, %cst_53 {dimension_numbers = #tpu.dot_dimension_numbers<[1], [0], [0], [1], [0, 0, 1, 1], [], []>} : vector<32x2xf32>, vector<2x4xf32>, vector<32x4xf32> -> vector<32x4xf32>
    %97 = arith.addf %75, %96 : vector<32x4xf32>
    %98 = vector.extract_strided_slice %91 {offsets = [0, 2], sizes = [32, 2], strides = [1, 1]} : vector<32x8xf32> to vector<32x2xf32>
    %99 = vector.extract_strided_slice %93 {offsets = [0, 4], sizes = [2, 4], strides = [1, 1]} : vector<2x16xf32> to vector<2x4xf32>
    %cst_54 = arith.constant dense<0.000000e+00> : vector<32x4xf32>
    %100 = tpu.matmul %98, %99, %cst_54 {dimension_numbers = #tpu.dot_dimension_numbers<[1], [0], [0], [1], [0, 0, 1, 1], [], []>} : vector<32x2xf32>, vector<2x4xf32>, vector<32x4xf32> -> vector<32x4xf32>
    %101 = arith.addf %79, %100 : vector<32x4xf32>
    %102 = vector.extract_strided_slice %91 {offsets = [0, 4], sizes = [32, 2], strides = [1, 1]} : vector<32x8xf32> to vector<32x2xf32>
    %103 = vector.extract_strided_slice %93 {offsets = [0, 8], sizes = [2, 4], strides = [1, 1]} : vector<2x16xf32> to vector<2x4xf32>
    %cst_55 = arith.constant dense<0.000000e+00> : vector<32x4xf32>
    %104 = tpu.matmul %102, %103, %cst_55 {dimension_numbers = #tpu.dot_dimension_numbers<[1], [0], [0], [1], [0, 0, 1, 1], [], []>} : vector<32x2xf32>, vector<2x4xf32>, vector<32x4xf32> -> vector<32x4xf32>
    %105 = arith.addf %83, %104 : vector<32x4xf32>
    %106 = vector.extract_strided_slice %91 {offsets = [0, 6], sizes = [32, 2], strides = [1, 1]} : vector<32x8xf32> to vector<32x2xf32>
    %107 = vector.extract_strided_slice %93 {offsets = [0, 12], sizes = [2, 4], strides = [1, 1]} : vector<2x16xf32> to vector<2x4xf32>
    %cst_56 = arith.constant dense<0.000000e+00> : vector<32x4xf32>
    %108 = tpu.matmul %106, %107, %cst_56 {dimension_numbers = #tpu.dot_dimension_numbers<[1], [0], [0], [1], [0, 0, 1, 1], [], []>} : vector<32x2xf32>, vector<2x4xf32>, vector<32x4xf32> -> vector<32x4xf32>
    %109 = arith.addf %87, %108 : vector<32x4xf32>
    %110 = tpu.concatenate %97, %101, %105, %109 in 1 : vector<32x4xf32>, vector<32x4xf32>, vector<32x4xf32>, vector<32x4xf32> -> vector<32x16xf32>
    %c0_57 = arith.constant 0 : index
    %c0_58 = arith.constant 0 : index
    %c0_59 = arith.constant 0 : index
    %111 = vector.load %arg4[%c0_57, %c0_58, %c0_59] : memref<1x1x16xf32, #tpu.memory_space<vmem>>, vector<1x1x16xf32>
    %112 = vector.shape_cast %111 : vector<1x1x16xf32> to vector<1x16xf32>
    %113 = vector.broadcast %112 : vector<1x16xf32> to vector<32x16xf32>
    %114 = arith.addf %110, %113 : vector<32x16xf32>
    %cst_60 = arith.constant 0.000000e+00 : f32
    %115 = vector.broadcast %cst_60 : f32 to vector<32x16xf32>
    %116 = arith.cmpf oge, %114, %115 : vector<32x16xf32>
    %cst_61 = arith.constant 1.000000e-01 : f32
    %117 = vector.broadcast %cst_61 : f32 to vector<32x16xf32>
    %118 = arith.mulf %117, %114 : vector<32x16xf32>
    %119 = arith.select %116, %114, %118 : vector<32x16xi1>, vector<32x16xf32>
    %120 = vector.shape_cast %119 : vector<32x16xf32> to vector<2x16x16xf32>
    %c0_62 = arith.constant 0 : index
    %c0_63 = arith.constant 0 : index
    %c0_64 = arith.constant 0 : index
    %121 = vector.load %arg5[%c0_62, %c0_63, %c0_64] : memref<2x16x16xf32, #tpu.memory_space<vmem>>, vector<2x16x16xf32>
    tpu.vector_store %arg5[%c0_62, %c0_63, %c0_64], %120 {strides = array<i32>} : memref<2x16x16xf32, #tpu.memory_space<vmem>>, vector<2x16x16xf32>,
    return
  }
  func.func @transform_0(%arg0: i32) -> (i32, i32, i32) {
    %c0_i32 = arith.constant 0 : i32
    %c0_i32_0 = arith.constant 0 : i32
    %c0_i32_1 = arith.constant 0 : i32
    return %c0_i32, %arg0, %c0_i32_0 : i32, i32, i32
  }
  func.func @transform_1(%arg0: i32) -> (i32, i32, i32) {
    %c1_i32 = arith.constant 1 : i32
    %0 = arith.addi %arg0, %c1_i32 : i32
    %c4_i32 = arith.constant 4 : i32
    %1 = arith.muli %0, %c4_i32 : i32
    %c0_i32 = arith.constant 0 : i32
    %c0_i32_0 = arith.constant 0 : i32
    %c0_i32_1 = arith.constant 0 : i32
    return %c0_i32, %1, %c0_i32_0 : i32, i32, i32
  }
  func.func @transform_2(%arg0: i32) -> (i32, i32, i32) {
    %c0_i32 = arith.constant 0 : i32
    %c0_i32_0 = arith.constant 0 : i32
    %c0_i32_1 = arith.constant 0 : i32
    %c0_i32_2 = arith.constant 0 : i32
    return %c0_i32, %c0_i32_0, %c0_i32_1 : i32, i32, i32
  }
  func.func @transform_3(%arg0: i32) -> (i32, i32, i32) {
    %c0_i32 = arith.constant 0 : i32
    %c0_i32_0 = arith.constant 0 : i32
    %c0_i32_1 = arith.constant 0 : i32
    %c0_i32_2 = arith.constant 0 : i32
    return %c0_i32, %c0_i32_0, %c0_i32_1 : i32, i32, i32
  }
  func.func @transform_4(%arg0: i32) -> (i32, i32, i32) {
    %c0_i32 = arith.constant 0 : i32
    %c0_i32_0 = arith.constant 0 : i32
    %c0_i32_1 = arith.constant 0 : i32
    return %c0_i32, %arg0, %c0_i32_0 : i32, i32, i32
  }
}

module attributes {stable_mosaic.version = 11 : i64} {
  func.func @_conv1d_kernel(%arg0: i32, %arg1: memref<2x16x16xf32, #tpu.memory_space<vmem>>, %arg2: memref<2x8x16xf32, #tpu.memory_space<vmem>>, %arg3: memref<3x16x1xf32, #tpu.memory_space<vmem>>, %arg4: memref<1x1x1xf32, #tpu.memory_space<vmem>>, %arg5: memref<2x16x1xf32, #tpu.memory_space<vmem>>) attributes {dimension_semantics = [#tpu.dimension_semantics<parallel>], iteration_bounds = array<i64: 1>, scalar_prefetch = 0 : i64, scratch_operands = 0 : i64, tpu.core_type = #tpu.core_type<tc>, window_params = [{transform_indices = @transform_0, window_bounds = array<i64: 2, 16, 16>}, {transform_indices = @transform_1, window_bounds = array<i64: 2, 8, 16>}, {pipeline_mode = #tpu.pipeline_mode<synchronous>, transform_indices = @transform_2, window_bounds = array<i64: 3, 16, 1>}, {pipeline_mode = #tpu.pipeline_mode<synchronous>, transform_indices = @transform_3, window_bounds = array<i64: 1, 1, 1>}, {transform_indices = @transform_4, window_bounds = array<i64: 2, 16, 1>}]} {
    %cst = arith.constant 0.000000e+00 : f32
    %0 = vector.broadcast %cst : f32 to vector<32x1xf32>
    %c0 = arith.constant 0 : index
    %c0_0 = arith.constant 0 : index
    %c0_1 = arith.constant 0 : index
    %1 = vector.load %arg1[%c0, %c0_0, %c0_1] : memref<2x16x16xf32, #tpu.memory_space<vmem>>, vector<2x16x16xf32>
    %2 = vector.shape_cast %1 : vector<2x16x16xf32> to vector<32x16xf32>
    %c0_2 = arith.constant 0 : index
    %c0_3 = arith.constant 0 : index
    %c0_4 = arith.constant 0 : index
    %3 = vector.load %arg3[%c0_2, %c0_3, %c0_4] : memref<3x16x1xf32, #tpu.memory_space<vmem>>, vector<1x16x1xf32>
    %4 = vector.shape_cast %3 : vector<1x16x1xf32> to vector<16x1xf32>
    %cst_5 = arith.constant dense<0.000000e+00> : vector<32x1xf32>
    %5 = tpu.matmul %2, %4, %cst_5 {dimension_numbers = #tpu.dot_dimension_numbers<[1], [0], [0], [1], [0, 0, 1, 1], [], []>} : vector<32x16xf32>, vector<16x1xf32>, vector<32x1xf32> -> vector<32x1xf32>
    %6 = arith.addf %0, %5 : vector<32x1xf32>
    %c0_6 = arith.constant 0 : index
    %c1 = arith.constant 1 : index
    %c0_7 = arith.constant 0 : index
    %7 = vector.load %arg1[%c0_6, %c1, %c0_7] : memref<2x16x16xf32, #tpu.memory_space<vmem>>, vector<2x15x16xf32>
    %c0_8 = arith.constant 0 : index
    %c0_9 = arith.constant 0 : index
    %c0_10 = arith.constant 0 : index
    %8 = vector.load %arg2[%c0_8, %c0_9, %c0_10] : memref<2x8x16xf32, #tpu.memory_space<vmem>>, vector<2x1x16xf32>
    %9 = tpu.concatenate %7, %8 in 1 : vector<2x15x16xf32>, vector<2x1x16xf32> -> vector<2x16x16xf32>
    %10 = vector.shape_cast %9 : vector<2x16x16xf32> to vector<32x16xf32>
    %c1_11 = arith.constant 1 : index
    %c0_12 = arith.constant 0 : index
    %c0_13 = arith.constant 0 : index
    %11 = vector.load %arg3[%c1_11, %c0_12, %c0_13] : memref<3x16x1xf32, #tpu.memory_space<vmem>>, vector<1x16x1xf32>
    %12 = vector.shape_cast %11 : vector<1x16x1xf32> to vector<16x1xf32>
    %cst_14 = arith.constant dense<0.000000e+00> : vector<32x1xf32>
    %13 = tpu.matmul %10, %12, %cst_14 {dimension_numbers = #tpu.dot_dimension_numbers<[1], [0], [0], [1], [0, 0, 1, 1], [], []>} : vector<32x16xf32>, vector<16x1xf32>, vector<32x1xf32> -> vector<32x1xf32>
    %14 = arith.addf %6, %13 : vector<32x1xf32>
    %c0_15 = arith.constant 0 : index
    %c2 = arith.constant 2 : index
    %c0_16 = arith.constant 0 : index
    %15 = vector.load %arg1[%c0_15, %c2, %c0_16] : memref<2x16x16xf32, #tpu.memory_space<vmem>>, vector<2x14x16xf32>
    %c0_17 = arith.constant 0 : index
    %c0_18 = arith.constant 0 : index
    %c0_19 = arith.constant 0 : index
    %16 = vector.load %arg2[%c0_17, %c0_18, %c0_19] : memref<2x8x16xf32, #tpu.memory_space<vmem>>, vector<2x2x16xf32>
    %17 = tpu.concatenate %15, %16 in 1 : vector<2x14x16xf32>, vector<2x2x16xf32> -> vector<2x16x16xf32>
    %18 = vector.shape_cast %17 : vector<2x16x16xf32> to vector<32x16xf32>
    %c2_20 = arith.constant 2 : index
    %c0_21 = arith.constant 0 : index
    %c0_22 = arith.constant 0 : index
    %19 = vector.load %arg3[%c2_20, %c0_21, %c0_22] : memref<3x16x1xf32, #tpu.memory_space<vmem>>, vector<1x16x1xf32>
    %20 = vector.shape_cast %19 : vector<1x16x1xf32> to vector<16x1xf32>
    %cst_23 = arith.constant dense<0.000000e+00> : vector<32x1xf32>
    %21 = tpu.matmul %18, %20, %cst_23 {dimension_numbers = #tpu.dot_dimension_numbers<[1], [0], [0], [1], [0, 0, 1, 1], [], []>} : vector<32x16xf32>, vector<16x1xf32>, vector<32x1xf32> -> vector<32x1xf32>
    %22 = arith.addf %14, %21 : vector<32x1xf32>
    %c0_24 = arith.constant 0 : index
    %c0_25 = arith.constant 0 : index
    %c0_26 = arith.constant 0 : index
    %23 = vector.load %arg4[%c0_24, %c0_25, %c0_26] : memref<1x1x1xf32, #tpu.memory_space<vmem>>, vector<1x1x1xf32>
    %24 = vector.shape_cast %23 : vector<1x1x1xf32> to vector<1x1xf32>
    %25 = vector.broadcast %24 : vector<1x1xf32> to vector<32x1xf32>
    %26 = arith.addf %22, %25 : vector<32x1xf32>
    %27 = vector.shape_cast %26 : vector<32x1xf32> to vector<2x16x1xf32>
    %c0_27 = arith.constant 0 : index
    %c0_28 = arith.constant 0 : index
    %c0_29 = arith.constant 0 : index
    %28 = vector.load %arg5[%c0_27, %c0_28, %c0_29] : memref<2x16x1xf32, #tpu.memory_space<vmem>>, vector<2x16x1xf32>
    tpu.vector_store %arg5[%c0_27, %c0_28, %c0_29], %27 {strides = array<i32>} : memref<2x16x1xf32, #tpu.memory_space<vmem>>, vector<2x16x1xf32>,
    return
  }
  func.func @transform_0(%arg0: i32) -> (i32, i32, i32) {
    %c0_i32 = arith.constant 0 : i32
    %c0_i32_0 = arith.constant 0 : i32
    %c0_i32_1 = arith.constant 0 : i32
    return %c0_i32, %arg0, %c0_i32_0 : i32, i32, i32
  }
  func.func @transform_1(%arg0: i32) -> (i32, i32, i32) {
    %c1_i32 = arith.constant 1 : i32
    %0 = arith.addi %arg0, %c1_i32 : i32
    %c2_i32 = arith.constant 2 : i32
    %1 = arith.muli %0, %c2_i32 : i32
    %c0_i32 = arith.constant 0 : i32
    %c0_i32_0 = arith.constant 0 : i32
    %c0_i32_1 = arith.constant 0 : i32
    return %c0_i32, %1, %c0_i32_0 : i32, i32, i32
  }
  func.func @transform_2(%arg0: i32) -> (i32, i32, i32) {
    %c0_i32 = arith.constant 0 : i32
    %c0_i32_0 = arith.constant 0 : i32
    %c0_i32_1 = arith.constant 0 : i32
    %c0_i32_2 = arith.constant 0 : i32
    return %c0_i32, %c0_i32_0, %c0_i32_1 : i32, i32, i32
  }
  func.func @transform_3(%arg0: i32) -> (i32, i32, i32) {
    %c0_i32 = arith.constant 0 : i32
    %c0_i32_0 = arith.constant 0 : i32
    %c0_i32_1 = arith.constant 0 : i32
    %c0_i32_2 = arith.constant 0 : i32
    return %c0_i32, %c0_i32_0, %c0_i32_1 : i32, i32, i32
  }
  func.func @transform_4(%arg0: i32) -> (i32, i32, i32) {
    %c0_i32 = arith.constant 0 : i32
    %c0_i32_0 = arith.constant 0 : i32
    %c0_i32_1 = arith.constant 0 : i32
    return %c0_i32, %arg0, %c0_i32_0 : i32, i32, i32
  }
}

</mosaic_0001>

<bundles_post_ra>
// kernel: _lambda_.7
= control target key start
LH: loop header
LB: loop body
LE: loop exit
PB: predicated region body
PF: predicated region fallthrough
CT: control target
= control target key end

     0   :  { %s657_s0 = inlined_call_operand.vmem [shape: f32[2,24,16], index: 0, kind: input, shape index: {}, may-alias: {0,1}]   ;;  %s658_s1 = inlined_call_operand.vmem [shape: f32[2,24,16], index: 1, kind: input, shape index: {}, may-alias: {0,1}]   ;;  %s659_s2 = inlined_call_operand.vmem [shape: f32[3,16,1], index: 2, kind: input, shape index: {}]   ;;  %s660_s3 = inlined_call_operand.<no memory space> [shape: f32[1,1,1], index: 3, kind: input, shape index: {}]   ;;  %s661_s4 = inlined_call_operand.vmem [shape: f32[2,16,1], index: 4, kind: output, shape index: {}]  }
   0x1   :  { %v9_v0 = vstv %s660_s3 }
   0x2   :  { %10 = vst [vmem:[#allocation2] sm:$0x1] %v9_v0 }
   0x3   :  { %v113_v1 = vld [vmem:[%s659_s2] sm:$0xff]  ;;  %v114_v2 = vld [vmem:[%s659_s2 + $0x8] sm:$0xff]  ;;  %v478_v3 = vld [vmem:[%s659_s2 + $0x10] sm:$0xff]  ;;  %vm133_vm0 = vcmask 130048   ;;  %vm127_vm1 = vcmask 1046528   ;;  %vm340_vm2 = vcmask 1045504  }
   0x4   :  { %v547_v4 = vpack.c.bf16 %v114_v2, %v113_v1  ;;  %v479_v5 = vld [vmem:[%s659_s2 + $0x18] sm:$0xff]  ;;  %v46_v6 = vld [vmem:[%s657_s0] sm:$0xff]  ;;  %v48_v7 = vld [vmem:[%s657_s0 + $0x8] sm:$0xff]  ;;  %vm458_vm3 = vcmask 7168  }
   0x5   :  { %v543_v8 = vpack.c.bf16 %v479_v5, %v478_v3  ;;  %47 = vst [vmem:[#allocation3] sm:$0xff] %v46_v6  ;;  %527 = vmatprep.mubr.msk.f32.mxu0 %vm133_vm0, %v46_v6  ;;  %49 = vst [vmem:[#allocation3 + $0x8] sm:$0xff] %v48_v7  ;;  %v488_v9 = vld [vmem:[%s659_s2 + $0x20] sm:$0xff]  ;;  %v489_v10 = vld [vmem:[%s659_s2 + $0x28] sm:$0xff] }
   0x6   :  { %v476_v11 = vld [vmem:[%s658_s1 + $0x10] sm:$0xff]  ;;  %548 = vmatprep.subr.bf16.mxu0 %v547_v4  ;;  %v551_v12 = vpack.c.bf16 %v489_v10, %v488_v9  ;;  %v50_v13 = vld [vmem:[%s657_s0 + $0x18] sm:$0xff]  ;;  %v52_v14 = vld [vmem:[%s657_s0 + $0x20] sm:$0xff] }
   0x7   :  { %93 = vst [vmem:[#allocation4] sm:$0xff] %v476_v11  ;;  %v477_v15 = vld [vmem:[%s658_s1 + $0x28] sm:$0xff]  ;;  %544 = vmatprep.subr.bf16.mxu1 %v543_v8  ;;  %550 = vmatpush3.bf16.msra.mxu0 %v547_v4  ;;  %51 = vst [vmem:[#allocation3 + $0x10] sm:$0xff] %v50_v13 }
   0x8   :  { %53 = vst [vmem:[#allocation3 + $0x18] sm:$0xff] %v52_v14  ;;  %95 = vst [vmem:[#allocation4 + $0x8] sm:$0xff] %v477_v15  ;;  %546 = vmatpush3.bf16.msra.mxu1 %v543_v8  ;;  %552 = vmatprep.subr.bf16.mxu0 %v551_v12 }
   0x9   :  { %555 = vmatprep.subr.bf16.mxu1 %v547_v4  ;;  %v494_v39 = vld [vmem:[#allocation2] ss:$0 sm:$0xff] }
   0xa   :  { %528 = vmatmul.mubr.msk.f32.vlgmr.msra.gmra.mrb[0].mxu0 %vm133_vm0, %v48_v7 }
   0xb   :  { %554 = vmatpush3.bf16.msra.mxu0 %v551_v12 }
   0xc   :  { %v115_v16 = vld [vmem:[#allocation3 + $0x1] sm:$0xff]  ;;  %v116_v18 = vld [vmem:[#allocation3 + $0x9] sm:$0x7f] }
   0xd   :  { %v328_v17 = vld [vmem:[#allocation3 + $0x2] sm:$0xff]  ;;  %517 = vmatprep.mubr.msk.f32.mxu1 %vm133_vm0, %v115_v16  ;;  %v329_v23 = vld [vmem:[#allocation3 + $0xa] sm:$0x3f] }
   0xe   :  { %v119_v19 = vld [vmem:[#allocation4] sm:$0x1]  ;;  %537 = vmatprep.mubr.msk.f32.mxu0 %vm133_vm0, %v328_v17 }
   0xf   :  { %v332_v20 = vld [vmem:[#allocation4] sm:$0x3]  ;;  %v123_v21 = vrot.slane %v119_v19, 1  ;;  %v120_v22 = vld [vmem:[#allocation4 + $0x8] sm:$0x1]  ;;  %v117_v24 = vld [vmem:[#allocation3 + $0x11] sm:$0xff] }
  0x10   :  { %v118_v25 = vld [vmem:[#allocation3 + $0x19] sm:$0x7f]  ;;  %v124_v26 = vrot.slane %v120_v22, 1  ;;  %v336_v27 = vrot.slane %v332_v20, 2  ;;  %v333_v29 = vld [vmem:[#allocation4 + $0x8] sm:$0x3] }
  0x11   :  { %v128_v28 = vsel %vm127_vm1, %v116_v18, %v123_v21  ;;  %v330_v31 = vld [vmem:[#allocation3 + $0x12] sm:$0xff]  ;;  %v331_v32 = vld [vmem:[#allocation3 + $0x1a] sm:$0x3f]  ;;  %v337_v33 = vrot.slane %v333_v29, 2 }
  0x12   :  { %518 = vmatmul.mubr.msk.f32.vlgmr.msra.gmra.mrb[0].mxu1 %vm133_vm0, %v128_v28  ;;  %v341_v30 = vsel %vm340_vm2, %v329_v23, %v336_v27  ;;  %v129_v34 = vsel %vm127_vm1, %v118_v25, %v124_v26 }
  0x13   :  { %556 = vmatpush3.bf16.msra.mxu1 %v547_v4  ;;  %520 = vmatprep.mubr.msk.f32.mxu1 %vm133_vm0, %v117_v24  ;;  %v342_v35 = vsel %vm340_vm2, %v331_v32, %v337_v33 }
  0x14   :  { %538 = vmatmul.mubr.msk.f32.vlgmr.msra.gmra.mrb[0].mxu0 %vm133_vm0, %v341_v30 }
  0x15   :  { %540 = vmatprep.mubr.msk.f32.mxu0 %vm133_vm0, %v330_v31 }
  0x16   :  { %521 = vmatmul.mubr.msk.f32.gmra.mrb[2].mxu1 %vm133_vm0, %v129_v34 }
  0x17   :  { %530 = vmatprep.mubr.msk.f32.mxu1 %vm133_vm0, %v50_v13 }
  0x18   :  { %541 = vmatmul.mubr.msk.f32.gmra.mrb[2].mxu0 %vm133_vm0, %v342_v35 }
  0x1e   :  { %531 = vmatmul.mubr.msk.f32.vlgmr.msra.gmra.mrb[2].mxu1 %vm133_vm0, %v52_v14 }
  0xe5   :  { %v519_v36 = vpop.f32.mrb[0].mxu1 }
  0xe6   :  { %v212_v37 = vpop.f32.mrb[1].mxu1 }
  0xe7   :  { %v539_v38 = vpop.f32.mrb[0].mxu0 }
  0xe8   :  { %v557_v40 = vadd.f32 %v539_v38, %v519_v36  ;;  %v424_v41 = vpop.f32.mrb[1].mxu0 }
  0xe9   :  { %v558_v42 = vadd.f32 %v424_v41, %v212_v37 }
  0xea   :  { %v455_v43 = vadd.f32 %v557_v40, %v494_v39 }
  0xeb   :  { %v454_v44 = vadd.f32 %v558_v42, %v494_v39  ;;  %v542_v45 = vpop.f32.mrb[2].mxu0 }
  0xec   :  { %460 = vst.msk [vmem:[%s661_s4 + $0x8] sm:$0xff] %vm458_vm3, %v455_v43  ;;  %v434_v46 = vpop.f32.mrb[3].mxu0 }
  0xed   :  { %459 = vst.msk [vmem:[%s661_s4] sm:$0xff] %vm458_vm3, %v454_v44 }
  0xf1   :  { %v532_v47 = vpop.f32.mrb[2].mxu1 }
  0xf2   :  { %v559_v48 = vadd.f32 %v542_v45, %v532_v47  ;;  %v319_v49 = vpop.f32.mrb[3].mxu1 }
  0xf3   :  { %v560_v50 = vadd.f32 %v434_v46, %v319_v49 }
  0xf4   :  { %v457_v51 = vadd.f32 %v559_v48, %v494_v39 }
  0xf5   :  { %v456_v52 = vadd.f32 %v560_v50, %v494_v39 }
  0xf6   :  { %462 = vst.msk [vmem:[%s661_s4 + $0x18] sm:$0xff] %vm458_vm3, %v457_v51 }
  0xf7   :  { %461 = vst.msk [vmem:[%s661_s4 + $0x10] sm:$0xff] %vm458_vm3, %v456_v52 }

// kernel: _lambda_.4
= control target key start
LH: loop header
LB: loop body
LE: loop exit
PB: predicated region body
PF: predicated region fallthrough
CT: control target
= control target key end

     0   :  { %v994_v3 = vmov 0   ;;  %vm314_vm0 = vcmask 1046528   ;;  %vm461_vm1 = vcmask 1045504   ;;  %vm608_vm2 = vcmask 1044480   ;;  %s1341_s0 = inlined_call_operand.vmem [shape: f32[2,72,1], index: 0, kind: input, shape index: {}, may-alias: {0,1}]   ;;  %s1342_s1 = inlined_call_operand.vmem [shape: f32[2,72,1], index: 1, kind: input, shape index: {}, may-alias: {0,1}]   ;;  %s1343_s2 = inlined_call_operand.vmem [shape: f32[5,1,4], index: 2, kind: input, shape index: {}]   ;;  %s1344_s3 = inlined_call_operand.vmem [shape: f32[1,1,4], index: 3, kind: input, shape index: {}]   ;;  %s1345_s4 = inlined_call_operand.vmem [shape: f32[2,64,4], index: 4, kind: output, shape index: {}]  }
   0x1   :  { %v72_v0 = vld [vmem:[%s1341_s0 + $0x10] sm:$0xff]  ;;  %v68_v1 = vld [vmem:[%s1341_s0] sm:$0xff]  ;;  %v74_v2 = vld [vmem:[%s1341_s0 + $0x18] sm:$0xff]  ;;  %993 = vset.pattern.permute.xlu1 %v994_v3  ;;  %992 = vset.pattern.permute.xlu0 %v994_v3  ;;  %vm755_vm3 = vcmask 1043456   ;;  %vm949_vm4 = vcmask 31744  }
   0x2   :  { %73 = vst [vmem:[#allocation2 + $0x10] sm:$0xff] %v72_v0  ;;  %69 = vst [vmem:[#allocation2] sm:$0xff] %v68_v1  ;;  %v70_v4 = vld [vmem:[%s1341_s0 + $0x8] sm:$0xff]  ;;  %v76_v6 = vld [vmem:[%s1341_s0 + $0x20] sm:$0xff]  ;;  %184 = vperm.xlu1 %993, %v72_v0   ;;  %174 = vperm.xlu0 %992, %v68_v1  }
   0x3   :  { %75 = vst [vmem:[#allocation2 + $0x18] sm:$0xff] %v74_v2  ;;  %v78_v5 = vld [vmem:[%s1341_s0 + $0x28] sm:$0xff]  ;;  %71 = vst [vmem:[#allocation2 + $0x8] sm:$0xff] %v70_v4  ;;  %v82_v7 = vld [vmem:[%s1341_s0 + $0x38] sm:$0xff] }
   0x4   :  { %79 = vst [vmem:[#allocation2 + $0x28] sm:$0xff] %v78_v5  ;;  %77 = vst [vmem:[#allocation2 + $0x20] sm:$0xff] %v76_v6  ;;  %v80_v8 = vld [vmem:[%s1341_s0 + $0x30] sm:$0xff]  ;;  %v84_v10 = vld [vmem:[%s1341_s0 + $0x48] sm:$0xff] }
   0x5   :  { %v86_v9 = vld [vmem:[%s1341_s0 + $0x50] sm:$0xff]  ;;  %83 = vst [vmem:[#allocation2 + $0x38] sm:$0xff] %v82_v7  ;;  %81 = vst [vmem:[#allocation2 + $0x30] sm:$0xff] %v80_v8  ;;  %v90_v11 = vld [vmem:[%s1341_s0 + $0x60] sm:$0xff] }
   0x6   :  { %87 = vst [vmem:[#allocation2 + $0x48] sm:$0xff] %v86_v9  ;;  %v88_v12 = vld [vmem:[%s1341_s0 + $0x58] sm:$0xff]  ;;  %85 = vst [vmem:[#allocation2 + $0x40] sm:$0xff] %v84_v10  ;;  %v94_v13 = vld [vmem:[%s1341_s0 + $0x70] sm:$0xff]  ;;  %189 = vperm.xlu1 %993, %v74_v2   ;;  %179 = vperm.xlu0 %992, %v70_v4  }
   0x7   :  { %91 = vst [vmem:[#allocation2 + $0x58] sm:$0xff] %v90_v11  ;;  %89 = vst [vmem:[#allocation2 + $0x50] sm:$0xff] %v88_v12  ;;  %v92_v14 = vld [vmem:[%s1341_s0 + $0x68] sm:$0xff]  ;;  %v98_v15 = vld [vmem:[%s1341_s0 + $0x80] sm:$0xff] }
   0x8   :  { %95 = vst [vmem:[#allocation2 + $0x68] sm:$0xff] %v94_v13  ;;  %93 = vst [vmem:[#allocation2 + $0x60] sm:$0xff] %v92_v14  ;;  %v96_v16 = vld [vmem:[%s1341_s0 + $0x78] sm:$0xff]  ;;  %v979_v17 = vld [vmem:[%s1342_s1 + $0x40] sm:$0xff] }
   0x9   :  { %99 = vst [vmem:[#allocation2 + $0x78] sm:$0xff] %v98_v15  ;;  %v980_v18 = vld [vmem:[%s1342_s1 + $0x88] sm:$0xff]  ;;  %97 = vst [vmem:[#allocation2 + $0x70] sm:$0xff] %v96_v16 }
   0xa   :  { %139 = vst [vmem:[#allocation3] sm:$0xff] %v979_v17  ;;  %141 = vst [vmem:[#allocation3 + $0x8] sm:$0xff] %v980_v18  ;;  %199 = vperm.xlu1 %993, %v78_v5   ;;  %194 = vperm.xlu0 %992, %v76_v6   ;;  %v291_v19 = vld [vmem:[#allocation2 + $0x9] sm:$0xff]  ;;  %v290_v20 = vld [vmem:[#allocation2 + $0x1] sm:$0xff] }
   0xb   :  { %v293_v21 = vld [vmem:[#allocation2 + $0x19] sm:$0xff]  ;;  %v292_v22 = vld [vmem:[#allocation2 + $0x11] sm:$0xff]  ;;  %v294_v25 = vld [vmem:[#allocation2 + $0x21] sm:$0xff] }
   0xc   :  { %v295_v24 = vld [vmem:[#allocation2 + $0x29] sm:$0xff]  ;;  %v297_v27 = vld [vmem:[#allocation2 + $0x39] sm:$0x7f]  ;;  %v296_v29 = vld [vmem:[#allocation2 + $0x31] sm:$0xff] }
   0xd   :  { %v298_v31 = vld [vmem:[#allocation2 + $0x41] sm:$0xff]  ;;  %v438_v41 = vld [vmem:[#allocation2 + $0xa] sm:$0xff]  ;;  %v439_v44 = vld [vmem:[#allocation2 + $0x12] sm:$0xff] }
   0xe   :  { %209 = vperm.xlu1 %993, %v82_v7   ;;  %204 = vperm.xlu0 %992, %v80_v8   ;;  %v299_v30 = vld [vmem:[#allocation2 + $0x49] sm:$0xff]  ;;  %v300_v33 = vld [vmem:[#allocation2 + $0x51] sm:$0xff]  ;;  %v440_v43 = vld [vmem:[#allocation2 + $0x1a] sm:$0xff] }
   0xf   :  { %v301_v32 = vld [vmem:[#allocation2 + $0x59] sm:$0xff]  ;;  %v302_v36 = vld [vmem:[#allocation2 + $0x61] sm:$0xff]  ;;  %v442_v46 = vld [vmem:[#allocation2 + $0x2a] sm:$0xff] }
  0x10   :  { %v303_v35 = vld [vmem:[#allocation2 + $0x69] sm:$0xff]  ;;  %v305_v38 = vld [vmem:[#allocation2 + $0x79] sm:$0x7f]  ;;  %v304_v40 = vld [vmem:[#allocation2 + $0x71] sm:$0xff] }
  0x11   :  { %v306_v23 = vld [vmem:[#allocation3] sm:$0x1]  ;;  %v307_v34 = vld [vmem:[#allocation3 + $0x8] sm:$0x1]  ;;  %v444_v49 = vld [vmem:[#allocation2 + $0x3a] sm:$0x3f] }
  0x12   :  { %219 = vperm.xlu1 %993, %v86_v9   ;;  %214 = vperm.xlu0 %992, %v84_v10   ;;  %v310_v26 = vrot.slane %v306_v23, 1  ;;  %v311_v37 = vrot.slane %v307_v34, 1  ;;  %v437_v42 = vld [vmem:[#allocation2 + $0x2] sm:$0xff]  ;;  %v453_v45 = vld [vmem:[#allocation3] sm:$0x3]  ;;  %v443_v51 = vld [vmem:[#allocation2 + $0x32] sm:$0xff] }
  0x13   :  { %v441_v47 = vld [vmem:[#allocation2 + $0x22] sm:$0xff]  ;;  %v457_v48 = vrot.slane %v453_v45, 2  ;;  %v446_v52 = vld [vmem:[#allocation2 + $0x4a] sm:$0xff]  ;;  %v448_v54 = vld [vmem:[#allocation2 + $0x5a] sm:$0xff] }
  0x14   :  { %v315_v28 = vsel %vm314_vm0, %v297_v27, %v310_v26  ;;  %v316_v39 = vsel %vm314_vm0, %v305_v38, %v311_v37  ;;  %v445_v53 = vld [vmem:[#allocation2 + $0x42] sm:$0xff]  ;;  %v447_v55 = vld [vmem:[#allocation2 + $0x52] sm:$0xff]  ;;  %v450_v57 = vld [vmem:[#allocation2 + $0x6a] sm:$0xff] }
  0x15   :  { %v462_v50 = vsel %vm461_vm1, %v444_v49, %v457_v48  ;;  %v454_v56 = vld [vmem:[#allocation3 + $0x8] sm:$0x3]  ;;  %v452_v60 = vld [vmem:[#allocation2 + $0x7a] sm:$0x3f]  ;;  %v451_v62 = vld [vmem:[#allocation2 + $0x72] sm:$0xff] }
  0x16   :  { %229 = vperm.xlu1 %993, %v90_v11   ;;  %224 = vperm.xlu0 %992, %v88_v12   ;;  %v449_v58 = vld [vmem:[#allocation2 + $0x62] sm:$0xff]  ;;  %v458_v59 = vrot.slane %v454_v56, 2  ;;  %v585_v63 = vld [vmem:[#allocation2 + $0xb] sm:$0xff]  ;;  %v586_v2 = vld [vmem:[#allocation2 + $0x13] sm:$0xff] }
  0x17   :  { %v584_v0 = vld [vmem:[#allocation2 + $0x3] sm:$0xff]  ;;  %v587_v1 = vld [vmem:[#allocation2 + $0x1b] sm:$0xff]  ;;  %v589_v4 = vld [vmem:[#allocation2 + $0x2b] sm:$0xff] }
  0x18   :  { %v463_v61 = vsel %vm461_vm1, %v452_v60, %v458_v59  ;;  %v600_v3 = vld [vmem:[#allocation3] sm:$0x7]  ;;  %v588_v5 = vld [vmem:[#allocation2 + $0x23] sm:$0xff]  ;;  %v591_v7 = vld [vmem:[#allocation2 + $0x3b] sm:$0x1f] }
  0x19   :  { %v604_v6 = vrot.slane %v600_v3, 3  ;;  %v590_v9 = vld [vmem:[#allocation2 + $0x33] sm:$0xff]  ;;  %v593_v10 = vld [vmem:[#allocation2 + $0x4b] sm:$0xff]  ;;  %v592_v11 = vld [vmem:[#allocation2 + $0x43] sm:$0xff] }
  0x1a   :  { %239 = vperm.xlu1 %993, %v94_v13   ;;  %234 = vperm.xlu0 %992, %v92_v14   ;;  %v595_v12 = vld [vmem:[#allocation2 + $0x5b] sm:$0xff]  ;;  %v594_v13 = vld [vmem:[#allocation2 + $0x53] sm:$0xff]  ;;  %v601_v14 = vld [vmem:[#allocation3 + $0x8] sm:$0x7] }
  0x1b   :  { %v609_v8 = vsel %vm608_vm2, %v591_v7, %v604_v6  ;;  %v605_v17 = vrot.slane %v601_v14, 3  ;;  %v599_v18 = vld [vmem:[#allocation2 + $0x7b] sm:$0x1f]  ;;  %v747_v27 = vld [vmem:[#allocation3] sm:$0xf]  ;;  %v744_v49 = vld [vmem:[#allocation2 + $0x6c] sm:$0xff] }
  0x1c   :  { %v733_v26 = vld [vmem:[#allocation2 + $0x14] sm:$0xff]  ;;  %v981_v59 = vld [vmem:[%s1343_s2] ss:$0 sm:$0xff]  ;;  %v983_v60 = vld [vmem:[%s1343_s2 + $0x1] ss:$0 sm:$0xff] }
  0x1d   :  { %v737_v37 = vld [vmem:[#allocation2 + $0x34] sm:$0xff] }
  0x1e   :  { %249 = vperm.xlu1 %993, %v98_v15   ;;  %244 = vperm.xlu0 %992, %v96_v16   ;;  %v597_v15 = vld [vmem:[#allocation2 + $0x6b] sm:$0xff]  ;;  %v596_v16 = vld [vmem:[#allocation2 + $0x63] sm:$0xff]  ;;  %v741_v45 = vld [vmem:[#allocation2 + $0x54] sm:$0xff] }
  0x1f   :  { %v745_v56 = vld [vmem:[#allocation2 + $0x74] sm:$0xff] }
  0x22   :  { %326 = vperm.xlu1 %993, %v291_v19   ;;  %321 = vperm.xlu0 %992, %v290_v20   ;;  %v610_v19 = vsel %vm608_vm2, %v599_v18, %v605_v17  ;;  %v598_v20 = vld [vmem:[#allocation2 + $0x73] sm:$0xff] }
  0x26   :  { %336 = vperm.xlu1 %993, %v293_v21   ;;  %331 = vperm.xlu0 %992, %v292_v22   ;;  %v732_v21 = vld [vmem:[#allocation2 + $0xc] sm:$0xff]  ;;  %v731_v22 = vld [vmem:[#allocation2 + $0x4] sm:$0xff] }
  0x2a   :  { %346 = vperm.xlu1 %993, %v295_v24   ;;  %341 = vperm.xlu0 %992, %v294_v25   ;;  %v734_v25 = vld [vmem:[#allocation2 + $0x1c] sm:$0xff] }
  0x2e   :  { %356 = vperm.xlu1 %993, %v315_v28   ;;  %351 = vperm.xlu0 %992, %v296_v29  }
  0x32   :  { %366 = vperm.xlu1 %993, %v299_v30   ;;  %361 = vperm.xlu0 %992, %v298_v31   ;;  %v736_v30 = vld [vmem:[#allocation2 + $0x2c] sm:$0xff]  ;;  %v735_v31 = vld [vmem:[#allocation2 + $0x24] sm:$0xff] }
  0x36   :  { %376 = vperm.xlu1 %993, %v301_v32   ;;  %371 = vperm.xlu0 %992, %v300_v33   ;;  %v751_v32 = vrot.slane %v747_v27, 4  ;;  %v738_v33 = vld [vmem:[#allocation2 + $0x3c] sm:$0xf] }
  0x3a   :  { %386 = vperm.xlu1 %993, %v303_v35   ;;  %381 = vperm.xlu0 %992, %v302_v36   ;;  %v756_v36 = vsel %vm755_vm3, %v738_v33, %v751_v32 }
  0x3e   :  { %396 = vperm.xlu1 %993, %v316_v39   ;;  %391 = vperm.xlu0 %992, %v304_v40   ;;  %v740_v40 = vld [vmem:[#allocation2 + $0x4c] sm:$0xff] }
  0x42   :  { %473 = vperm.xlu1 %993, %v438_v41   ;;  %468 = vperm.xlu0 %992, %v437_v42   ;;  %v739_v41 = vld [vmem:[#allocation2 + $0x44] sm:$0xff] }
  0x46   :  { %483 = vperm.xlu1 %993, %v440_v43   ;;  %478 = vperm.xlu0 %992, %v439_v44   ;;  %v742_v44 = vld [vmem:[#allocation2 + $0x5c] sm:$0xff] }
  0x4a   :  { %493 = vperm.xlu1 %993, %v442_v46   ;;  %488 = vperm.xlu0 %992, %v441_v47   ;;  %v748_v46 = vld [vmem:[#allocation3 + $0x8] sm:$0xf] }
  0x4e   :  { %503 = vperm.xlu1 %993, %v462_v50   ;;  %498 = vperm.xlu0 %992, %v443_v51   ;;  %v743_v50 = vld [vmem:[#allocation2 + $0x64] sm:$0xff]  ;;  %v752_v51 = vrot.slane %v748_v46, 4 }
  0x52   :  { %513 = vperm.xlu1 %993, %v446_v52   ;;  %508 = vperm.xlu0 %992, %v445_v53   ;;  %v746_v52 = vld [vmem:[#allocation2 + $0x7c] sm:$0xf] }
  0x56   :  { %523 = vperm.xlu1 %993, %v448_v54   ;;  %518 = vperm.xlu0 %992, %v447_v55   ;;  %v757_v55 = vsel %vm755_vm3, %v746_v52, %v752_v51 }
  0x5a   :  { %533 = vperm.xlu1 %993, %v450_v57   ;;  %528 = vperm.xlu0 %992, %v449_v58  }
  0x5e   :  { %543 = vperm.xlu1 %993, %v463_v61   ;;  %538 = vperm.xlu0 %992, %v451_v62  }
  0x62   :  { %620 = vperm.xlu1 %993, %v585_v63   ;;  %615 = vperm.xlu0 %992, %v584_v0  }
  0x66   :  { %630 = vperm.xlu1 %993, %v587_v1   ;;  %625 = vperm.xlu0 %992, %v586_v2  }
  0x6a   :  { %640 = vperm.xlu1 %993, %v589_v4   ;;  %635 = vperm.xlu0 %992, %v588_v5  }
  0x6e   :  { %650 = vperm.xlu1 %993, %v609_v8   ;;  %645 = vperm.xlu0 %992, %v590_v9  }
  0x72   :  { %660 = vperm.xlu1 %993, %v593_v10   ;;  %655 = vperm.xlu0 %992, %v592_v11  }
  0x76   :  { %670 = vperm.xlu1 %993, %v595_v12   ;;  %665 = vperm.xlu0 %992, %v594_v13  }
  0x7a   :  { %680 = vperm.xlu1 %993, %v597_v15   ;;  %675 = vperm.xlu0 %992, %v596_v16  }
  0x7e   :  { %690 = vperm.xlu1 %993, %v610_v19   ;;  %685 = vperm.xlu0 %992, %v598_v20  }
  0x81   :  { %v1080_v23 = vpop.permute.xlu1 %184  ;;  %v175_v24 = vpop.permute.xlu0 %174 }
  0x82   :  { %767 = vperm.xlu1 %993, %v732_v21   ;;  %762 = vperm.xlu0 %992, %v731_v22   ;;  %v258_v63 = vmul.f32 %v981_v59, %v175_v24  ;;  %v260_v7 = vmul.f32 %v981_v59, %v1080_v23 }
  0x85   :  { %v190_v28 = vpop.permute.xlu1 %189  ;;  %v180_v29 = vpop.permute.xlu0 %179 }
  0x86   :  { %777 = vperm.xlu1 %993, %v734_v25   ;;  %772 = vperm.xlu0 %992, %v733_v26   ;;  %v259_v0 = vmul.f32 %v981_v59, %v180_v29  ;;  %v261_v8 = vmul.f32 %v981_v59, %v190_v28 }
  0x89   :  { %v200_v34 = vpop.permute.xlu1 %199  ;;  %v195_v35 = vpop.permute.xlu0 %194 }
  0x8a   :  { %787 = vperm.xlu1 %993, %v736_v30   ;;  %782 = vperm.xlu0 %992, %v735_v31   ;;  %v263_v15 = vmul.f32 %v981_v59, %v200_v34  ;;  %v262_v16 = vmul.f32 %v981_v59, %v195_v35 }
  0x8d   :  { %v210_v38 = vpop.permute.xlu1 %209  ;;  %v205_v39 = vpop.permute.xlu0 %204 }
  0x8e   :  { %797 = vperm.xlu1 %993, %v756_v36   ;;  %792 = vperm.xlu0 %992, %v737_v37   ;;  %v265_v23 = vmul.f32 %v981_v59, %v210_v38  ;;  %v264_v24 = vmul.f32 %v981_v59, %v205_v39 }
  0x91   :  { %v220_v42 = vpop.permute.xlu1 %219  ;;  %v215_v43 = vpop.permute.xlu0 %214 }
  0x92   :  { %807 = vperm.xlu1 %993, %v740_v40   ;;  %802 = vperm.xlu0 %992, %v739_v41   ;;  %v267_v31 = vmul.f32 %v981_v59, %v220_v42  ;;  %v266_v32 = vmul.f32 %v981_v59, %v215_v43 }
  0x95   :  { %v230_v47 = vpop.permute.xlu1 %229  ;;  %v225_v48 = vpop.permute.xlu0 %224 }
  0x96   :  { %817 = vperm.xlu1 %993, %v742_v44   ;;  %812 = vperm.xlu0 %992, %v741_v45   ;;  %v269_v38 = vmul.f32 %v981_v59, %v230_v47  ;;  %v268_v39 = vmul.f32 %v981_v59, %v225_v48 }
  0x99   :  { %v240_v53 = vpop.permute.xlu1 %239  ;;  %v235_v54 = vpop.permute.xlu0 %234 }
  0x9a   :  { %827 = vperm.xlu1 %993, %v744_v49   ;;  %822 = vperm.xlu0 %992, %v743_v50   ;;  %v271_v42 = vmul.f32 %v981_v59, %v240_v53  ;;  %v270_v43 = vmul.f32 %v981_v59, %v235_v54 }
  0x9d   :  { %v1084_v57 = vpop.permute.xlu1 %249  ;;  %v1086_v58 = vpop.permute.xlu0 %244 }
  0x9e   :  { %837 = vperm.xlu1 %993, %v757_v55   ;;  %832 = vperm.xlu0 %992, %v745_v56   ;;  %v273_v47 = vmul.f32 %v981_v59, %v1084_v57  ;;  %v272_v48 = vmul.f32 %v981_v59, %v1086_v58 }
  0xa1   :  { %v327_v61 = vpop.permute.xlu1 %326  ;;  %v322_v62 = vpop.permute.xlu0 %321 }
  0xa2   :  { %v406_v1 = vmul.f32 %v983_v60, %v327_v61  ;;  %v405_v2 = vmul.f32 %v983_v60, %v322_v62 }
  0xa4   :  { %v1094_v3 = vadd.f32 %v406_v1, %v259_v0  ;;  %v1096_v4 = vadd.f32 %v405_v2, %v258_v63 }
  0xa5   :  { %v337_v5 = vpop.permute.xlu1 %336  ;;  %v332_v6 = vpop.permute.xlu0 %331 }
  0xa6   :  { %v408_v9 = vmul.f32 %v983_v60, %v337_v5  ;;  %v407_v10 = vmul.f32 %v983_v60, %v332_v6 }
  0xa8   :  { %v1099_v11 = vadd.f32 %v408_v9, %v261_v8  ;;  %v1101_v12 = vadd.f32 %v407_v10, %v260_v7 }
  0xa9   :  { %v347_v13 = vpop.permute.xlu1 %346  ;;  %v342_v14 = vpop.permute.xlu0 %341 }
  0xaa   :  { %v410_v17 = vmul.f32 %v983_v60, %v347_v13  ;;  %v409_v18 = vmul.f32 %v983_v60, %v342_v14 }
  0xac   :  { %v1103_v19 = vadd.f32 %v410_v17, %v263_v15  ;;  %v1105_v20 = vadd.f32 %v409_v18, %v262_v16 }
  0xad   :  { %v357_v21 = vpop.permute.xlu1 %356  ;;  %v352_v22 = vpop.permute.xlu0 %351 }
  0xae   :  { %v412_v25 = vmul.f32 %v983_v60, %v357_v21  ;;  %v411_v26 = vmul.f32 %v983_v60, %v352_v22 }
  0xb0   :  { %v1107_v27 = vadd.f32 %v412_v25, %v265_v23  ;;  %v1109_v28 = vadd.f32 %v411_v26, %v264_v24 }
  0xb1   :  { %v367_v29 = vpop.permute.xlu1 %366  ;;  %v362_v30 = vpop.permute.xlu0 %361 }
  0xb2   :  { %v414_v33 = vmul.f32 %v983_v60, %v367_v29  ;;  %v413_v34 = vmul.f32 %v983_v60, %v362_v30 }
  0xb4   :  { %v1111_v35 = vadd.f32 %v414_v33, %v267_v31  ;;  %v1113_v36 = vadd.f32 %v413_v34, %v266_v32  ;;  %v985_v33 = vld [vmem:[%s1343_s2 + $0x2] ss:$0 sm:$0xff] }
  0xb5   :  { %v377_v37 = vpop.permute.xlu1 %376  ;;  %v372_v40 = vpop.permute.xlu0 %371 }
  0xb6   :  { %v416_v41 = vmul.f32 %v983_v60, %v377_v37  ;;  %v415_v44 = vmul.f32 %v983_v60, %v372_v40 }
  0xb8   :  { %v1115_v45 = vadd.f32 %v416_v41, %v269_v38  ;;  %v1117_v46 = vadd.f32 %v415_v44, %v268_v39  ;;  %v1155_v44 = vld [vmem:[%s1343_s2 + $0x3] ss:$0 sm:$0xff] }
  0xb9   :  { %v387_v49 = vpop.permute.xlu1 %386  ;;  %v382_v50 = vpop.permute.xlu0 %381 }
  0xba   :  { %v418_v51 = vmul.f32 %v983_v60, %v387_v49  ;;  %v417_v52 = vmul.f32 %v983_v60, %v382_v50 }
  0xbc   :  { %v1119_v55 = vadd.f32 %v418_v51, %v271_v42  ;;  %v1121_v56 = vadd.f32 %v417_v52, %v270_v43 }
  0xbd   :  { %v397_v61 = vpop.permute.xlu1 %396  ;;  %v392_v62 = vpop.permute.xlu0 %391 }
  0xbe   :  { %v420_v63 = vmul.f32 %v983_v60, %v397_v61  ;;  %v419_v0 = vmul.f32 %v983_v60, %v392_v62 }
  0xc0   :  { %v1125_v1 = vadd.f32 %v420_v63, %v273_v47  ;;  %v1127_v2 = vadd.f32 %v419_v0, %v272_v48 }
  0xc1   :  { %v474_v53 = vpop.permute.xlu1 %473  ;;  %v469_v54 = vpop.permute.xlu0 %468 }
  0xc2   :  { %v553_v40 = vmul.f32 %v985_v33, %v474_v53  ;;  %v552_v38 = vmul.f32 %v985_v33, %v469_v54 }
  0xc4   :  { %v569_v61 = vadd.f32 %v553_v40, %v1094_v3  ;;  %v568_v62 = vadd.f32 %v552_v38, %v1096_v4 }
  0xc5   :  { %v484_v5 = vpop.permute.xlu1 %483  ;;  %v479_v6 = vpop.permute.xlu0 %478 }
  0xc6   :  { %v555_v39 = vmul.f32 %v985_v33, %v484_v5  ;;  %v554_v41 = vmul.f32 %v985_v33, %v479_v6  ;;  %v1170_v5 = vld [vmem:[%s1343_s2 + $0x4] ss:$0 sm:$0xff] }
  0xc8   :  { %v571_v63 = vadd.f32 %v555_v39, %v1099_v11  ;;  %v570_v0 = vadd.f32 %v554_v41, %v1101_v12 }
  0xc9   :  { %v494_v7 = vpop.permute.xlu1 %493  ;;  %v489_v8 = vpop.permute.xlu0 %488 }
  0xca   :  { %v557_v49 = vmul.f32 %v985_v33, %v494_v7  ;;  %v556_v50 = vmul.f32 %v985_v33, %v489_v8 }
  0xcc   :  { %v573_v6 = vadd.f32 %v557_v49, %v1103_v19  ;;  %v572_v3 = vadd.f32 %v556_v50, %v1105_v20 }
  0xcd   :  { %v504_v9 = vpop.permute.xlu1 %503  ;;  %v499_v10 = vpop.permute.xlu0 %498 }
  0xce   :  { %v559_v42 = vmul.f32 %v985_v33, %v504_v9  ;;  %v558_v43 = vmul.f32 %v985_v33, %v499_v10 }
  0xd0   :  { %v1175_v8 = vadd.f32 %v559_v42, %v1107_v27  ;;  %v1178_v11 = vadd.f32 %v558_v43, %v1109_v28 }
  0xd1   :  { %v514_v13 = vpop.permute.xlu1 %513  ;;  %v509_v14 = vpop.permute.xlu0 %508 }
  0xd2   :  { %v561_v53 = vmul.f32 %v985_v33, %v514_v13  ;;  %v560_v54 = vmul.f32 %v985_v33, %v509_v14 }
  0xd4   :  { %v1183_v20 = vadd.f32 %v561_v53, %v1111_v35 }
  0xd5   :  { %v524_v15 = vpop.permute.xlu1 %523  ;;  %v519_v57 = vpop.permute.xlu0 %518 }
  0xd6   :  { %v563_v4 = vmul.f32 %v985_v33, %v524_v15  ;;  %v562_v7 = vmul.f32 %v985_v33, %v519_v57  ;;  %v1186_v15 = vadd.f32 %v560_v54, %v1113_v36  ;;  %v1193_v57 = vld [vmem:[%s1344_s3] ss:$0 sm:$0xff] }
  0xd9   :  { %v534_v16 = vpop.permute.xlu1 %533  ;;  %v529_v58 = vpop.permute.xlu0 %528 }
  0xda   :  { %v565_v12 = vmul.f32 %v985_v33, %v534_v16  ;;  %v564_v9 = vmul.f32 %v985_v33, %v529_v58  ;;  %v1196_v16 = vadd.f32 %v563_v4, %v1115_v45  ;;  %v1199_v58 = vadd.f32 %v562_v7, %v1117_v46 }
  0xdc   :  { %v1202_v36 = vadd.f32 %v565_v12, %v1119_v55 }
  0xdd   :  { %v1129_v59 = vpop.permute.xlu1 %543  ;;  %v1131_v60 = vpop.permute.xlu0 %538 }
  0xde   :  { %v1214_v55 = vmul.f32 %v985_v33, %v1129_v59 }
  0xe1   :  { %v621_v17 = vpop.permute.xlu1 %620  ;;  %v616_v18 = vpop.permute.xlu0 %615 }
  0xe2   :  { %v700_v47 = vmul.f32 %v1155_v44, %v621_v17  ;;  %v699_v48 = vmul.f32 %v1155_v44, %v616_v18 }
  0xe4   :  { %v716_v14 = vadd.f32 %v700_v47, %v569_v61  ;;  %v715_v17 = vadd.f32 %v699_v48, %v568_v62 }
  0xe5   :  { %v631_v21 = vpop.permute.xlu1 %630  ;;  %v626_v22 = vpop.permute.xlu0 %625 }
  0xe6   :  { %v702_v27 = vmul.f32 %v1155_v44, %v631_v21  ;;  %v701_v28 = vmul.f32 %v1155_v44, %v626_v22  ;;  %v1205_v21 = vadd.f32 %v564_v9, %v1121_v56  ;;  %v1217_v56 = vmul.f32 %v985_v33, %v1131_v60 }
  0xe8   :  { %v718_v42 = vadd.f32 %v702_v27, %v571_v63 }
  0xe9   :  { %v641_v23 = vpop.permute.xlu1 %640  ;;  %v636_v24 = vpop.permute.xlu0 %635 }
  0xea   :  { %v704_v22 = vmul.f32 %v1155_v44, %v641_v23  ;;  %v703_v38 = vmul.f32 %v1155_v44, %v636_v24  ;;  %v717_v23 = vadd.f32 %v701_v28, %v570_v0 }
  0xec   :  { %v720_v61 = vadd.f32 %v704_v22, %v573_v6  ;;  %v719_v62 = vadd.f32 %v703_v38, %v572_v3 }
  0xed   :  { %v1133_v25 = vpop.permute.xlu1 %650  ;;  %v1135_v26 = vpop.permute.xlu0 %645 }
  0xee   :  { %v706_v60 = vmul.f32 %v1155_v44, %v1133_v25  ;;  %v705_v33 = vmul.f32 %v1155_v44, %v1135_v26 }
  0xf1   :  { %v1137_v29 = vpop.permute.xlu1 %660  ;;  %v1139_v30 = vpop.permute.xlu0 %655 }
  0xf2   :  { %v708_v25 = vmul.f32 %v1155_v44, %v1137_v29  ;;  %v707_v26 = vmul.f32 %v1155_v44, %v1139_v30  ;;  %v722_v29 = vadd.f32 %v706_v60, %v1175_v8  ;;  %v721_v30 = vadd.f32 %v705_v33, %v1178_v11 }
  0xf4   :  { %v724_v8 = vadd.f32 %v708_v25, %v1183_v20  ;;  %v723_v11 = vadd.f32 %v707_v26, %v1186_v15 }
  0xf5   :  { %v1141_v31 = vpop.permute.xlu1 %670  ;;  %v1143_v32 = vpop.permute.xlu0 %665 }
  0xf9   :  { %v1148_v34 = vpop.permute.xlu1 %680  ;;  %v1150_v37 = vpop.permute.xlu0 %675 }
  0xfd   :  { %v1157_v51 = vpop.permute.xlu1 %690  ;;  %v1159_v52 = vpop.permute.xlu0 %685 }
 0x101   :  { %v768_v10 = vpop.permute.xlu1 %767  ;;  %v763_v13 = vpop.permute.xlu0 %762 }
 0x102   :  { %v847_v18 = vmul.f32 %v1170_v5, %v768_v10  ;;  %v846_v19 = vmul.f32 %v1170_v5, %v763_v13 }
 0x104   :  { %v863_v35 = vadd.f32 %v847_v18, %v716_v14  ;;  %v862_v40 = vadd.f32 %v846_v19, %v715_v17 }
 0x105   :  { %v778_v39 = vpop.permute.xlu1 %777  ;;  %v773_v41 = vpop.permute.xlu0 %772 }
 0x106   :  { %v886_v45 = vadd.f32 %v1193_v57, %v863_v35  ;;  %v885_v49 = vadd.f32 %v1193_v57, %v862_v40  ;;  %v849_v46 = vmul.f32 %v1170_v5, %v778_v39  ;;  %v848_v50 = vmul.f32 %v1170_v5, %v773_v41 }
 0x108   :  { %vm902_vm5 = vcmp.ge.f32.partialorder %v886_v45, 0.0  ;;  %v918_v24 = vmul.f32 0.1, %v886_v45  ;;  %vm901_vm6 = vcmp.ge.f32.partialorder %v885_v49, 0.0  ;;  %v917_v43 = vmul.f32 0.1, %v885_v49 }
 0x109   :  { %v865_v47 = vadd.f32 %v849_v46, %v718_v42  ;;  %v864_v48 = vadd.f32 %v848_v50, %v717_v23  ;;  %v788_v53 = vpop.permute.xlu1 %787  ;;  %v783_v54 = vpop.permute.xlu0 %782  ;;  %v710_v23 = vmul.f32 %v1155_v44, %v1141_v31  ;;  %v712_v31 = vmul.f32 %v1155_v44, %v1148_v34 }
 0x10a   :  { %v934_v4 = vsel %vm902_vm5, %v886_v45, %v918_v24  ;;  %v933_v7 = vsel %vm901_vm6, %v885_v49, %v917_v43  ;;  %v851_v59 = vmul.f32 %v1170_v5, %v788_v53  ;;  %v850_v12 = vmul.f32 %v1170_v5, %v783_v54 }
 0x10b   :  { %951 = vst.msk [vmem:[%s1345_s4 + $0x8] sm:$0xff] %vm949_vm4, %v934_v4  ;;  %950 = vst.msk [vmem:[%s1345_s4] sm:$0xff] %vm949_vm4, %v933_v7  ;;  %v888_v63 = vadd.f32 %v1193_v57, %v865_v47  ;;  %v887_v0 = vadd.f32 %v1193_v57, %v864_v48  ;;  %v709_v24 = vmul.f32 %v1155_v44, %v1143_v32 }
 0x10c   :  { %v867_v6 = vadd.f32 %v851_v59, %v720_v61  ;;  %v866_v3 = vadd.f32 %v850_v12, %v719_v62  ;;  %v711_v32 = vmul.f32 %v1155_v44, %v1150_v37  ;;  %v726_v34 = vadd.f32 %v710_v23, %v1196_v16 }
 0x10d   :  { %vm904_vm7 = vcmp.ge.f32.partialorder %v888_v63, 0.0  ;;  %v920_v9 = vmul.f32 0.1, %v888_v63  ;;  %vm903_vm8 = vcmp.ge.f32.partialorder %v887_v0, 0.0  ;;  %v919_v10 = vmul.f32 0.1, %v887_v0  ;;  %v798_v13 = vpop.permute.xlu1 %797  ;;  %v793_v14 = vpop.permute.xlu0 %792 }
 0x10e   :  { %v890_v17 = vadd.f32 %v1193_v57, %v867_v6  ;;  %v889_v18 = vadd.f32 %v1193_v57, %v866_v3  ;;  %v853_v19 = vmul.f32 %v1170_v5, %v798_v13  ;;  %v852_v27 = vmul.f32 %v1170_v5, %v793_v14 }
 0x10f   :  { %v936_v28 = vsel %vm904_vm7, %v888_v63, %v920_v9  ;;  %v935_v35 = vsel %vm903_vm8, %v887_v0, %v919_v10  ;;  %v725_v37 = vadd.f32 %v709_v24, %v1199_v58  ;;  %v728_v16 = vadd.f32 %v712_v31, %v1202_v36 }
 0x110   :  { %953 = vst.msk [vmem:[%s1345_s4 + $0x18] sm:$0xff] %vm949_vm4, %v936_v28  ;;  %952 = vst.msk [vmem:[%s1345_s4 + $0x10] sm:$0xff] %vm949_vm4, %v935_v35  ;;  %vm906_vm9 = vcmp.ge.f32.partialorder %v890_v17, 0.0  ;;  %v922_v40 = vmul.f32 0.1, %v890_v17  ;;  %vm905_vm10 = vcmp.ge.f32.partialorder %v889_v18, 0.0  ;;  %v869_v38 = vadd.f32 %v853_v19, %v722_v29 }
 0x111   :  { %v921_v22 = vmul.f32 0.1, %v889_v18  ;;  %v868_v39 = vadd.f32 %v852_v27, %v721_v30  ;;  %v808_v41 = vpop.permute.xlu1 %807  ;;  %v803_v45 = vpop.permute.xlu0 %802  ;;  %v727_v58 = vadd.f32 %v711_v32, %v1205_v21  ;;  %v714_v14 = vmul.f32 %v1155_v44, %v1157_v51 }
 0x112   :  { %v938_v49 = vsel %vm906_vm9, %v890_v17, %v922_v40  ;;  %v855_v50 = vmul.f32 %v1170_v5, %v808_v41  ;;  %v854_v42 = vmul.f32 %v1170_v5, %v803_v45  ;;  %v892_v20 = vadd.f32 %v1193_v57, %v869_v38 }
 0x113   :  { %v937_v46 = vsel %vm905_vm10, %v889_v18, %v921_v22  ;;  %955 = vst.msk [vmem:[%s1345_s4 + $0x28] sm:$0xff] %vm949_vm4, %v938_v49  ;;  %v891_v15 = vadd.f32 %v1193_v57, %v868_v39  ;;  %v713_v17 = vmul.f32 %v1155_v44, %v1159_v52  ;;  %v583_v51 = vadd.f32 %v1214_v55, %v1125_v1 }
 0x114   :  { %954 = vst.msk [vmem:[%s1345_s4 + $0x20] sm:$0xff] %vm949_vm4, %v937_v46  ;;  %v871_v43 = vadd.f32 %v855_v50, %v724_v8  ;;  %v870_v61 = vadd.f32 %v854_v42, %v723_v11  ;;  %vm908_vm11 = vcmp.ge.f32.partialorder %v892_v20, 0.0  ;;  %v924_v62 = vmul.f32 0.1, %v892_v20 }
 0x115   :  { %vm907_vm12 = vcmp.ge.f32.partialorder %v891_v15, 0.0  ;;  %v923_v47 = vmul.f32 0.1, %v891_v15  ;;  %v818_v48 = vpop.permute.xlu1 %817  ;;  %v813_v53 = vpop.permute.xlu0 %812  ;;  %v582_v44 = vadd.f32 %v1217_v56, %v1127_v2  ;;  %v730_v1 = vadd.f32 %v714_v14, %v583_v51 }
 0x116   :  { %v894_v54 = vadd.f32 %v1193_v57, %v871_v43  ;;  %v893_v4 = vadd.f32 %v1193_v57, %v870_v61  ;;  %v857_v7 = vmul.f32 %v1170_v5, %v818_v48  ;;  %v856_v59 = vmul.f32 %v1170_v5, %v813_v53 }
 0x117   :  { %v940_v12 = vsel %vm908_vm11, %v892_v20, %v924_v62  ;;  %v939_v60 = vsel %vm907_vm12, %v891_v15, %v923_v47  ;;  %v729_v55 = vadd.f32 %v713_v17, %v582_v44 }
 0x118   :  { %957 = vst.msk [vmem:[%s1345_s4 + $0x38] sm:$0xff] %vm949_vm4, %v940_v12  ;;  %956 = vst.msk [vmem:[%s1345_s4 + $0x30] sm:$0xff] %vm949_vm4, %v939_v60  ;;  %vm910_vm13 = vcmp.ge.f32.partialorder %v894_v54, 0.0  ;;  %v926_v33 = vmul.f32 0.1, %v894_v54  ;;  %vm909_vm14 = vcmp.ge.f32.partialorder %v893_v4, 0.0  ;;  %v873_v0 = vadd.f32 %v857_v7, %v726_v34 }
 0x119   :  { %v925_v63 = vmul.f32 0.1, %v893_v4  ;;  %v872_v25 = vadd.f32 %v856_v59, %v725_v37  ;;  %v828_v26 = vpop.permute.xlu1 %827  ;;  %v823_v6 = vpop.permute.xlu0 %822 }
 0x11a   :  { %v942_v3 = vsel %vm910_vm13, %v894_v54, %v926_v33  ;;  %v859_v10 = vmul.f32 %v1170_v5, %v828_v26  ;;  %v858_v13 = vmul.f32 %v1170_v5, %v823_v6  ;;  %v896_v36 = vadd.f32 %v1193_v57, %v873_v0 }
 0x11b   :  { %v941_v9 = vsel %vm909_vm14, %v893_v4, %v925_v63  ;;  %959 = vst.msk [vmem:[%s1345_s4 + $0x48] sm:$0xff] %vm949_vm4, %v942_v3  ;;  %v895_v21 = vadd.f32 %v1193_v57, %v872_v25 }
 0x11c   :  { %958 = vst.msk [vmem:[%s1345_s4 + $0x40] sm:$0xff] %vm949_vm4, %v941_v9  ;;  %v875_v52 = vadd.f32 %v859_v10, %v728_v16  ;;  %v874_v18 = vadd.f32 %v858_v13, %v727_v58  ;;  %vm912_vm15 = vcmp.ge.f32.partialorder %v896_v36, 0.0  ;;  %v928_v19 = vmul.f32 0.1, %v896_v36 }
 0x11d   :  { %vm911_vm0 = vcmp.ge.f32.partialorder %v895_v21, 0.0  ;;  %v927_v27 = vmul.f32 0.1, %v895_v21  ;;  %v838_v29 = vpop.permute.xlu1 %837  ;;  %v833_v30 = vpop.permute.xlu0 %832 }
 0x11e   :  { %v898_v28 = vadd.f32 %v1193_v57, %v875_v52  ;;  %v897_v35 = vadd.f32 %v1193_v57, %v874_v18  ;;  %v861_v40 = vmul.f32 %v1170_v5, %v838_v29  ;;  %v860_v22 = vmul.f32 %v1170_v5, %v833_v30 }
 0x11f   :  { %v944_v8 = vsel %vm912_vm15, %v896_v36, %v928_v19  ;;  %v943_v2 = vsel %vm911_vm0, %v895_v21, %v927_v27 }
 0x120   :  { %961 = vst.msk [vmem:[%s1345_s4 + $0x58] sm:$0xff] %vm949_vm4, %v944_v8  ;;  %960 = vst.msk [vmem:[%s1345_s4 + $0x50] sm:$0xff] %vm949_vm4, %v943_v2  ;;  %vm914_vm1 = vcmp.ge.f32.partialorder %v898_v28, 0.0  ;;  %v930_v56 = vmul.f32 0.1, %v898_v28  ;;  %vm913_vm2 = vcmp.ge.f32.partialorder %v897_v35, 0.0  ;;  %v877_v38 = vadd.f32 %v861_v40, %v730_v1 }
 0x121   :  { %v929_v11 = vmul.f32 0.1, %v897_v35  ;;  %v876_v5 = vadd.f32 %v860_v22, %v729_v55 }
 0x122   :  { %v946_v39 = vsel %vm914_vm1, %v898_v28, %v930_v56  ;;  %v900_v45 = vadd.f32 %v1193_v57, %v877_v38 }
 0x123   :  { %v945_v41 = vsel %vm913_vm2, %v897_v35, %v929_v11  ;;  %963 = vst.msk [vmem:[%s1345_s4 + $0x68] sm:$0xff] %vm949_vm4, %v946_v39  ;;  %v899_v49 = vadd.f32 %v1193_v57, %v876_v5 }
 0x124   :  { %962 = vst.msk [vmem:[%s1345_s4 + $0x60] sm:$0xff] %vm949_vm4, %v945_v41  ;;  %vm916_vm3 = vcmp.ge.f32.partialorder %v900_v45, 0.0  ;;  %v932_v46 = vmul.f32 0.1, %v900_v45 }
 0x125   :  { %vm915_vm5 = vcmp.ge.f32.partialorder %v899_v49, 0.0  ;;  %v931_v50 = vmul.f32 0.1, %v899_v49 }
 0x126   :  { %v948_v42 = vsel %vm916_vm3, %v900_v45, %v932_v46 }
 0x127   :  { %v947_v23 = vsel %vm915_vm5, %v899_v49, %v931_v50  ;;  %965 = vst.msk [vmem:[%s1345_s4 + $0x78] sm:$0xff] %vm949_vm4, %v948_v42 }
 0x128   :  { %964 = vst.msk [vmem:[%s1345_s4 + $0x70] sm:$0xff] %vm949_vm4, %v947_v23 }

// kernel: _lambda_.5
= control target key start
LH: loop header
LB: loop body
LE: loop exit
PB: predicated region body
PF: predicated region fallthrough
CT: control target
= control target key end

     0   :  { %s2189_s21 = smov 124   ;;  %vm214_vm0 = vcmask 1041408   ;;  %vm189_vm1 = vcmask 15360   ;;  %vm762_vm2 = vcmask 1046528   ;;  %vm1399_vm3 = vcmask 1045504   ;;  %s2493_s0 = inlined_call_operand.vmem [shape: f32[2,72,4], index: 0, kind: input, shape index: {}, may-alias: {0,1}]   ;;  %s2494_s1 = inlined_call_operand.vmem [shape: f32[2,72,4], index: 1, kind: input, shape index: {}, may-alias: {0,1}]   ;;  %s2495_s2 = inlined_call_operand.vmem [shape: f32[5,2,8], index: 2, kind: input, shape index: {}]   ;;  %s2496_s3 = inlined_call_operand.vmem [shape: f32[1,1,8], index: 3, kind: input, shape index: {}]   ;;  %s2497_s4 = inlined_call_operand.vmem [shape: f32[2,32,8], index: 4, kind: output, shape index: {}]  }
   0x1   :  { %v1797_v0 = vld [vmem:[%s2495_s2 + $0x2] sm:$0x3]  ;;  %v72_v1 = vld [vmem:[%s2493_s0 + $0x10] sm:$0xff]  ;;  %v74_v2 = vld [vmem:[%s2493_s0 + $0x18] sm:$0xff]  ;;  %vm1725_vm4 = vcmask 31744   ;;  %vm1773_vm5 = vcmask 64512  }
   0x2   :  { %471 = vrot.lane.b32.xlu0 %v1797_v0, %s2189_s21  ;;  %73 = vst [vmem:[#allocation2 + $0x10] sm:$0xff] %v72_v1  ;;  %75 = vst [vmem:[#allocation2 + $0x18] sm:$0xff] %v74_v2  ;;  %v68_v3 = vld [vmem:[%s2493_s0] sm:$0xff]  ;;  %v70_v4 = vld [vmem:[%s2493_s0 + $0x8] sm:$0xff]  ;;  %1982 = vmatprep.subr.msk.mxu0 %vm214_vm0, %v1797_v0 }
   0x3   :  { %v76_v5 = vld [vmem:[%s2493_s0 + $0x20] sm:$0xff]  ;;  %69 = vst [vmem:[#allocation2] sm:$0xff] %v68_v3  ;;  %71 = vst [vmem:[#allocation2 + $0x8] sm:$0xff] %v70_v4  ;;  %v78_v6 = vld [vmem:[%s2493_s0 + $0x28] sm:$0xff]  ;;  %1983 = vmatpush3.msk.msra.mxu0 %vm214_vm0, %v1797_v0 }
   0x4   :  { %77 = vst [vmem:[#allocation2 + $0x20] sm:$0xff] %v76_v5  ;;  %v80_v7 = vld [vmem:[%s2493_s0 + $0x30] sm:$0xff]  ;;  %v82_v8 = vld [vmem:[%s2493_s0 + $0x38] sm:$0xff]  ;;  %79 = vst [vmem:[#allocation2 + $0x28] sm:$0xff] %v78_v6 }
   0x5   :  { %81 = vst [vmem:[#allocation2 + $0x30] sm:$0xff] %v80_v7  ;;  %83 = vst [vmem:[#allocation2 + $0x38] sm:$0xff] %v82_v8  ;;  %v84_v9 = vld [vmem:[%s2493_s0 + $0x48] sm:$0xff]  ;;  %v86_v10 = vld [vmem:[%s2493_s0 + $0x50] sm:$0xff] }
   0x6   :  { %v88_v11 = vld [vmem:[%s2493_s0 + $0x58] sm:$0xff]  ;;  %85 = vst [vmem:[#allocation2 + $0x40] sm:$0xff] %v84_v9  ;;  %87 = vst [vmem:[#allocation2 + $0x48] sm:$0xff] %v86_v10  ;;  %v90_v12 = vld [vmem:[%s2493_s0 + $0x60] sm:$0xff] }
   0x7   :  { %89 = vst [vmem:[#allocation2 + $0x50] sm:$0xff] %v88_v11  ;;  %v92_v13 = vld [vmem:[%s2493_s0 + $0x68] sm:$0xff]  ;;  %v94_v14 = vld [vmem:[%s2493_s0 + $0x70] sm:$0xff]  ;;  %91 = vst [vmem:[#allocation2 + $0x58] sm:$0xff] %v90_v12 }
   0x8   :  { %93 = vst [vmem:[#allocation2 + $0x60] sm:$0xff] %v92_v13  ;;  %95 = vst [vmem:[#allocation2 + $0x68] sm:$0xff] %v94_v14  ;;  %v96_v15 = vld [vmem:[%s2493_s0 + $0x78] sm:$0xff]  ;;  %v98_v16 = vld [vmem:[%s2493_s0 + $0x80] sm:$0xff]  ;;  %s2190_s0 = smov 126  }
   0x9   :  { %v170_v17 = vld [vmem:[%s2495_s2] sm:$0x3]  ;;  %97 = vst [vmem:[#allocation2 + $0x70] sm:$0xff] %v96_v15  ;;  %99 = vst [vmem:[#allocation2 + $0x78] sm:$0xff] %v98_v16  ;;  %v1796_v19 = vld [vmem:[%s2494_s1 + $0x88] sm:$0xff] }
   0xa   :  { %v1795_v18 = vld [vmem:[%s2494_s1 + $0x40] sm:$0xff]  ;;  %1996 = vmatprep.subr.msk.mxu0 %vm214_vm0, %v170_v17  ;;  %141 = vst [vmem:[#allocation3 + $0x8] sm:$0xff] %v1796_v19  ;;  %v174_v20 = vld [vmem:[#allocation2 + $0x11] ss:$2 sm:$0xff]  ;;  %v157_v30 = vld [vmem:[#allocation2 + $0x10] ss:$2 sm:$0xff] }
   0xb   :  { %139 = vst [vmem:[#allocation3] sm:$0xff] %v1795_v18  ;;  %457 = vrot.lane.b32.xlu1 %v174_v20, %s2190_s0  ;;  %v172_v21 = vld [vmem:[#allocation2 + $0x1] ss:$2 sm:$0xff]  ;;  %v155_v29 = vld [vmem:[#allocation2] ss:$2 sm:$0xff] }
   0xc   :  { %455 = vrot.lane.b32.xlu0 %v172_v21, %s2190_s0  ;;  %v176_v22 = vld [vmem:[#allocation2 + $0x21] ss:$2 sm:$0xff]  ;;  %1984 = vmatprep.mubr.msk.f32.mxu0 %vm189_vm1, %v172_v21  ;;  %v178_v23 = vld [vmem:[#allocation2 + $0x31] ss:$2 sm:$0xff]  ;;  %v159_v31 = vld [vmem:[#allocation2 + $0x20] ss:$2 sm:$0xff] }
   0xd   :  { %1985 = vmatmul.mubr.msk.f32.vlgmr.msra.gmra.mrb[0].mxu0 %vm189_vm1, %v174_v20  ;;  %v1834_v24 = vld [vmem:[%s2495_s2 + $0x4] sm:$0x3]  ;;  %v2309_v32 = vld [vmem:[%s2495_s2 + $0x6] sm:$0x3]  ;;  %v161_v33 = vld [vmem:[#allocation2 + $0x30] ss:$2 sm:$0xff] }
   0xe   :  { %1987 = vmatprep.mubr.msk.f32.mxu0 %vm189_vm1, %v176_v22  ;;  %1997 = vmatpush3.msk.msra.mxu0 %vm214_vm0, %v170_v17  ;;  %v180_v25 = vld [vmem:[#allocation2 + $0x41] ss:$2 sm:$0xff]  ;;  %v182_v26 = vld [vmem:[#allocation2 + $0x51] ss:$2 sm:$0xff]  ;;  %v163_v34 = vld [vmem:[#allocation2 + $0x40] ss:$2 sm:$0xff] }
   0xf   :  { %459 = vrot.lane.b32.xlu1 %v176_v22, %s2190_s0  ;;  %2038 = vmatprep.subr.msk.mxu0 %vm214_vm0, %v1834_v24  ;;  %v184_v27 = vld [vmem:[#allocation2 + $0x61] ss:$2 sm:$0xff]  ;;  %v165_v35 = vld [vmem:[#allocation2 + $0x50] ss:$2 sm:$0xff]  ;;  %v167_v36 = vld [vmem:[#allocation2 + $0x60] ss:$2 sm:$0xff] }
  0x10   :  { %461 = vrot.lane.b32.xlu0 %v178_v23, %s2190_s0  ;;  %v186_v28 = vld [vmem:[#allocation2 + $0x71] ss:$2 sm:$0xff]  ;;  %v169_v37 = vld [vmem:[#allocation2 + $0x70] ss:$2 sm:$0xff]  ;;  %v2333_v44 = vld [vmem:[%s2495_s2 + $0x8] sm:$0x3] }
  0x11   :  { %1988 = vmatmul.mubr.msk.f32.gmra.mrb[2].mxu0 %vm189_vm1, %v178_v23  ;;  %v738_v38 = vld [vmem:[#allocation2 + $0x2] ss:$2 sm:$0xff]  ;;  %v740_v40 = vld [vmem:[#allocation2 + $0x12] ss:$2 sm:$0xff]  ;;  %v1057_v53 = vld [vmem:[#allocation2 + $0x3] ss:$2 sm:$0xff] }
  0x12   :  { %1990 = vmatprep.mubr.msk.f32.mxu0 %vm189_vm1, %v180_v25  ;;  %v753_v39 = vld [vmem:[#allocation3] ss:$2 sm:$0x1]  ;;  %v742_v42 = vld [vmem:[#allocation2 + $0x22] ss:$2 sm:$0xff]  ;;  %s2191_s2 = smov 4  }
  0x13   :  { %463 = vrot.lane.b32.xlu1 %v180_v25, %s2190_s0  ;;  %v758_v41 = vrot.slane %v753_v39, 1  ;;  %v744_v43 = vld [vmem:[#allocation2 + $0x32] ss:$2 sm:$0x7f]  ;;  %v746_v46 = vld [vmem:[#allocation2 + $0x42] ss:$2 sm:$0xff] }
  0x14   :  { %465 = vrot.lane.b32.xlu0 %v182_v26, %s2190_s0  ;;  %v755_v47 = vld [vmem:[#allocation3 + $0x8] ss:$2 sm:$0x1]  ;;  %v748_v48 = vld [vmem:[#allocation2 + $0x52] ss:$2 sm:$0xff] }
  0x15   :  { %1991 = vmatmul.mubr.msk.f32.gmra.mrb[4].mxu0 %vm189_vm1, %v182_v26  ;;  %v763_v45 = vsel %vm762_vm2, %v744_v43, %v758_v41  ;;  %v759_v49 = vrot.slane %v755_v47, 1  ;;  %v750_v50 = vld [vmem:[#allocation2 + $0x62] ss:$2 sm:$0xff]  ;;  %v752_v51 = vld [vmem:[#allocation2 + $0x72] ss:$2 sm:$0x7f] }
  0x16   :  { %1993 = vmatprep.mubr.msk.f32.mxu0 %vm189_vm1, %v184_v27  ;;  %v1073_v54 = vld [vmem:[#allocation3 + $0x1] ss:$2 sm:$0x1]  ;;  %v1061_v57 = vld [vmem:[#allocation2 + $0x23] ss:$2 sm:$0xff] }
  0x17   :  { %467 = vrot.lane.b32.xlu1 %v184_v27, %s2190_s0  ;;  %v764_v52 = vsel %vm762_vm2, %v752_v51, %v759_v49  ;;  %v1059_v55 = vld [vmem:[#allocation2 + $0x13] ss:$2 sm:$0xff]  ;;  %v1078_v56 = vrot.slane %v1073_v54, 1  ;;  %v1065_v60 = vld [vmem:[#allocation2 + $0x43] ss:$2 sm:$0xff] }
  0x18   :  { %469 = vrot.lane.b32.xlu0 %v186_v28, %s2190_s0  ;;  %v1063_v58 = vld [vmem:[#allocation2 + $0x33] ss:$2 sm:$0x7f]  ;;  %v1075_v61 = vld [vmem:[#allocation3 + $0x9] ss:$2 sm:$0x1] }
  0x19   :  { %1994 = vmatmul.mubr.msk.f32.gmra.mrb[6].mxu0 %vm189_vm1, %v186_v28  ;;  %v1082_v59 = vsel %vm762_vm2, %v1063_v58, %v1078_v56  ;;  %v1067_v62 = vld [vmem:[#allocation2 + $0x53] ss:$2 sm:$0xff]  ;;  %v1079_v63 = vrot.slane %v1075_v61, 1  ;;  %v1069_v0 = vld [vmem:[#allocation2 + $0x63] ss:$2 sm:$0xff] }
  0x1a   :  { %1998 = vmatprep.mubr.msk.f32.mxu0 %vm189_vm1, %v155_v29  ;;  %v1071_v1 = vld [vmem:[#allocation2 + $0x73] ss:$2 sm:$0x7f]  ;;  %v1376_v3 = vld [vmem:[#allocation2 + $0x4] ss:$2 sm:$0xff] }
  0x1b   :  { %612 = vrot.lane.b32.xlu1 %v170_v17, %s2189_s21  ;;  %v1083_v2 = vsel %vm762_vm2, %v1071_v1, %v1079_v63  ;;  %v1391_v4 = vld [vmem:[#allocation3] ss:$2 sm:$0x3]  ;;  %v1380_v7 = vld [vmem:[#allocation2 + $0x24] ss:$2 sm:$0xff] }
  0x1c   :  { %596 = vrot.lane.b32.xlu0 %v155_v29, %s2190_s0  ;;  %v1378_v5 = vld [vmem:[#allocation2 + $0x14] ss:$2 sm:$0xff]  ;;  %v1395_v6 = vrot.slane %v1391_v4, 2  ;;  %v1384_v10 = vld [vmem:[#allocation2 + $0x44] ss:$2 sm:$0xff] }
  0x1d   :  { %1999 = vmatmul.mubr.msk.f32.vlgmr.msra.gmra.mrb[0].mxu0 %vm189_vm1, %v157_v30  ;;  %v1382_v8 = vld [vmem:[#allocation2 + $0x34] ss:$2 sm:$0x3f]  ;;  %v1392_v11 = vld [vmem:[#allocation3 + $0x8] ss:$2 sm:$0x3] }
  0x1e   :  { %2001 = vmatprep.mubr.msk.f32.mxu0 %vm189_vm1, %v159_v31  ;;  %2039 = vmatpush3.msk.msra.mxu0 %vm214_vm0, %v1834_v24  ;;  %v1400_v9 = vsel %vm1399_vm3, %v1382_v8, %v1395_v6  ;;  %v1386_v12 = vld [vmem:[#allocation2 + $0x54] ss:$2 sm:$0xff]  ;;  %v1396_v13 = vrot.slane %v1392_v11, 2  ;;  %v1388_v14 = vld [vmem:[#allocation2 + $0x64] ss:$2 sm:$0xff] }
  0x1f   :  { %598 = vrot.lane.b32.xlu1 %v157_v30, %s2190_s0  ;;  %2066 = vmatprep.subr.msk.mxu0 %vm214_vm0, %v2309_v32  ;;  %v1390_v15 = vld [vmem:[#allocation2 + $0x74] ss:$2 sm:$0x3f] }
  0x20   :  { %600 = vrot.lane.b32.xlu0 %v159_v31, %s2190_s0  ;;  %v1401_v16 = vsel %vm1399_vm3, %v1390_v15, %v1396_v13 }
  0x21   :  { %2002 = vmatmul.mubr.msk.f32.gmra.mrb[2].mxu0 %vm189_vm1, %v161_v33 }
  0x22   :  { %2004 = vmatprep.mubr.msk.f32.mxu0 %vm189_vm1, %v163_v34 }
  0x23   :  { %602 = vrot.lane.b32.xlu1 %v161_v33, %s2190_s0 }
  0x24   :  { %604 = vrot.lane.b32.xlu0 %v163_v34, %s2190_s0 }
  0x25   :  { %2005 = vmatmul.mubr.msk.f32.gmra.mrb[4].mxu0 %vm189_vm1, %v165_v35 }
  0x26   :  { %2007 = vmatprep.mubr.msk.f32.mxu0 %vm189_vm1, %v167_v36 }
  0x27   :  { %606 = vrot.lane.b32.xlu1 %v165_v35, %s2190_s0 }
  0x28   :  { %608 = vrot.lane.b32.xlu0 %v167_v36, %s2190_s0 }
  0x29   :  { %2008 = vmatmul.mubr.msk.f32.gmra.mrb[6].mxu0 %vm189_vm1, %v169_v37 }
  0x2a   :  { %2040 = vmatprep.mubr.msk.f32.mxu0 %vm189_vm1, %v738_v38 }
  0x2b   :  { %610 = vrot.lane.b32.xlu1 %v169_v37, %s2190_s0 }
  0x2c   :  { %923 = vrot.lane.b32.xlu0 %v1834_v24, %s2189_s21 }
  0x2d   :  { %2041 = vmatmul.mubr.msk.f32.vlgmr.msra.gmra.mrb[0].mxu0 %vm189_vm1, %v740_v40 }
  0x2e   :  { %2043 = vmatprep.mubr.msk.f32.mxu0 %vm189_vm1, %v742_v42  ;;  %2067 = vmatpush3.msk.msra.mxu0 %vm214_vm0, %v2309_v32 }
  0x2f   :  { %907 = vrot.lane.b32.xlu1 %v738_v38, %s2190_s0  ;;  %2094 = vmatprep.subr.msk.mxu0 %vm214_vm0, %v2333_v44 }
  0x30   :  { %909 = vrot.lane.b32.xlu0 %v740_v40, %s2190_s0 }
  0x31   :  { %2044 = vmatmul.mubr.msk.f32.gmra.mrb[2].mxu0 %vm189_vm1, %v763_v45 }
  0x32   :  { %2046 = vmatprep.mubr.msk.f32.mxu0 %vm189_vm1, %v746_v46 }
  0x33   :  { %911 = vrot.lane.b32.xlu1 %v742_v42, %s2190_s0 }
  0x34   :  { %913 = vrot.lane.b32.xlu0 %v763_v45, %s2190_s0 }
  0x35   :  { %2047 = vmatmul.mubr.msk.f32.gmra.mrb[4].mxu0 %vm189_vm1, %v748_v48 }
  0x36   :  { %2049 = vmatprep.mubr.msk.f32.mxu0 %vm189_vm1, %v750_v50 }
  0x37   :  { %915 = vrot.lane.b32.xlu1 %v746_v46, %s2190_s0 }
  0x38   :  { %917 = vrot.lane.b32.xlu0 %v748_v48, %s2190_s0 }
  0x39   :  { %2050 = vmatmul.mubr.msk.f32.gmra.mrb[6].mxu0 %vm189_vm1, %v764_v52 }
  0x3a   :  { %2068 = vmatprep.mubr.msk.f32.mxu0 %vm189_vm1, %v1057_v53 }
  0x3b   :  { %919 = vrot.lane.b32.xlu1 %v750_v50, %s2190_s0 }
  0x3c   :  { %921 = vrot.lane.b32.xlu0 %v764_v52, %s2190_s0 }
  0x3d   :  { %2069 = vmatmul.mubr.msk.f32.vlgmr.msra.gmra.mrb[0].mxu0 %vm189_vm1, %v1059_v55 }
  0x3e   :  { %2071 = vmatprep.mubr.msk.f32.mxu0 %vm189_vm1, %v1061_v57  ;;  %2095 = vmatpush3.msk.msra.mxu0 %vm214_vm0, %v2333_v44 }
  0x3f   :  { %1242 = vrot.lane.b32.xlu1 %v2309_v32, %s2189_s21 }
  0x40   :  { %1226 = vrot.lane.b32.xlu0 %v1057_v53, %s2190_s0 }
  0x41   :  { %2072 = vmatmul.mubr.msk.f32.gmra.mrb[2].mxu0 %vm189_vm1, %v1082_v59 }
  0x42   :  { %2074 = vmatprep.mubr.msk.f32.mxu0 %vm189_vm1, %v1065_v60 }
  0x43   :  { %1228 = vrot.lane.b32.xlu1 %v1059_v55, %s2190_s0 }
  0x44   :  { %1230 = vrot.lane.b32.xlu0 %v1061_v57, %s2190_s0 }
  0x45   :  { %2075 = vmatmul.mubr.msk.f32.gmra.mrb[4].mxu0 %vm189_vm1, %v1067_v62 }
  0x46   :  { %2077 = vmatprep.mubr.msk.f32.mxu0 %vm189_vm1, %v1069_v0 }
  0x47   :  { %1232 = vrot.lane.b32.xlu1 %v1082_v59, %s2190_s0 }
  0x48   :  { %1234 = vrot.lane.b32.xlu0 %v1065_v60, %s2190_s0 }
  0x49   :  { %2078 = vmatmul.mubr.msk.f32.gmra.mrb[6].mxu0 %vm189_vm1, %v1083_v2 }
  0x4a   :  { %2096 = vmatprep.mubr.msk.f32.mxu0 %vm189_vm1, %v1376_v3 }
  0x4b   :  { %1236 = vrot.lane.b32.xlu1 %v1067_v62, %s2190_s0 }
  0x4c   :  { %1238 = vrot.lane.b32.xlu0 %v1069_v0, %s2190_s0 }
  0x4d   :  { %2097 = vmatmul.mubr.msk.f32.vlgmr.msra.gmra.mrb[0].mxu0 %vm189_vm1, %v1378_v5 }
  0x4e   :  { %2099 = vmatprep.mubr.msk.f32.mxu0 %vm189_vm1, %v1380_v7 }
  0x4f   :  { %1240 = vrot.lane.b32.xlu1 %v1083_v2, %s2190_s0 }
  0x50   :  { %1560 = vrot.lane.b32.xlu0 %v2333_v44, %s2189_s21 }
  0x51   :  { %2100 = vmatmul.mubr.msk.f32.gmra.mrb[2].mxu0 %vm189_vm1, %v1400_v9 }
  0x52   :  { %2102 = vmatprep.mubr.msk.f32.mxu0 %vm189_vm1, %v1384_v10 }
  0x53   :  { %1544 = vrot.lane.b32.xlu1 %v1376_v3, %s2190_s0 }
  0x54   :  { %1546 = vrot.lane.b32.xlu0 %v1378_v5, %s2190_s0 }
  0x55   :  { %2103 = vmatmul.mubr.msk.f32.gmra.mrb[4].mxu0 %vm189_vm1, %v1386_v12 }
  0x56   :  { %2105 = vmatprep.mubr.msk.f32.mxu0 %vm189_vm1, %v1388_v14 }
  0x57   :  { %1548 = vrot.lane.b32.xlu1 %v1380_v7, %s2190_s0 }
  0x58   :  { %1550 = vrot.lane.b32.xlu0 %v1400_v9, %s2190_s0 }
  0x59   :  { %2106 = vmatmul.mubr.msk.f32.gmra.mrb[6].mxu0 %vm189_vm1, %v1401_v16 }
  0x5b   :  { %1552 = vrot.lane.b32.xlu1 %v1384_v10, %s2190_s0 }
  0x5c   :  { %1554 = vrot.lane.b32.xlu0 %v1386_v12, %s2190_s0 }
  0x5f   :  { %1556 = vrot.lane.b32.xlu1 %v1388_v14, %s2190_s0  ;;  %v1891_v14 = vld [vmem:[%s2496_s3] ss:$0 sm:$0xff] }
  0x60   :  { %1558 = vrot.lane.b32.xlu0 %v1401_v16, %s2190_s0 }
  0x74   :  { %v472_v17 = vpop.permute.xlu0 %471 }
  0x75   :  { %2010 = vmatprep.subr.msk.mxu1 %vm214_vm0, %v472_v17 }
  0x76   :  { %2011 = vmatpush3.msk.msra.mxu1 %vm214_vm0, %v472_v17 }
  0x7d   :  { %v458_v18 = vpop.permute.xlu1 %457 }
  0x7e   :  { %v456_v19 = vpop.permute.xlu0 %455 }
  0x7f   :  { %2012 = vmatprep.mubr.msk.f32.mxu1 %vm189_vm1, %v456_v19 }
  0x80   :  { %2013 = vmatmul.mubr.msk.f32.vlgmr.msra.gmra.mrb[0].mxu1 %vm189_vm1, %v458_v18 }
  0x81   :  { %v460_v20 = vpop.permute.xlu1 %459 }
  0x82   :  { %v462_v21 = vpop.permute.xlu0 %461  ;;  %2015 = vmatprep.mubr.msk.f32.mxu1 %vm189_vm1, %v460_v20 }
  0x84   :  { %2016 = vmatmul.mubr.msk.f32.gmra.mrb[2].mxu1 %vm189_vm1, %v462_v21 }
  0x85   :  { %v464_v22 = vpop.permute.xlu1 %463 }
  0x86   :  { %v466_v23 = vpop.permute.xlu0 %465  ;;  %2018 = vmatprep.mubr.msk.f32.mxu1 %vm189_vm1, %v464_v22 }
  0x88   :  { %2019 = vmatmul.mubr.msk.f32.gmra.mrb[4].mxu1 %vm189_vm1, %v466_v23 }
  0x89   :  { %v468_v24 = vpop.permute.xlu1 %467 }
  0x8a   :  { %v470_v25 = vpop.permute.xlu0 %469  ;;  %2021 = vmatprep.mubr.msk.f32.mxu1 %vm189_vm1, %v468_v24 }
  0x8c   :  { %2022 = vmatmul.mubr.msk.f32.gmra.mrb[6].mxu1 %vm189_vm1, %v470_v25 }
  0x8d   :  { %v613_v26 = vpop.permute.xlu1 %612 }
  0x8e   :  { %v597_v27 = vpop.permute.xlu0 %596  ;;  %2024 = vmatprep.subr.msk.mxu1 %vm214_vm0, %v613_v26 }
  0x8f   :  { %2026 = vmatprep.mubr.msk.f32.mxu1 %vm189_vm1, %v597_v27  ;;  %2025 = vmatpush3.msk.msra.mxu1 %vm214_vm0, %v613_v26 }
  0x91   :  { %v599_v28 = vpop.permute.xlu1 %598 }
  0x92   :  { %v601_v29 = vpop.permute.xlu0 %600  ;;  %2027 = vmatmul.mubr.msk.f32.vlgmr.msra.gmra.mrb[0].mxu1 %vm189_vm1, %v599_v28 }
  0x93   :  { %2029 = vmatprep.mubr.msk.f32.mxu1 %vm189_vm1, %v601_v29 }
  0x95   :  { %v603_v30 = vpop.permute.xlu1 %602 }
  0x96   :  { %v605_v31 = vpop.permute.xlu0 %604  ;;  %2030 = vmatmul.mubr.msk.f32.gmra.mrb[2].mxu1 %vm189_vm1, %v603_v30 }
  0x97   :  { %2032 = vmatprep.mubr.msk.f32.mxu1 %vm189_vm1, %v605_v31 }
  0x99   :  { %v607_v32 = vpop.permute.xlu1 %606 }
  0x9a   :  { %v609_v33 = vpop.permute.xlu0 %608  ;;  %2033 = vmatmul.mubr.msk.f32.gmra.mrb[4].mxu1 %vm189_vm1, %v607_v32 }
  0x9b   :  { %2035 = vmatprep.mubr.msk.f32.mxu1 %vm189_vm1, %v609_v33 }
  0x9d   :  { %v611_v34 = vpop.permute.xlu1 %610 }
  0x9e   :  { %v924_v35 = vpop.permute.xlu0 %923  ;;  %2036 = vmatmul.mubr.msk.f32.gmra.mrb[6].mxu1 %vm189_vm1, %v611_v34 }
  0x9f   :  { %2052 = vmatprep.subr.msk.mxu1 %vm214_vm0, %v924_v35 }
  0xa0   :  { %2053 = vmatpush3.msk.msra.mxu1 %vm214_vm0, %v924_v35 }
  0xa1   :  { %v908_v36 = vpop.permute.xlu1 %907 }
  0xa2   :  { %v910_v37 = vpop.permute.xlu0 %909  ;;  %2054 = vmatprep.mubr.msk.f32.mxu1 %vm189_vm1, %v908_v36 }
  0xa3   :  { %2055 = vmatmul.mubr.msk.f32.vlgmr.msra.gmra.mrb[0].mxu1 %vm189_vm1, %v910_v37 }
  0xa5   :  { %v912_v38 = vpop.permute.xlu1 %911 }
  0xa6   :  { %v914_v39 = vpop.permute.xlu0 %913  ;;  %2057 = vmatprep.mubr.msk.f32.mxu1 %vm189_vm1, %v912_v38 }
  0xa7   :  { %2058 = vmatmul.mubr.msk.f32.gmra.mrb[2].mxu1 %vm189_vm1, %v914_v39 }
  0xa9   :  { %v916_v40 = vpop.permute.xlu1 %915 }
  0xaa   :  { %v918_v41 = vpop.permute.xlu0 %917  ;;  %2060 = vmatprep.mubr.msk.f32.mxu1 %vm189_vm1, %v916_v40 }
  0xab   :  { %2061 = vmatmul.mubr.msk.f32.gmra.mrb[4].mxu1 %vm189_vm1, %v918_v41 }
  0xad   :  { %v920_v42 = vpop.permute.xlu1 %919 }
  0xae   :  { %v922_v43 = vpop.permute.xlu0 %921  ;;  %2063 = vmatprep.mubr.msk.f32.mxu1 %vm189_vm1, %v920_v42 }
  0xaf   :  { %2064 = vmatmul.mubr.msk.f32.gmra.mrb[6].mxu1 %vm189_vm1, %v922_v43 }
  0xb1   :  { %v1243_v44 = vpop.permute.xlu1 %1242 }
  0xb2   :  { %v1227_v45 = vpop.permute.xlu0 %1226  ;;  %2080 = vmatprep.subr.msk.mxu1 %vm214_vm0, %v1243_v44 }
  0xb3   :  { %2082 = vmatprep.mubr.msk.f32.mxu1 %vm189_vm1, %v1227_v45  ;;  %2081 = vmatpush3.msk.msra.mxu1 %vm214_vm0, %v1243_v44 }
  0xb5   :  { %v1229_v46 = vpop.permute.xlu1 %1228 }
  0xb6   :  { %v1231_v47 = vpop.permute.xlu0 %1230  ;;  %2083 = vmatmul.mubr.msk.f32.vlgmr.msra.gmra.mrb[0].mxu1 %vm189_vm1, %v1229_v46 }
  0xb7   :  { %2085 = vmatprep.mubr.msk.f32.mxu1 %vm189_vm1, %v1231_v47 }
  0xb9   :  { %v1233_v48 = vpop.permute.xlu1 %1232 }
  0xba   :  { %v1235_v49 = vpop.permute.xlu0 %1234  ;;  %2086 = vmatmul.mubr.msk.f32.gmra.mrb[2].mxu1 %vm189_vm1, %v1233_v48 }
  0xbb   :  { %2088 = vmatprep.mubr.msk.f32.mxu1 %vm189_vm1, %v1235_v49 }
  0xbd   :  { %v1237_v50 = vpop.permute.xlu1 %1236 }
  0xbe   :  { %v1239_v51 = vpop.permute.xlu0 %1238  ;;  %2089 = vmatmul.mubr.msk.f32.gmra.mrb[4].mxu1 %vm189_vm1, %v1237_v50 }
  0xbf   :  { %2091 = vmatprep.mubr.msk.f32.mxu1 %vm189_vm1, %v1239_v51 }
  0xc1   :  { %v1241_v52 = vpop.permute.xlu1 %1240 }
  0xc2   :  { %v1561_v53 = vpop.permute.xlu0 %1560  ;;  %2092 = vmatmul.mubr.msk.f32.gmra.mrb[6].mxu1 %vm189_vm1, %v1241_v52 }
  0xc3   :  { %2108 = vmatprep.subr.msk.mxu1 %vm214_vm0, %v1561_v53 }
  0xc4   :  { %2109 = vmatpush3.msk.msra.mxu1 %vm214_vm0, %v1561_v53 }
  0xc5   :  { %v1545_v54 = vpop.permute.xlu1 %1544 }
  0xc6   :  { %2110 = vmatprep.mubr.msk.f32.mxu1 %vm189_vm1, %v1545_v54  ;;  %v1547_v55 = vpop.permute.xlu0 %1546 }
  0xc7   :  { %2111 = vmatmul.mubr.msk.f32.vlgmr.msra.gmra.mrb[0].mxu1 %vm189_vm1, %v1547_v55 }
  0xc9   :  { %v1549_v56 = vpop.permute.xlu1 %1548 }
  0xca   :  { %2113 = vmatprep.mubr.msk.f32.mxu1 %vm189_vm1, %v1549_v56  ;;  %v1551_v57 = vpop.permute.xlu0 %1550 }
  0xcb   :  { %2114 = vmatmul.mubr.msk.f32.gmra.mrb[2].mxu1 %vm189_vm1, %v1551_v57 }
  0xcd   :  { %v1553_v58 = vpop.permute.xlu1 %1552 }
  0xce   :  { %2116 = vmatprep.mubr.msk.f32.mxu1 %vm189_vm1, %v1553_v58  ;;  %v1555_v59 = vpop.permute.xlu0 %1554 }
  0xcf   :  { %2117 = vmatmul.mubr.msk.f32.gmra.mrb[4].mxu1 %vm189_vm1, %v1555_v59 }
  0xd1   :  { %v1557_v60 = vpop.permute.xlu1 %1556 }
  0xd2   :  { %2119 = vmatprep.mubr.msk.f32.mxu1 %vm189_vm1, %v1557_v60  ;;  %v1559_v61 = vpop.permute.xlu0 %1558 }
  0xd3   :  { %2120 = vmatmul.mubr.msk.f32.gmra.mrb[6].mxu1 %vm189_vm1, %v1559_v61 }
 0x120   :  { %v2098_v62 = vpop.f32.mrb[0].mxu0 }
 0x121   :  { %v1497_v63 = vpop.f32.mrb[1].mxu0 }
 0x124   :  { %v2101_v0 = vpop.f32.mrb[2].mxu0 }
 0x125   :  { %v1507_v1 = vpop.f32.mrb[3].mxu0 }
 0x128   :  { %v2104_v2 = vpop.f32.mrb[4].mxu0 }
 0x129   :  { %v1517_v3 = vpop.f32.mrb[5].mxu0 }
 0x12c   :  { %v2107_v4 = vpop.f32.mrb[6].mxu0 }
 0x12d   :  { %v2447_v5 = vpop.f32.mrb[7].mxu0 }
 0x19a   :  { %v2112_v6 = vpop.f32.mrb[0].mxu1 }
 0x19b   :  { %1703 = vrot.lane.b32.xlu0 %v2112_v6, %s2191_s2  ;;  %v1646_v7 = vpop.f32.mrb[1].mxu1 }
 0x19c   :  { %1701 = vrot.lane.b32.xlu1 %v1646_v7, %s2191_s2 }
 0x19e   :  { %v2115_v8 = vpop.f32.mrb[2].mxu1 }
 0x19f   :  { %1707 = vrot.lane.b32.xlu0 %v2115_v8, %s2191_s2  ;;  %v1656_v9 = vpop.f32.mrb[3].mxu1 }
 0x1a0   :  { %1705 = vrot.lane.b32.xlu1 %v1656_v9, %s2191_s2 }
 0x1a2   :  { %v2118_v10 = vpop.f32.mrb[4].mxu1 }
 0x1a3   :  { %1711 = vrot.lane.b32.xlu0 %v2118_v10, %s2191_s2  ;;  %v1666_v11 = vpop.f32.mrb[5].mxu1 }
 0x1a4   :  { %1709 = vrot.lane.b32.xlu1 %v1666_v11, %s2191_s2 }
 0x1a6   :  { %v2121_v12 = vpop.f32.mrb[6].mxu1 }
 0x1a7   :  { %1715 = vrot.lane.b32.xlu0 %v2121_v12, %s2191_s2  ;;  %v1676_v13 = vpop.f32.mrb[7].mxu1 }
 0x1a8   :  { %1713 = vrot.lane.b32.xlu1 %v1676_v13, %s2191_s2 }
 0x20d   :  { %v1704_v15 = vpop.permute.xlu0 %1703 }
 0x20e   :  { %v1727_v16 = vsel %vm1725_vm4, %v2098_v62, %v1704_v15  ;;  %v1702_v17 = vpop.permute.xlu1 %1701 }
 0x20f   :  { %v1742_v18 = vadd.f32 %v1891_v14, %v1727_v16  ;;  %v1726_v19 = vsel %vm1725_vm4, %v1497_v63, %v1702_v17 }
 0x210   :  { %v1741_v20 = vadd.f32 %v1891_v14, %v1726_v19 }
 0x211   :  { %vm1750_vm6 = vcmp.ge.f32.partialorder %v1742_v18, 0.0  ;;  %v1758_v21 = vmul.f32 0.1, %v1742_v18  ;;  %v1708_v22 = vpop.permute.xlu0 %1707 }
 0x212   :  { %vm1749_vm7 = vcmp.ge.f32.partialorder %v1741_v20, 0.0  ;;  %v1757_v23 = vmul.f32 0.1, %v1741_v20  ;;  %v1729_v24 = vsel %vm1725_vm4, %v2101_v0, %v1708_v22  ;;  %v1706_v25 = vpop.permute.xlu1 %1705 }
 0x213   :  { %v1766_v26 = vsel %vm1750_vm6, %v1742_v18, %v1758_v21  ;;  %v1744_v27 = vadd.f32 %v1891_v14, %v1729_v24  ;;  %v1728_v28 = vsel %vm1725_vm4, %v1507_v1, %v1706_v25 }
 0x214   :  { %1775 = vst.msk [vmem:[%s2497_s4 + $0x8] sm:$0xff] %vm1773_vm5, %v1766_v26  ;;  %v1765_v29 = vsel %vm1749_vm7, %v1741_v20, %v1757_v23  ;;  %v1743_v30 = vadd.f32 %v1891_v14, %v1728_v28 }
 0x215   :  { %1774 = vst.msk [vmem:[%s2497_s4] sm:$0xff] %vm1773_vm5, %v1765_v29  ;;  %vm1752_vm8 = vcmp.ge.f32.partialorder %v1744_v27, 0.0  ;;  %v1760_v31 = vmul.f32 0.1, %v1744_v27  ;;  %v1712_v32 = vpop.permute.xlu0 %1711 }
 0x216   :  { %vm1751_vm9 = vcmp.ge.f32.partialorder %v1743_v30, 0.0  ;;  %v1759_v33 = vmul.f32 0.1, %v1743_v30  ;;  %v1731_v34 = vsel %vm1725_vm4, %v2104_v2, %v1712_v32  ;;  %v1710_v35 = vpop.permute.xlu1 %1709 }
 0x217   :  { %v1768_v36 = vsel %vm1752_vm8, %v1744_v27, %v1760_v31  ;;  %v1746_v37 = vadd.f32 %v1891_v14, %v1731_v34  ;;  %v1730_v38 = vsel %vm1725_vm4, %v1517_v3, %v1710_v35 }
 0x218   :  { %1777 = vst.msk [vmem:[%s2497_s4 + $0x18] sm:$0xff] %vm1773_vm5, %v1768_v36  ;;  %v1767_v39 = vsel %vm1751_vm9, %v1743_v30, %v1759_v33  ;;  %v1745_v40 = vadd.f32 %v1891_v14, %v1730_v38 }
 0x219   :  { %1776 = vst.msk [vmem:[%s2497_s4 + $0x10] sm:$0xff] %vm1773_vm5, %v1767_v39  ;;  %vm1754_vm10 = vcmp.ge.f32.partialorder %v1746_v37, 0.0  ;;  %v1762_v41 = vmul.f32 0.1, %v1746_v37  ;;  %v1716_v42 = vpop.permute.xlu0 %1715 }
 0x21a   :  { %vm1753_vm11 = vcmp.ge.f32.partialorder %v1745_v40, 0.0  ;;  %v1761_v43 = vmul.f32 0.1, %v1745_v40  ;;  %v1733_v44 = vsel %vm1725_vm4, %v2107_v4, %v1716_v42  ;;  %v1714_v45 = vpop.permute.xlu1 %1713 }
 0x21b   :  { %v1770_v46 = vsel %vm1754_vm10, %v1746_v37, %v1762_v41  ;;  %v1748_v47 = vadd.f32 %v1891_v14, %v1733_v44  ;;  %v1732_v48 = vsel %vm1725_vm4, %v2447_v5, %v1714_v45 }
 0x21c   :  { %1779 = vst.msk [vmem:[%s2497_s4 + $0x28] sm:$0xff] %vm1773_vm5, %v1770_v46  ;;  %v1769_v49 = vsel %vm1753_vm11, %v1745_v40, %v1761_v43  ;;  %v1747_v50 = vadd.f32 %v1891_v14, %v1732_v48 }
 0x21d   :  { %1778 = vst.msk [vmem:[%s2497_s4 + $0x20] sm:$0xff] %vm1773_vm5, %v1769_v49  ;;  %vm1756_vm12 = vcmp.ge.f32.partialorder %v1748_v47, 0.0  ;;  %v1764_v51 = vmul.f32 0.1, %v1748_v47 }
 0x21e   :  { %vm1755_vm13 = vcmp.ge.f32.partialorder %v1747_v50, 0.0  ;;  %v1763_v52 = vmul.f32 0.1, %v1747_v50 }
 0x21f   :  { %v1772_v53 = vsel %vm1756_vm12, %v1748_v47, %v1764_v51 }
 0x220   :  { %1781 = vst.msk [vmem:[%s2497_s4 + $0x38] sm:$0xff] %vm1773_vm5, %v1772_v53  ;;  %v1771_v54 = vsel %vm1755_vm13, %v1747_v50, %v1763_v52 }
 0x221   :  { %1780 = vst.msk [vmem:[%s2497_s4 + $0x30] sm:$0xff] %vm1773_vm5, %v1771_v54 }

// kernel: _lambda_.6
= control target key start
LH: loop header
LB: loop body
LE: loop exit
PB: predicated region body
PF: predicated region fallthrough
CT: control target
= control target key end

     0   :  { %s2874_s21 = smov 124   ;;  %vm154_vm0 = vcmask 1041408   ;;  %s2875_s14 = smov 126   ;;  %vm141_vm1 = vcmask 15360   ;;  %vm990_vm2 = vcmask 1046528   ;;  %vm1895_vm3 = vcmask 1045504   ;;  %s3280_s0 = inlined_call_operand.vmem [shape: f32[2,40,8], index: 0, kind: input, shape index: {}, may-alias: {0,1}]   ;;  %s3281_s1 = inlined_call_operand.vmem [shape: f32[2,40,8], index: 1, kind: input, shape index: {}, may-alias: {0,1}]   ;;  %s3282_s2 = inlined_call_operand.vmem [shape: f32[5,2,16], index: 2, kind: input, shape index: {}]   ;;  %s3283_s3 = inlined_call_operand.vmem [shape: f32[1,1,16], index: 3, kind: input, shape index: {}]   ;;  %s3284_s4 = inlined_call_operand.vmem [shape: f32[2,16,16], index: 4, kind: output, shape index: {}]  }
   0x1   :  { %v2437_v0 = vld [vmem:[%s3282_s2 + $0x2] sm:$0x3]  ;;  %v2913_v1 = vld [vmem:[%s3282_s2] sm:$0x3]  ;;  %v56_v2 = vld [vmem:[%s3280_s0 + $0x10] sm:$0xff]  ;;  %s2878_s15 = smov 122  }
   0x2   :  { %351 = vrot.lane.b32.xlu0 %v2437_v0, %s2874_s21  ;;  %456 = vrot.lane.b32.xlu1 %v2913_v1, %s2874_s21  ;;  %57 = vst [vmem:[#allocation2 + $0x10] sm:$0xff] %v56_v2  ;;  %v58_v3 = vld [vmem:[%s3280_s0 + $0x18] sm:$0xff]  ;;  %v52_v4 = vld [vmem:[%s3280_s0] sm:$0xff]  ;;  %s2881_s23 = smov 12   ;;  %vm2379_vm4 = vcmask 31744   ;;  %vm2384_vm5 = vcmask 64512  }
   0x3   :  { %59 = vst [vmem:[#allocation2 + $0x18] sm:$0xff] %v58_v3  ;;  %53 = vst [vmem:[#allocation2] sm:$0xff] %v52_v4  ;;  %v54_v5 = vld [vmem:[%s3280_s0 + $0x8] sm:$0xff]  ;;  %v62_v7 = vld [vmem:[%s3280_s0 + $0x30] sm:$0xff]  ;;  %2642 = vmatprep.subr.msk.mxu0 %vm154_vm0, %v2437_v0  ;;  %vm2389_vm6 = vcmask 97280   ;;  %vm2417_vm7 = vcmask 130048  }
   0x4   :  { %v60_v6 = vld [vmem:[%s3280_s0 + $0x28] sm:$0xff]  ;;  %55 = vst [vmem:[#allocation2 + $0x8] sm:$0xff] %v54_v5  ;;  %63 = vst [vmem:[#allocation2 + $0x28] sm:$0xff] %v62_v7  ;;  %v64_v8 = vld [vmem:[%s3280_s0 + $0x38] sm:$0xff]  ;;  %2643 = vmatpush3.msk.msra.mxu0 %vm154_vm0, %v2437_v0 }
   0x5   :  { %61 = vst [vmem:[#allocation2 + $0x20] sm:$0xff] %v60_v6  ;;  %v66_v9 = vld [vmem:[%s3280_s0 + $0x40] sm:$0xff]  ;;  %65 = vst [vmem:[#allocation2 + $0x30] sm:$0xff] %v64_v8  ;;  %v2436_v11 = vld [vmem:[%s3281_s1 + $0x48] sm:$0xff]  ;;  %2650 = vmatprep.subr.msk.mxu0 %vm154_vm0, %v2913_v1  ;;  %s2876_s0 = smov 120  }
   0x6   :  { %67 = vst [vmem:[#allocation2 + $0x38] sm:$0xff] %v66_v9  ;;  %v2435_v10 = vld [vmem:[%s3281_s1 + $0x20] sm:$0xff]  ;;  %109 = vst [vmem:[#allocation3 + $0x8] sm:$0xff] %v2436_v11  ;;  %s2877_s1 = smov 116   ;;  %v3090_v47 = vld [vmem:[%s3282_s2 + $0x8] sm:$0x3] }
   0x7   :  { %107 = vst [vmem:[#allocation3] sm:$0xff] %v2435_v10  ;;  %v2997_v22 = vld [vmem:[%s3282_s2 + $0x4] sm:$0x3]  ;;  %v3038_v32 = vld [vmem:[%s3282_s2 + $0x6] sm:$0x3]  ;;  %s2879_s2 = smov 8  }
   0xa   :  { %v134_v12 = vld [vmem:[#allocation2 + $0x11] ss:$2 sm:$0xff]  ;;  %v125_v16 = vld [vmem:[#allocation2 + $0x10] ss:$2 sm:$0xff] }
   0xb   :  { %345 = vrot.lane.b32.xlu1 %v134_v12, %s2875_s14  ;;  %v132_v13 = vld [vmem:[#allocation2 + $0x1] ss:$2 sm:$0xff]  ;;  %v123_v17 = vld [vmem:[#allocation2] ss:$2 sm:$0xff] }
   0xc   :  { %343 = vrot.lane.b32.xlu0 %v132_v13, %s2875_s14  ;;  %v136_v14 = vld [vmem:[#allocation2 + $0x21] ss:$2 sm:$0xff]  ;;  %2644 = vmatprep.mubr.msk.f32.mxu0 %vm141_vm1, %v132_v13  ;;  %v127_v19 = vld [vmem:[#allocation2 + $0x20] ss:$2 sm:$0xff] }
   0xd   :  { %v138_v15 = vld [vmem:[#allocation2 + $0x31] ss:$2 sm:$0xff]  ;;  %2645 = vmatmul.mubr.msk.f32.vlgmr.msra.gmra.mrb[0].mxu0 %vm141_vm1, %v134_v12  ;;  %v129_v18 = vld [vmem:[#allocation2 + $0x30] ss:$2 sm:$0xff] }
   0xe   :  { %2647 = vmatprep.mubr.msk.f32.mxu0 %vm141_vm1, %v136_v14  ;;  %2651 = vmatpush3.msk.msra.mxu0 %vm154_vm0, %v2913_v1  ;;  %v981_v20 = vld [vmem:[#allocation3] ss:$2 sm:$0x1]  ;;  %v2992_v21 = vld [vmem:[#allocation2 + $0x2] ss:$2 sm:$0xff] }
   0xf   :  { %347 = vrot.lane.b32.xlu1 %v136_v14, %s2875_s14  ;;  %v986_v23 = vrot.slane %v981_v20, 1  ;;  %v976_v24 = vld [vmem:[#allocation2 + $0x12] ss:$2 sm:$0x7f]  ;;  %v3003_v26 = vld [vmem:[#allocation2 + $0x22] ss:$2 sm:$0xff] }
  0x10   :  { %349 = vrot.lane.b32.xlu0 %v138_v15, %s2875_s14  ;;  %v983_v25 = vld [vmem:[#allocation3 + $0x8] ss:$2 sm:$0x1]  ;;  %v980_v29 = vld [vmem:[#allocation2 + $0x32] ss:$2 sm:$0x7f] }
  0x11   :  { %2648 = vmatmul.mubr.msk.f32.gmra.mrb[2].mxu0 %vm141_vm1, %v138_v15  ;;  %v3006_v27 = vsel %vm990_vm2, %v976_v24, %v986_v23  ;;  %v987_v28 = vrot.slane %v983_v25, 1  ;;  %v1435_v31 = vld [vmem:[#allocation3 + $0x1] ss:$2 sm:$0x1]  ;;  %v3047_v38 = vld [vmem:[#allocation2 + $0x3] ss:$2 sm:$0xff] }
  0x12   :  { %2652 = vmatprep.mubr.msk.f32.mxu0 %vm141_vm1, %v123_v17  ;;  %v1440_v33 = vrot.slane %v1435_v31, 1  ;;  %v1429_v34 = vld [vmem:[#allocation2 + $0x13] ss:$2 sm:$0x7f]  ;;  %v3056_v41 = vld [vmem:[#allocation2 + $0x23] ss:$2 sm:$0xff] }
  0x13   :  { %450 = vrot.lane.b32.xlu1 %v125_v16, %s2875_s14  ;;  %v3013_v30 = vsel %vm990_vm2, %v980_v29, %v987_v28  ;;  %v1437_v35 = vld [vmem:[#allocation3 + $0x9] ss:$2 sm:$0x1]  ;;  %v1433_v39 = vld [vmem:[#allocation2 + $0x33] ss:$2 sm:$0x7f] }
  0x14   :  { %448 = vrot.lane.b32.xlu0 %v123_v17, %s2875_s14  ;;  %v3045_v36 = vsel %vm990_vm2, %v1429_v34, %v1440_v33  ;;  %v1441_v37 = vrot.slane %v1437_v35, 1  ;;  %v1887_v44 = vld [vmem:[#allocation3] ss:$2 sm:$0x3]  ;;  %v3085_v45 = vld [vmem:[#allocation2 + $0x4] ss:$2 sm:$0xff] }
  0x15   :  { %2653 = vmatmul.mubr.msk.f32.vlgmr.msra.gmra.mrb[0].mxu0 %vm141_vm1, %v125_v16  ;;  %v1891_v48 = vrot.slane %v1887_v44, 2  ;;  %v1882_v50 = vld [vmem:[#allocation2 + $0x14] ss:$2 sm:$0x3f]  ;;  %v3098_v52 = vld [vmem:[#allocation2 + $0x24] ss:$2 sm:$0xff] }
  0x16   :  { %2655 = vmatprep.mubr.msk.f32.mxu0 %vm141_vm1, %v127_v19  ;;  %v3054_v40 = vsel %vm990_vm2, %v1433_v39, %v1441_v37  ;;  %v1888_v51 = vld [vmem:[#allocation3 + $0x8] ss:$2 sm:$0x3]  ;;  %v1886_v57 = vld [vmem:[#allocation2 + $0x34] ss:$2 sm:$0x3f] }
  0x17   :  { %454 = vrot.lane.b32.xlu1 %v129_v18, %s2875_s14  ;;  %v3102_v54 = vsel %vm1895_vm3, %v1882_v50, %v1891_v48  ;;  %v1892_v55 = vrot.slane %v1888_v51, 2 }
  0x18   :  { %452 = vrot.lane.b32.xlu0 %v127_v19, %s2875_s14 }
  0x19   :  { %2656 = vmatmul.mubr.msk.f32.gmra.mrb[2].mxu0 %vm141_vm1, %v129_v18  ;;  %v3111_v59 = vsel %vm1895_vm3, %v1886_v57, %v1892_v55 }
  0x1b   :  { %553 = vrot.lane.b32.xlu1 %v132_v13, %s2874_s21 }
  0x1c   :  { %561 = vrot.lane.b32.xlu0 %v2437_v0, %s2876_s0 }
  0x1f   :  { %555 = vrot.lane.b32.xlu1 %v134_v12, %s2874_s21 }
  0x20   :  { %771 = vrot.lane.b32.xlu0 %v2437_v0, %s2877_s1 }
  0x23   :  { %765 = vrot.lane.b32.xlu1 %v134_v12, %s2878_s15 }
  0x24   :  { %763 = vrot.lane.b32.xlu0 %v132_v13, %s2878_s15 }
  0x27   :  { %559 = vrot.lane.b32.xlu1 %v138_v15, %s2874_s21 }
  0x28   :  { %557 = vrot.lane.b32.xlu0 %v136_v14, %s2874_s21 }
  0x2b   :  { %769 = vrot.lane.b32.xlu1 %v138_v15, %s2878_s15 }
  0x2c   :  { %767 = vrot.lane.b32.xlu0 %v136_v14, %s2878_s15 }
  0x2f   :  { %658 = vrot.lane.b32.xlu1 %v123_v17, %s2874_s21 }
  0x30   :  { %666 = vrot.lane.b32.xlu0 %v2913_v1, %s2876_s0 }
  0x33   :  { %660 = vrot.lane.b32.xlu1 %v125_v16, %s2874_s21 }
  0x34   :  { %876 = vrot.lane.b32.xlu0 %v2913_v1, %s2877_s1 }
  0x37   :  { %870 = vrot.lane.b32.xlu1 %v125_v16, %s2878_s15 }
  0x38   :  { %868 = vrot.lane.b32.xlu0 %v123_v17, %s2878_s15 }
  0x3b   :  { %664 = vrot.lane.b32.xlu1 %v129_v18, %s2874_s21 }
  0x3c   :  { %662 = vrot.lane.b32.xlu0 %v127_v19, %s2874_s21 }
  0x3f   :  { %874 = vrot.lane.b32.xlu1 %v129_v18, %s2878_s15 }
  0x40   :  { %872 = vrot.lane.b32.xlu0 %v127_v19, %s2878_s15 }
  0x43   :  { %1099 = vrot.lane.b32.xlu1 %v2992_v21, %s2875_s14 }
  0x44   :  { %1107 = vrot.lane.b32.xlu0 %v2997_v22, %s2874_s21 }
  0x47   :  { %1103 = vrot.lane.b32.xlu1 %v3003_v26, %s2875_s14 }
  0x48   :  { %1101 = vrot.lane.b32.xlu0 %v3006_v27, %s2875_s14 }
  0x4b   :  { %1216 = vrot.lane.b32.xlu1 %v2997_v22, %s2876_s0 }
  0x4c   :  { %1105 = vrot.lane.b32.xlu0 %v3013_v30, %s2875_s14 }
  0x4f   :  { %1325 = vrot.lane.b32.xlu1 %v2997_v22, %s2877_s1 }
  0x50   :  { %1208 = vrot.lane.b32.xlu0 %v2992_v21, %s2874_s21 }
  0x53   :  { %1317 = vrot.lane.b32.xlu1 %v2992_v21, %s2878_s15 }
  0x54   :  { %1210 = vrot.lane.b32.xlu0 %v3006_v27, %s2874_s21 }
  0x57   :  { %1212 = vrot.lane.b32.xlu1 %v3003_v26, %s2874_s21 }
  0x58   :  { %1319 = vrot.lane.b32.xlu0 %v3006_v27, %s2878_s15 }
  0x5b   :  { %1321 = vrot.lane.b32.xlu1 %v3003_v26, %s2878_s15 }
  0x5c   :  { %1214 = vrot.lane.b32.xlu0 %v3013_v30, %s2874_s21 }
  0x5f   :  { %1560 = vrot.lane.b32.xlu1 %v3038_v32, %s2874_s21 }
  0x60   :  { %1323 = vrot.lane.b32.xlu0 %v3013_v30, %s2878_s15 }
  0x63   :  { %1554 = vrot.lane.b32.xlu1 %v3045_v36, %s2875_s14 }
  0x64   :  { %1552 = vrot.lane.b32.xlu0 %v3047_v38, %s2875_s14 }
  0x67   :  { %1558 = vrot.lane.b32.xlu1 %v3054_v40, %s2875_s14 }
  0x68   :  { %1556 = vrot.lane.b32.xlu0 %v3056_v41, %s2875_s14 }
  0x6b   :  { %1661 = vrot.lane.b32.xlu1 %v3047_v38, %s2874_s21 }
  0x6c   :  { %1669 = vrot.lane.b32.xlu0 %v3038_v32, %s2876_s0 }
  0x6f   :  { %1663 = vrot.lane.b32.xlu1 %v3045_v36, %s2874_s21 }
  0x70   :  { %1778 = vrot.lane.b32.xlu0 %v3038_v32, %s2877_s1 }
  0x73   :  { %1772 = vrot.lane.b32.xlu1 %v3045_v36, %s2878_s15 }
  0x74   :  { %1770 = vrot.lane.b32.xlu0 %v3047_v38, %s2878_s15  ;;  %v352_v42 = vpop.permute.xlu0 %351  ;;  %v457_v43 = vpop.permute.xlu1 %456 }
  0x75   :  { %2658 = vmatprep.subr.msk.mxu1 %vm154_vm0, %v352_v42 }
  0x76   :  { %2659 = vmatpush3.msk.msra.mxu1 %vm154_vm0, %v352_v42 }
  0x77   :  { %1667 = vrot.lane.b32.xlu1 %v3054_v40, %s2874_s21  ;;  %2666 = vmatprep.subr.msk.mxu1 %vm154_vm0, %v457_v43 }
  0x78   :  { %1665 = vrot.lane.b32.xlu0 %v3056_v41, %s2874_s21 }
  0x7b   :  { %1776 = vrot.lane.b32.xlu1 %v3054_v40, %s2878_s15 }
  0x7c   :  { %1774 = vrot.lane.b32.xlu0 %v3056_v41, %s2878_s15 }
  0x7d   :  { %v346_v46 = vpop.permute.xlu1 %345 }
  0x7e   :  { %v344_v49 = vpop.permute.xlu0 %343 }
  0x7f   :  { %2660 = vmatprep.mubr.msk.f32.mxu1 %vm141_vm1, %v344_v49  ;;  %2004 = vrot.lane.b32.xlu1 %v3085_v45, %s2875_s14 }
  0x80   :  { %2661 = vmatmul.mubr.msk.f32.vlgmr.msra.gmra.mrb[0].mxu1 %vm141_vm1, %v346_v46  ;;  %2012 = vrot.lane.b32.xlu0 %v3090_v47, %s2874_s21 }
  0x81   :  { %2667 = vmatpush3.msk.msra.mxu1 %vm154_vm0, %v457_v43  ;;  %v348_v53 = vpop.permute.xlu1 %347 }
  0x82   :  { %v350_v56 = vpop.permute.xlu0 %349  ;;  %2663 = vmatprep.mubr.msk.f32.mxu1 %vm141_vm1, %v348_v53 }
  0x83   :  { %2008 = vrot.lane.b32.xlu1 %v3098_v52, %s2875_s14 }
  0x84   :  { %2664 = vmatmul.mubr.msk.f32.gmra.mrb[2].mxu1 %vm141_vm1, %v350_v56  ;;  %2006 = vrot.lane.b32.xlu0 %v3102_v54, %s2875_s14 }
  0x85   :  { %v451_v58 = vpop.permute.xlu1 %450 }
  0x86   :  { %v449_v60 = vpop.permute.xlu0 %448 }
  0x87   :  { %2668 = vmatprep.mubr.msk.f32.mxu1 %vm141_vm1, %v449_v60  ;;  %2121 = vrot.lane.b32.xlu1 %v3090_v47, %s2876_s0 }
  0x88   :  { %2010 = vrot.lane.b32.xlu0 %v3111_v59, %s2875_s14  ;;  %2669 = vmatmul.mubr.msk.f32.vlgmr.msra.gmra.mrb[0].mxu1 %vm141_vm1, %v451_v58 }
  0x89   :  { %v455_v61 = vpop.permute.xlu1 %454 }
  0x8a   :  { %v453_v62 = vpop.permute.xlu0 %452 }
  0x8b   :  { %2671 = vmatprep.mubr.msk.f32.mxu1 %vm141_vm1, %v453_v62  ;;  %2230 = vrot.lane.b32.xlu1 %v3090_v47, %s2877_s1 }
  0x8c   :  { %2113 = vrot.lane.b32.xlu0 %v3085_v45, %s2874_s21  ;;  %2672 = vmatmul.mubr.msk.f32.gmra.mrb[2].mxu1 %vm141_vm1, %v455_v61 }
  0x8d   :  { %v554_v63 = vpop.permute.xlu1 %553 }
  0x8e   :  { %v562_v0 = vpop.permute.xlu0 %561  ;;  %2676 = vmatprep.mubr.msk.f32.mxu0 %vm141_vm1, %v554_v63 }
  0x8f   :  { %2674 = vmatprep.subr.msk.mxu0 %vm154_vm0, %v562_v0  ;;  %2222 = vrot.lane.b32.xlu1 %v3085_v45, %s2878_s15 }
  0x90   :  { %2115 = vrot.lane.b32.xlu0 %v3102_v54, %s2874_s21  ;;  %2675 = vmatpush3.msk.msra.mxu0 %vm154_vm0, %v562_v0 }
  0x91   :  { %v556_v1 = vpop.permute.xlu1 %555 }
  0x92   :  { %v772_v2 = vpop.permute.xlu0 %771  ;;  %2677 = vmatmul.mubr.msk.f32.vlgmr.msra.gmra.mrb[4].mxu0 %vm141_vm1, %v556_v1 }
  0x93   :  { %2690 = vmatprep.subr.msk.mxu1 %vm154_vm0, %v772_v2  ;;  %2117 = vrot.lane.b32.xlu1 %v3098_v52, %s2874_s21 }
  0x94   :  { %2224 = vrot.lane.b32.xlu0 %v3102_v54, %s2878_s15  ;;  %2691 = vmatpush3.msk.msra.mxu1 %vm154_vm0, %v772_v2 }
  0x95   :  { %v766_v3 = vpop.permute.xlu1 %765 }
  0x96   :  { %v764_v4 = vpop.permute.xlu0 %763 }
  0x97   :  { %2692 = vmatprep.mubr.msk.f32.mxu1 %vm141_vm1, %v764_v4  ;;  %2226 = vrot.lane.b32.xlu1 %v3098_v52, %s2878_s15 }
  0x98   :  { %2119 = vrot.lane.b32.xlu0 %v3111_v59, %s2874_s21  ;;  %2693 = vmatmul.mubr.msk.f32.vlgmr.msra.gmra.mrb[4].mxu1 %vm141_vm1, %v766_v3  ;;  %s2880_s21 = smov 4  }
  0x99   :  { %v560_v5 = vpop.permute.xlu1 %559 }
  0x9a   :  { %v558_v6 = vpop.permute.xlu0 %557 }
  0x9b   :  { %2679 = vmatprep.mubr.msk.f32.mxu0 %vm141_vm1, %v558_v6 }
  0x9c   :  { %2228 = vrot.lane.b32.xlu0 %v3111_v59, %s2878_s15  ;;  %2680 = vmatmul.mubr.msk.f32.gmra.mrb[6].mxu0 %vm141_vm1, %v560_v5 }
  0x9d   :  { %v770_v7 = vpop.permute.xlu1 %769 }
  0x9e   :  { %v768_v8 = vpop.permute.xlu0 %767 }
  0x9f   :  { %2695 = vmatprep.mubr.msk.f32.mxu1 %vm141_vm1, %v768_v8 }
  0xa0   :  { %2696 = vmatmul.mubr.msk.f32.gmra.mrb[6].mxu1 %vm141_vm1, %v770_v7 }
  0xa1   :  { %v659_v9 = vpop.permute.xlu1 %658 }
  0xa2   :  { %v667_v10 = vpop.permute.xlu0 %666  ;;  %2684 = vmatprep.mubr.msk.f32.mxu0 %vm141_vm1, %v659_v9 }
  0xa3   :  { %2682 = vmatprep.subr.msk.mxu0 %vm154_vm0, %v667_v10 }
  0xa4   :  { %2683 = vmatpush3.msk.msra.mxu0 %vm154_vm0, %v667_v10 }
  0xa5   :  { %v661_v11 = vpop.permute.xlu1 %660  ;;  %2706 = vmatprep.subr.msk.mxu0 %vm154_vm0, %v2997_v22 }
  0xa6   :  { %v877_v12 = vpop.permute.xlu0 %876  ;;  %2685 = vmatmul.mubr.msk.f32.vlgmr.msra.gmra.mrb[4].mxu0 %vm141_vm1, %v661_v11 }
  0xa7   :  { %2698 = vmatprep.subr.msk.mxu1 %vm154_vm0, %v877_v12  ;;  %2707 = vmatpush3.msk.msra.mxu0 %vm154_vm0, %v2997_v22 }
  0xa8   :  { %2699 = vmatpush3.msk.msra.mxu1 %vm154_vm0, %v877_v12 }
  0xa9   :  { %v871_v13 = vpop.permute.xlu1 %870 }
  0xaa   :  { %v869_v14 = vpop.permute.xlu0 %868 }
  0xab   :  { %2700 = vmatprep.mubr.msk.f32.mxu1 %vm141_vm1, %v869_v14 }
  0xac   :  { %2701 = vmatmul.mubr.msk.f32.vlgmr.msra.gmra.mrb[4].mxu1 %vm141_vm1, %v871_v13 }
  0xad   :  { %v665_v15 = vpop.permute.xlu1 %664 }
  0xae   :  { %v663_v16 = vpop.permute.xlu0 %662 }
  0xaf   :  { %2687 = vmatprep.mubr.msk.f32.mxu0 %vm141_vm1, %v663_v16 }
  0xb0   :  { %2688 = vmatmul.mubr.msk.f32.gmra.mrb[6].mxu0 %vm141_vm1, %v665_v15 }
  0xb1   :  { %v875_v17 = vpop.permute.xlu1 %874  ;;  %2708 = vmatprep.mubr.msk.f32.mxu0 %vm141_vm1, %v2992_v21 }
  0xb2   :  { %v873_v18 = vpop.permute.xlu0 %872 }
  0xb3   :  { %2703 = vmatprep.mubr.msk.f32.mxu1 %vm141_vm1, %v873_v18 }
  0xb4   :  { %2704 = vmatmul.mubr.msk.f32.gmra.mrb[6].mxu1 %vm141_vm1, %v875_v17  ;;  %2709 = vmatmul.mubr.msk.f32.vlgmr.msra.gmra.mrb[0].mxu0 %vm141_vm1, %v3006_v27 }
  0xb5   :  { %v1100_v19 = vpop.permute.xlu1 %1099  ;;  %2711 = vmatprep.mubr.msk.f32.mxu0 %vm141_vm1, %v3003_v26 }
  0xb6   :  { %v1108_v20 = vpop.permute.xlu0 %1107  ;;  %2716 = vmatprep.mubr.msk.f32.mxu1 %vm141_vm1, %v1100_v19 }
  0xb7   :  { %2714 = vmatprep.subr.msk.mxu1 %vm154_vm0, %v1108_v20 }
  0xb8   :  { %2715 = vmatpush3.msk.msra.mxu1 %vm154_vm0, %v1108_v20  ;;  %2712 = vmatmul.mubr.msk.f32.gmra.mrb[2].mxu0 %vm141_vm1, %v3013_v30 }
  0xb9   :  { %v1104_v21 = vpop.permute.xlu1 %1103 }
  0xba   :  { %v1102_v22 = vpop.permute.xlu0 %1101 }
  0xbb   :  { %2717 = vmatmul.mubr.msk.f32.vlgmr.msra.gmra.mrb[0].mxu1 %vm141_vm1, %v1102_v22 }
  0xbc   :  { %2719 = vmatprep.mubr.msk.f32.mxu1 %vm141_vm1, %v1104_v21 }
  0xbd   :  { %v1217_v23 = vpop.permute.xlu1 %1216 }
  0xbe   :  { %v1106_v24 = vpop.permute.xlu0 %1105  ;;  %2722 = vmatprep.subr.msk.mxu0 %vm154_vm0, %v1217_v23 }
  0xbf   :  { %2720 = vmatmul.mubr.msk.f32.gmra.mrb[2].mxu1 %vm141_vm1, %v1106_v24  ;;  %2723 = vmatpush3.msk.msra.mxu0 %vm154_vm0, %v1217_v23 }
  0xc0   :  { %2738 = vmatprep.subr.msk.mxu0 %vm154_vm0, %v3038_v32 }
  0xc1   :  { %v1326_v25 = vpop.permute.xlu1 %1325 }
  0xc2   :  { %v1209_v26 = vpop.permute.xlu0 %1208  ;;  %2730 = vmatprep.subr.msk.mxu1 %vm154_vm0, %v1326_v25 }
  0xc3   :  { %2724 = vmatprep.mubr.msk.f32.mxu0 %vm141_vm1, %v1209_v26  ;;  %2731 = vmatpush3.msk.msra.mxu1 %vm154_vm0, %v1326_v25  ;;  %v2541_v26 = vld [vmem:[%s3283_s3] ss:$0 sm:$0xff] }
  0xc5   :  { %v1318_v27 = vpop.permute.xlu1 %1317 }
  0xc6   :  { %v1211_v28 = vpop.permute.xlu0 %1210  ;;  %2732 = vmatprep.mubr.msk.f32.mxu1 %vm141_vm1, %v1318_v27 }
  0xc7   :  { %2725 = vmatmul.mubr.msk.f32.vlgmr.msra.gmra.mrb[4].mxu0 %vm141_vm1, %v1211_v28 }
  0xc8   :  { %2739 = vmatpush3.msk.msra.mxu0 %vm154_vm0, %v3038_v32 }
  0xc9   :  { %v1213_v29 = vpop.permute.xlu1 %1212 }
  0xca   :  { %v1320_v30 = vpop.permute.xlu0 %1319  ;;  %2727 = vmatprep.mubr.msk.f32.mxu0 %vm141_vm1, %v1213_v29 }
  0xcb   :  { %2733 = vmatmul.mubr.msk.f32.vlgmr.msra.gmra.mrb[4].mxu1 %vm141_vm1, %v1320_v30 }
  0xcd   :  { %v1322_v31 = vpop.permute.xlu1 %1321 }
  0xce   :  { %v1215_v33 = vpop.permute.xlu0 %1214  ;;  %2735 = vmatprep.mubr.msk.f32.mxu1 %vm141_vm1, %v1322_v31 }
  0xcf   :  { %2728 = vmatmul.mubr.msk.f32.gmra.mrb[6].mxu0 %vm141_vm1, %v1215_v33 }
  0xd0   :  { %2740 = vmatprep.mubr.msk.f32.mxu0 %vm141_vm1, %v3047_v38 }
  0xd1   :  { %v1561_v34 = vpop.permute.xlu1 %1560 }
  0xd2   :  { %v1324_v35 = vpop.permute.xlu0 %1323  ;;  %2746 = vmatprep.subr.msk.mxu1 %vm154_vm0, %v1561_v34 }
  0xd3   :  { %2736 = vmatmul.mubr.msk.f32.gmra.mrb[6].mxu1 %vm141_vm1, %v1324_v35  ;;  %2741 = vmatmul.mubr.msk.f32.vlgmr.msra.gmra.mrb[0].mxu0 %vm141_vm1, %v3045_v36 }
  0xd4   :  { %2747 = vmatpush3.msk.msra.mxu1 %vm154_vm0, %v1561_v34  ;;  %2743 = vmatprep.mubr.msk.f32.mxu0 %vm141_vm1, %v3056_v41 }
  0xd5   :  { %v1555_v32 = vpop.permute.xlu1 %1554 }
  0xd6   :  { %v1553_v37 = vpop.permute.xlu0 %1552 }
  0xd7   :  { %2748 = vmatprep.mubr.msk.f32.mxu1 %vm141_vm1, %v1553_v37  ;;  %2744 = vmatmul.mubr.msk.f32.gmra.mrb[2].mxu0 %vm141_vm1, %v3054_v40 }
  0xd8   :  { %2749 = vmatmul.mubr.msk.f32.vlgmr.msra.gmra.mrb[0].mxu1 %vm141_vm1, %v1555_v32 }
  0xd9   :  { %v1559_v38 = vpop.permute.xlu1 %1558 }
  0xda   :  { %v1557_v39 = vpop.permute.xlu0 %1556 }
  0xdb   :  { %2751 = vmatprep.mubr.msk.f32.mxu1 %vm141_vm1, %v1557_v39 }
  0xdc   :  { %2752 = vmatmul.mubr.msk.f32.gmra.mrb[2].mxu1 %vm141_vm1, %v1559_v38 }
  0xdd   :  { %v1662_v36 = vpop.permute.xlu1 %1661 }
  0xde   :  { %v1670_v42 = vpop.permute.xlu0 %1669  ;;  %2756 = vmatprep.mubr.msk.f32.mxu0 %vm141_vm1, %v1662_v36 }
  0xdf   :  { %2754 = vmatprep.subr.msk.mxu0 %vm154_vm0, %v1670_v42 }
  0xe0   :  { %2755 = vmatpush3.msk.msra.mxu0 %vm154_vm0, %v1670_v42 }
  0xe1   :  { %v1664_v41 = vpop.permute.xlu1 %1663  ;;  %2770 = vmatprep.subr.msk.mxu0 %vm154_vm0, %v3090_v47 }
  0xe2   :  { %v1779_v40 = vpop.permute.xlu0 %1778  ;;  %2757 = vmatmul.mubr.msk.f32.vlgmr.msra.gmra.mrb[4].mxu0 %vm141_vm1, %v1664_v41 }
  0xe3   :  { %2762 = vmatprep.subr.msk.mxu1 %vm154_vm0, %v1779_v40  ;;  %2771 = vmatpush3.msk.msra.mxu0 %vm154_vm0, %v3090_v47 }
  0xe4   :  { %2763 = vmatpush3.msk.msra.mxu1 %vm154_vm0, %v1779_v40 }
  0xe5   :  { %v1773_v43 = vpop.permute.xlu1 %1772 }
  0xe6   :  { %v1771_v44 = vpop.permute.xlu0 %1770 }
  0xe7   :  { %2764 = vmatprep.mubr.msk.f32.mxu1 %vm141_vm1, %v1771_v44 }
  0xe8   :  { %2765 = vmatmul.mubr.msk.f32.vlgmr.msra.gmra.mrb[4].mxu1 %vm141_vm1, %v1773_v43 }
  0xe9   :  { %v1668_v46 = vpop.permute.xlu1 %1667 }
  0xea   :  { %v1666_v48 = vpop.permute.xlu0 %1665 }
  0xeb   :  { %2759 = vmatprep.mubr.msk.f32.mxu0 %vm141_vm1, %v1666_v48 }
  0xec   :  { %2760 = vmatmul.mubr.msk.f32.gmra.mrb[6].mxu0 %vm141_vm1, %v1668_v46 }
  0xed   :  { %2772 = vmatprep.mubr.msk.f32.mxu0 %vm141_vm1, %v3085_v45  ;;  %v1777_v49 = vpop.permute.xlu1 %1776 }
  0xee   :  { %v1775_v50 = vpop.permute.xlu0 %1774 }
  0xef   :  { %2767 = vmatprep.mubr.msk.f32.mxu1 %vm141_vm1, %v1775_v50 }
  0xf0   :  { %2773 = vmatmul.mubr.msk.f32.vlgmr.msra.gmra.mrb[0].mxu0 %vm141_vm1, %v3102_v54  ;;  %2768 = vmatmul.mubr.msk.f32.gmra.mrb[6].mxu1 %vm141_vm1, %v1777_v49 }
  0xf1   :  { %2775 = vmatprep.mubr.msk.f32.mxu0 %vm141_vm1, %v3098_v52  ;;  %v2005_v47 = vpop.permute.xlu1 %2004 }
  0xf2   :  { %v2013_v51 = vpop.permute.xlu0 %2012  ;;  %2780 = vmatprep.mubr.msk.f32.mxu1 %vm141_vm1, %v2005_v47 }
  0xf3   :  { %2778 = vmatprep.subr.msk.mxu1 %vm154_vm0, %v2013_v51 }
  0xf4   :  { %2776 = vmatmul.mubr.msk.f32.gmra.mrb[2].mxu0 %vm141_vm1, %v3111_v59  ;;  %2779 = vmatpush3.msk.msra.mxu1 %vm154_vm0, %v2013_v51 }
  0xf5   :  { %v2009_v45 = vpop.permute.xlu1 %2008 }
  0xf6   :  { %v2007_v53 = vpop.permute.xlu0 %2006 }
  0xf7   :  { %2781 = vmatmul.mubr.msk.f32.vlgmr.msra.gmra.mrb[0].mxu1 %vm141_vm1, %v2007_v53 }
  0xf8   :  { %2783 = vmatprep.mubr.msk.f32.mxu1 %vm141_vm1, %v2009_v45 }
  0xf9   :  { %v2122_v54 = vpop.permute.xlu1 %2121 }
  0xfa   :  { %v2011_v55 = vpop.permute.xlu0 %2010  ;;  %2786 = vmatprep.subr.msk.mxu0 %vm154_vm0, %v2122_v54 }
  0xfb   :  { %2784 = vmatmul.mubr.msk.f32.gmra.mrb[2].mxu1 %vm141_vm1, %v2011_v55  ;;  %2787 = vmatpush3.msk.msra.mxu0 %vm154_vm0, %v2122_v54 }
  0xfd   :  { %v2231_v52 = vpop.permute.xlu1 %2230 }
  0xfe   :  { %v2114_v56 = vpop.permute.xlu0 %2113  ;;  %2794 = vmatprep.subr.msk.mxu1 %vm154_vm0, %v2231_v52 }
  0xff   :  { %2788 = vmatprep.mubr.msk.f32.mxu0 %vm141_vm1, %v2114_v56  ;;  %2795 = vmatpush3.msk.msra.mxu1 %vm154_vm0, %v2231_v52 }
 0x101   :  { %v2223_v57 = vpop.permute.xlu1 %2222 }
 0x102   :  { %v2116_v58 = vpop.permute.xlu0 %2115  ;;  %2796 = vmatprep.mubr.msk.f32.mxu1 %vm141_vm1, %v2223_v57 }
 0x103   :  { %2789 = vmatmul.mubr.msk.f32.vlgmr.msra.gmra.mrb[4].mxu0 %vm141_vm1, %v2116_v58 }
 0x105   :  { %v2118_v59 = vpop.permute.xlu1 %2117 }
 0x106   :  { %v2225_v60 = vpop.permute.xlu0 %2224  ;;  %2791 = vmatprep.mubr.msk.f32.mxu0 %vm141_vm1, %v2118_v59 }
 0x107   :  { %2797 = vmatmul.mubr.msk.f32.vlgmr.msra.gmra.mrb[4].mxu1 %vm141_vm1, %v2225_v60 }
 0x109   :  { %v2227_v61 = vpop.permute.xlu1 %2226 }
 0x10a   :  { %v2120_v62 = vpop.permute.xlu0 %2119  ;;  %2799 = vmatprep.mubr.msk.f32.mxu1 %vm141_vm1, %v2227_v61 }
 0x10b   :  { %2792 = vmatmul.mubr.msk.f32.gmra.mrb[6].mxu0 %vm141_vm1, %v2120_v62 }
 0x10e   :  { %v2229_v63 = vpop.permute.xlu0 %2228 }
 0x10f   :  { %2800 = vmatmul.mubr.msk.f32.gmra.mrb[6].mxu1 %vm141_vm1, %v2229_v63 }
 0x1c3   :  { %v2774_v0 = vpop.f32.mrb[0].mxu0 }
 0x1c4   :  { %v1981_v1 = vpop.f32.mrb[1].mxu0 }
 0x1c7   :  { %v2777_v2 = vpop.f32.mrb[2].mxu0 }
 0x1c8   :  { %v1991_v3 = vpop.f32.mrb[3].mxu0 }
 0x1ca   :  { %v2782_v4 = vpop.f32.mrb[0].mxu1 }
 0x1cb   :  { %v2090_v5 = vpop.f32.mrb[1].mxu1 }
 0x1ce   :  { %v2785_v6 = vpop.f32.mrb[2].mxu1 }
 0x1cf   :  { %v2100_v7 = vpop.f32.mrb[3].mxu1 }
 0x1d6   :  { %v2790_v8 = vpop.f32.mrb[4].mxu0 }
 0x1d7   :  { %2353 = vrot.lane.b32.xlu0 %v2790_v8, %s2879_s2  ;;  %v2199_v9 = vpop.f32.mrb[5].mxu0 }
 0x1d8   :  { %2351 = vrot.lane.b32.xlu1 %v2199_v9, %s2879_s2 }
 0x1da   :  { %v2798_v10 = vpop.f32.mrb[4].mxu1 }
 0x1db   :  { %v2308_v11 = vpop.f32.mrb[5].mxu1 }
 0x1de   :  { %v2793_v12 = vpop.f32.mrb[6].mxu0 }
 0x1df   :  { %2357 = vrot.lane.b32.xlu0 %v2793_v12, %s2879_s2  ;;  %v2209_v13 = vpop.f32.mrb[7].mxu0 }
 0x1e0   :  { %2355 = vrot.lane.b32.xlu1 %v2209_v13, %s2879_s2 }
 0x1e2   :  { %v2801_v14 = vpop.f32.mrb[6].mxu1 }
 0x1e3   :  { %v2318_v15 = vpop.f32.mrb[7].mxu1  ;;  %2337 = vrot.lane.b32.xlu0 %v2782_v4, %s2880_s21 }
 0x1e4   :  { %2335 = vrot.lane.b32.xlu1 %v2090_v5, %s2880_s21 }
 0x1e7   :  { %2341 = vrot.lane.b32.xlu0 %v2785_v6, %s2880_s21 }
 0x1e8   :  { %2339 = vrot.lane.b32.xlu1 %v2100_v7, %s2880_s21 }
 0x1eb   :  { %2369 = vrot.lane.b32.xlu0 %v2798_v10, %s2881_s23 }
 0x1ec   :  { %2367 = vrot.lane.b32.xlu1 %v2308_v11, %s2881_s23 }
 0x1ef   :  { %2373 = vrot.lane.b32.xlu0 %v2801_v14, %s2881_s23 }
 0x1f0   :  { %2371 = vrot.lane.b32.xlu1 %v2318_v15, %s2881_s23 }
 0x249   :  { %v2354_v16 = vpop.permute.xlu0 %2353 }
 0x24a   :  { %v2352_v17 = vpop.permute.xlu1 %2351 }
 0x251   :  { %v2358_v18 = vpop.permute.xlu0 %2357 }
 0x252   :  { %v2356_v19 = vpop.permute.xlu1 %2355 }
 0x255   :  { %v2338_v20 = vpop.permute.xlu0 %2337 }
 0x256   :  { %v2336_v21 = vpop.permute.xlu1 %2335  ;;  %v2381_v23 = vsel %vm2379_vm4, %v2774_v0, %v2338_v20 }
 0x257   :  { %v2380_v25 = vsel %vm2379_vm4, %v1981_v1, %v2336_v21  ;;  %v2386_v27 = vsel %vm2384_vm5, %v2381_v23, %v2354_v16 }
 0x258   :  { %v2385_v31 = vsel %vm2384_vm5, %v2380_v25, %v2352_v17 }
 0x259   :  { %v2342_v22 = vpop.permute.xlu0 %2341 }
 0x25a   :  { %v2340_v24 = vpop.permute.xlu1 %2339  ;;  %v2383_v29 = vsel %vm2379_vm4, %v2777_v2, %v2342_v22 }
 0x25b   :  { %v2382_v34 = vsel %vm2379_vm4, %v1991_v3, %v2340_v24  ;;  %v2388_v39 = vsel %vm2384_vm5, %v2383_v29, %v2358_v18 }
 0x25c   :  { %v2387_v40 = vsel %vm2384_vm5, %v2382_v34, %v2356_v19 }
 0x25d   :  { %v2370_v28 = vpop.permute.xlu0 %2369 }
 0x25e   :  { %v2391_v30 = vsel %vm2389_vm6, %v2386_v27, %v2370_v28  ;;  %v2368_v33 = vpop.permute.xlu1 %2367 }
 0x25f   :  { %v2402_v35 = vadd.f32 %v2541_v26, %v2391_v30  ;;  %v2390_v32 = vsel %vm2389_vm6, %v2385_v31, %v2368_v33 }
 0x260   :  { %v2401_v37 = vadd.f32 %v2541_v26, %v2390_v32 }
 0x261   :  { %vm2406_vm8 = vcmp.ge.f32.partialorder %v2402_v35, 0.0  ;;  %v2410_v38 = vmul.f32 0.1, %v2402_v35  ;;  %v2374_v36 = vpop.permute.xlu0 %2373 }
 0x262   :  { %vm2405_vm9 = vcmp.ge.f32.partialorder %v2401_v37, 0.0  ;;  %v2409_v42 = vmul.f32 0.1, %v2401_v37  ;;  %v2393_v41 = vsel %vm2389_vm6, %v2388_v39, %v2374_v36  ;;  %v2372_v43 = vpop.permute.xlu1 %2371 }
 0x263   :  { %v2414_v44 = vsel %vm2406_vm8, %v2402_v35, %v2410_v38  ;;  %v2404_v46 = vadd.f32 %v2541_v26, %v2393_v41  ;;  %v2392_v48 = vsel %vm2389_vm6, %v2387_v40, %v2372_v43 }
 0x264   :  { %2419 = vst.msk [vmem:[%s3284_s4 + $0x8] sm:$0xff] %vm2417_vm7, %v2414_v44  ;;  %v2413_v49 = vsel %vm2405_vm9, %v2401_v37, %v2409_v42  ;;  %v2403_v50 = vadd.f32 %v2541_v26, %v2392_v48 }
 0x265   :  { %2418 = vst.msk [vmem:[%s3284_s4] sm:$0xff] %vm2417_vm7, %v2413_v49  ;;  %vm2408_vm10 = vcmp.ge.f32.partialorder %v2404_v46, 0.0  ;;  %v2412_v47 = vmul.f32 0.1, %v2404_v46 }
 0x266   :  { %vm2407_vm11 = vcmp.ge.f32.partialorder %v2403_v50, 0.0  ;;  %v2411_v51 = vmul.f32 0.1, %v2403_v50 }
 0x267   :  { %v2416_v45 = vsel %vm2408_vm10, %v2404_v46, %v2412_v47 }
 0x268   :  { %2421 = vst.msk [vmem:[%s3284_s4 + $0x18] sm:$0xff] %vm2417_vm7, %v2416_v45  ;;  %v2415_v53 = vsel %vm2407_vm11, %v2403_v50, %v2411_v51 }
 0x269   :  { %2420 = vst.msk [vmem:[%s3284_s4 + $0x10] sm:$0xff] %vm2417_vm7, %v2415_v53 }

</bundles_post_ra>
